<compile_context>
chip_gen: v7x
topology: tpu7x:2x2x1
jax: 0.10.0
libtpu: 0.0.40
codegen_flags: <defaults>
</compile_context>

<pallas_src>
import math
import functools

import jax
import jax.numpy as jnp
from jax.experimental import pallas as pl
from jax.experimental.pallas import tpu as pltpu  # noqa: F401


# ----------------------------- configs ------------------------------------
class Configs:
    seq_len = 16
    pred_len = 16
    d_model = 32
    enc_in = 4
    c_out = 4
    e_layers = 2
    patch_len = 8
    stride = 8
    dropout = 0.0          # dropout layers are identity (inference / p=0)


_SQRT_HALF = 0.7071067811865476
_LN_EPS = 1e-5
_REVIN_EPS = 1e-5


# --------------------------- in-kernel math --------------------------------
def _erf(x):
    # Abramowitz & Stegun 7.1.26 rational approximation (|err| <= 1.5e-7),
    # within f32 roundoff of torch's exact erf-based GELU.
    a1, a2, a3, a4, a5 = (0.254829592, -0.284496736, 1.421413741,
                          -1.453152027, 1.061405429)
    p = 0.3275911
    sgn = jnp.where(x >= 0.0, 1.0, -1.0)
    xa = jnp.abs(x)
    t = 1.0 / (1.0 + p * xa)
    poly = ((((a5 * t + a4) * t + a3) * t + a2) * t + a1) * t
    return sgn * (1.0 - poly * jnp.exp(-xa * xa))


def _gelu(x):
    # exact (erf-based) GELU, matching torch.nn.GELU()
    return 0.5 * x * (1.0 + _erf(x * _SQRT_HALF))


def _autocorr_like_torch(blocks):
    """Replicates torch's S_Correction transform on the patch axis:
       rfft(x, norm='ortho') -> X*conj(X) -> irfft(default n = 2*(bins-1),
       'backward' norm) -> clamp(min=0).
       `blocks` is the list of n per-patch [N, D] tiles; n is tiny (3), so this
       is just a few VPU ops and the constants are baked in at trace time."""
    n = len(blocks)
    assert n >= 2
    m = n // 2 + 1            # rfft bins
    n_out = 2 * (m - 1)       # torch's default irfft length (NOT n!)
    powers = []
    for k in range(m):
        re = jnp.zeros_like(blocks[0])
        im = jnp.zeros_like(blocks[0])
        for j, xj in enumerate(blocks):
            ang = 2.0 * math.pi * k * j / n
            re = re + xj * math.cos(ang)
            im = im - xj * math.sin(ang)
        powers.append((re * re + im * im) * (1.0 / n))   # 'ortho' norm -> /n
    acs = []
    for t in range(n_out):
        acc = powers[0]
        for k in range(1, m - 1):
            acc = acc + (2.0 * math.cos(2.0 * math.pi * k * t / n_out)) * powers[k]
        acc = acc + math.cos(math.pi * t) * powers[m - 1]   # bin m-1 as Nyquist
        acs.append(jnp.maximum(acc * (1.0 / n_out), 0.0))   # 'backward' + clamp
    return acs


# ------------------------------ fused kernel --------------------------------
def _umixer_kernel(x_ref, rw_ref, rb_ref,
                   plw_ref, plb_ref,
                   wen_ref, ben_ref, weo_ref, beo_ref,
                   tw1_ref, tb1_ref, tw2_ref, tb2_ref, tlg_ref, tlb_ref,
                   cw1_ref, cb1_ref, cw2_ref, cb2_ref, clg_ref, clb_ref,
                   avg_ref, rep_ref, nlg_ref, nlb_ref,
                   cmw_ref, cmb_ref, hw_ref, hb_ref,
                   y_ref, *, d_model, n_patches_old):
    D = d_model
    PD_old = n_patches_old * D
    K = tw1_ref.shape[0]                 # surviving mixer pairs (= e_layers+1)

    x = x_ref[...]                                           # [N, L] raw series

    # ---- RevIN 'norm' (biased variance, eps inside the sqrt, affine)
    mean = jnp.mean(x, axis=-1, keepdims=True)               # [N, 1]
    var = jnp.mean(jnp.square(x - mean), axis=-1, keepdims=True)
    stdev = jnp.sqrt(var + _REVIN_EPS)
    xn = (x - mean) / stdev * rw_ref[...] + rb_ref[...]      # [N, L]

    # ---- predict_linear(seq_len -> seq_len + pred_len)
    xp = jnp.dot(xn, plw_ref[...],
                 preferred_element_type=jnp.float32) + plb_ref[...]      # [N, L+T]

    # ---- patching + value embedding + positional embedding (one matmul each)
    X = jnp.dot(xp, wen_ref[...],
                preferred_element_type=jnp.float32) + ben_ref[...]       # [N, P*D]
    Xold = jnp.dot(x, weo_ref[...],
                   preferred_element_type=jnp.float32) + beo_ref[...]    # [N, Po*D]

    avg = avg_ref[...]                                       # [P*D, P*D] block avg
    avg_old = avg_ref[:PD_old, :PD_old]                      # [Po*D, Po*D]

    def block_ln(z, g, b, avg_m):
        # LayerNorm over each d_model block of the lane-concatenated layout,
        # with the per-block mean / variance broadcast done on the MXU.
        mu = jnp.dot(z, avg_m, preferred_element_type=jnp.float32)
        zc = z - mu
        v = jnp.dot(zc * zc, avg_m, preferred_element_type=jnp.float32)
        return zc * jax.lax.rsqrt(v + _LN_EPS) * g + b

    # ---- surviving mixer chain (see dead-code note in the header)
    for k in range(K):
        # tempolMix_CI_pat: block-diagonal Linear(D,D) -> GELU -> Linear(D,D),
        # residual, LayerNorm(d_model)
        h = _gelu(jnp.dot(X, tw1_ref[k],
                          preferred_element_type=jnp.float32) + tb1_ref[k])
        z = jnp.dot(h, tw2_ref[k],
                    preferred_element_type=jnp.float32) + tb2_ref[k]
        X = block_ln(z + X, tlg_ref[k], tlb_ref[k], avg)

        # channelMix_CI_pat: per-d_model Linear(P,P) x2 packed as diagonal-block
        # dense [P*D, P*D] matrices -> MXU, residual, LayerNorm(d_model)
        h = _gelu(jnp.dot(X, cw1_ref[k],
                          preferred_element_type=jnp.float32) + cb1_ref[k])
        z = jnp.dot(h, cw2_ref[k],
                    preferred_element_type=jnp.float32) + cb2_ref[k]
        X = block_ln(z + X, clg_ref[k], clb_ref[k], avg)

    # ---- comb Linear(e_layers -> 1): only slot 0 nonzero -> scale + bias
    Xc = X * cmw_ref[...] + cmb_ref[...]                      # [N, P*D]

    # ---- S_Correction on layer_norm(x_old) vs layer_norm(comb[:, :P_old])
    ln_old = block_ln(Xold, nlg_ref[...], nlb_ref[...], avg_old)
    ln_new = block_ln(Xc[:, :PD_old], nlg_ref[...], nlb_ref[...], avg_old)

    old_blocks = [ln_old[:, j * D:(j + 1) * D] for j in range(n_patches_old)]
    new_blocks = [ln_new[:, j * D:(j + 1) * D] for j in range(n_patches_old)]
    ac_old = _autocorr_like_torch(old_blocks)
    ac_new = _autocorr_like_torch(new_blocks)
    num = None
    den = None
    for a, b in zip(ac_old, ac_new):
        num = a * b if num is None else num + a * b
        den = b * b if den is None else den + b * b
    alpha_sqrt = jnp.sqrt(num / (den + 0.001))                # [N, D]

    # broadcast alpha across the patch-concatenated lanes via a replication
    # matmul (keeps the VALU free and avoids in-kernel lane concatenation)
    alpha_t = jnp.dot(alpha_sqrt, rep_ref[...],
                      preferred_element_type=jnp.float32)     # [N, P*D]

    # ---- Flatten_Head: one [N, P*D] @ [P*D, T] matmul
    y = jnp.dot(Xc * alpha_t, hw_ref[...],
                preferred_element_type=jnp.float32) + hb_ref[...]        # [N, T]

    # ---- RevIN 'denorm' (standard RevIN: (y - b) / (w + eps^2) * stdev + mean)
    y = (y - rb_ref[...]) / (rw_ref[...] + _REVIN_EPS * _REVIN_EPS)
    y = y * stdev + mean
    y_ref[...] = y


# ---------------------------- host-side packing ------------------------------
def positional_embedding(d_model, length):
    position = jnp.arange(length, dtype=jnp.float32)[:, None]
    div_term = jnp.exp(jnp.arange(0, d_model, 2, dtype=jnp.float32)
                       * -(math.log(10000.0) / d_model))
    pe = jnp.zeros((length, d_model), jnp.float32)
    pe = pe.at[:, 0::2].set(jnp.sin(position * div_term))
    pe = pe.at[:, 1::2].set(jnp.cos(position * div_term))
    return pe


def num_patches(length, cfg):
    return (length + cfg.stride - cfg.patch_len) // cfg.stride + 1


def _patch_embed_matrix(val_w, series_len, n_patches, stride, d_model):
    """ReplicationPad1d((0, stride)) + unfold(patch_len, stride) +
       Linear(patch_len, d_model, bias=False) folded into one
       [series_len, n_patches*d_model] matrix (pad taps accumulate onto the
       last time-step row, replicating the right-edge padding)."""
    plen = val_w.shape[0]
    W = jnp.zeros((series_len, n_patches * d_model), jnp.float32)
    for p in range(n_patches):
        for j in range(plen):
            t = p * stride + j
            row = min(t, series_len - 1)
            W = W.at[row, p * d_model:(p + 1) * d_model].add(val_w[j])
    return W


def _block_diag(blocks):
    """[G, Din, Dout] -> [G*Din, G*Dout] block-diagonal."""
    G, D1, D2 = blocks.shape
    out = jnp.zeros((G * D1, G * D2), jnp.float32)
    for g in range(G):
        out = out.at[g * D1:(g + 1) * D1, g * D2:(g + 1) * D2].set(blocks[g])
    return out


def _channel_block_matrix(w):
    """Per-d_model Linear(P,P) (torch weight layout [p_out, p_in, d]) packed as
       a dense [P*D, P*D] matrix with M[p_in*D+d, p_out*D+d] = w[p_out, p_in, d]."""
    P_, _, D_ = w.shape
    M = jnp.zeros((P_ * D_, P_ * D_), jnp.float32)
    didx = jnp.arange(D_)
    for po in range(P_):
        for pi in range(P_):
            M = M.at[pi * D_ + didx, po * D_ + didx].set(w[po, pi])
    return M


def init_params(cfg, key):
    D = cfg.d_model
    P = int((cfg.pred_len + cfg.seq_len - cfg.patch_len) / cfg.stride + 2)
    it = iter(jax.random.split(key, 128))

    def u(shape, fan_in):
        k = 1.0 / math.sqrt(fan_in)
        return jax.random.uniform(next(it), shape, jnp.float32, -k, k)

    def tempol_mixer():
        # per-patch Linear(D, D) x2 (weights stored as [D_in, D_out]) + LN(D)
        return dict(w1=u((P, D, D), D), b1=u((P, D), D),
                    w2=u((P, D, D), D), b2=u((P, D), D),
                    ln_g=jnp.ones((D,), jnp.float32),
                    ln_b=jnp.zeros((D,), jnp.float32))

    def channel_mixer():
        # per-d_model-channel Linear(P, P) x2, stored as [p_out, p_in, d] + LN(D)
        return dict(w1=u((P, P, D), P), b1=u((P, D), P),
                    w2=u((P, P, D), P), b2=u((P, D), P),
                    ln_g=jnp.ones((D,), jnp.float32),
                    ln_b=jnp.zeros((D,), jnp.float32))

    params = {
        'revin_w': jnp.ones((cfg.enc_in,), jnp.float32),
        'revin_b': jnp.zeros((cfg.enc_in,), jnp.float32),
        'pl_w': u((cfg.seq_len, cfg.seq_len + cfg.pred_len), cfg.seq_len),
        'pl_b': u((cfg.seq_len + cfg.pred_len,), cfg.seq_len),
        'val_w': u((cfg.patch_len, D), cfg.patch_len),       # value_embedding, no bias
        'norm_g': jnp.ones((D,), jnp.float32),
        'norm_b': jnp.zeros((D,), jnp.float32),
        'comb_w': u((1, cfg.e_layers), cfg.e_layers),
        'comb_b': u((1,), cfg.e_layers),
        'head_w': u((D * P, cfg.pred_len), D * P),
        'head_b': u((cfg.pred_len,), D * P),
        'temp_md': [tempol_mixer() for _ in range(cfg.e_layers)],
        'chan_md': [channel_mixer() for _ in range(cfg.e_layers)],
        'temp_mu': [tempol_mixer() for _ in range(cfg.e_layers)],
        'chan_mu': [channel_mixer() for _ in range(cfg.e_layers)],
    }
    return params


def pack_params(params, cfg):
    """Pack the weights used by the surviving encoder chain into kernel-ready
       block-diagonal / lane-concatenated layouts (all [.., P*D] with d_model
       contiguous per patch block)."""
    Lyr = cfg.e_layers
    D = cfg.d_model
    T = cfg.pred_len
    L = cfg.seq_len
    L_ext = cfg.seq_len + cfg.pred_len
    P = num_patches(L_ext, cfg)
    P_old = num_patches(L, cfg)
    PD = P * D
    assert P_old >= 2

    # execution order of the surviving mixer chain (see header dead-code note)
    t_seq = [params['temp_md'][Lyr - 1]] + [params['temp_mu'][j]
                                            for j in range(Lyr - 1, -1, -1)]
    c_seq = [params['chan_md'][Lyr - 1]] + [params['chan_mu'][j]
                                            for j in range(Lyr - 1, -1, -1)]

    def tile_ln(v):
        return jnp.tile(v, P).reshape(1, PD)

    pk = {
        'pl_w': params['pl_w'],
        'pl_b': params['pl_b'].reshape(1, L_ext),
        'w_emb_new': _patch_embed_matrix(params['val_w'], L_ext, P, cfg.stride, D),
        'b_emb_new': positional_embedding(D, P).reshape(1, PD),
        'w_emb_old': _patch_embed_matrix(params['val_w'], L, P_old, cfg.stride, D),
        'b_emb_old': positional_embedding(D, P_old).reshape(1, P_old * D),
        'tw1': jnp.stack([_block_diag(m['w1']) for m in t_seq]),
        'tb1': jnp.stack([m['b1'].reshape(1, PD) for m in t_seq]),
        'tw2': jnp.stack([_block_diag(m['w2']) for m in t_seq]),
        'tb2': jnp.stack([m['b2'].reshape(1, PD) for m in t_seq]),
        'tlg': jnp.stack([tile_ln(m['ln_g']) for m in t_seq]),
        'tlb': jnp.stack([tile_ln(m['ln_b']) for m in t_seq]),
        'cw1': jnp.stack([_channel_block_matrix(m['w1']) for m in c_seq]),
        'cb1': jnp.stack([m['b1'].reshape(1, PD) for m in c_seq]),
        'cw2': jnp.stack([_channel_block_matrix(m['w2']) for m in c_seq]),
        'cb2': jnp.stack([m['b2'].reshape(1, PD) for m in c_seq]),
        'clg': jnp.stack([tile_ln(m['ln_g']) for m in c_seq]),
        'clb': jnp.stack([tile_ln(m['ln_b']) for m in c_seq]),
        # block-averaging matrix for the in-kernel per-patch LayerNorm stats
        'avg': _block_diag(jnp.tile((jnp.ones((D, D), jnp.float32) / D)[None],
                                    (P, 1, 1))),
        # replication matrix: [N, D] alpha -> [N, P*D]
        'rep': jnp.tile(jnp.eye(D, dtype=jnp.float32), (1, P)),
        'nlg': jnp.tile(params['norm_g'], P_old).reshape(1, P_old * D),
        'nlb': jnp.tile(params['norm_b'], P_old).reshape(1, P_old * D),
        'comb_w': params['comb_w'][0:1, 0:1],                # scalar scale (slot 0)
        'comb_b': params['comb_b'].reshape(1, 1),
        # Flatten_Head weight reordered so row p*D+d matches the [N, P*D] layout
        # (torch flattens (D, P) d-major).
        'head_w': jnp.transpose(params['head_w'].reshape(D, P, T),
                                (1, 0, 2)).reshape(PD, T),
        'head_b': params['head_b'].reshape(1, T),
        'revin_w': params['revin_w'],
        'revin_b': params['revin_b'],
    }
    return pk


# ------------------------------- forward -------------------------------------
def forecast(pk, cfg, x_input):
    B, L, C = x_input.shape
    D = cfg.d_model
    T = cfg.pred_len
    N = B * C
    P_old = num_patches(cfg.seq_len, cfg)

    # layout plumbing only: channel-major rows for the kernel
    x2 = jnp.transpose(x_input, (0, 2, 1)).reshape(N, L)
    rw = jnp.tile(pk['revin_w'], B).reshape(N, 1)
    rb = jnp.tile(pk['revin_b'], B).reshape(N, 1)

    kernel = functools.partial(_umixer_kernel, d_model=D, n_patches_old=P_old)
    y = pl.pallas_call(
        kernel,
        out_shape=jax.ShapeDtypeStruct((N, T), jnp.float32),
    )(x2, rw, rb,
      pk['pl_w'], pk['pl_b'],
      pk['w_emb_new'], pk['b_emb_new'], pk['w_emb_old'], pk['b_emb_old'],
      pk['tw1'], pk['tb1'], pk['tw2'], pk['tb2'], pk['tlg'], pk['tlb'],
      pk['cw1'], pk['cb1'], pk['cw2'], pk['cb2'], pk['clg'], pk['clb'],
      pk['avg'], pk['rep'], pk['nlg'], pk['nlb'],
      pk['comb_w'], pk['comb_b'], pk['head_w'], pk['head_b'])

    # [N, T] -> [B, pred_len, C]  (the reference's final slice is an identity)
    return jnp.transpose(y.reshape(B, C, T), (0, 2, 1))


def forward(pk, cfg, x_input, x_mark_input=None, dec_inp=None,
            batch_y_mark=None, mask=None):
    return forecast(pk, cfg, x_input)


# --------------------------------- main --------------------------------------
if __name__ == "__main__":
    cfg = Configs()
    key = jax.random.PRNGKey(0)
    k_params, k_x = jax.random.split(key)
    params = init_params(cfg, k_params)
    packed = pack_params(params, cfg)

    B = 2
    x_input = jax.random.normal(k_x, (B, cfg.seq_len, cfg.enc_in), dtype=jnp.float32)
    x_mark_input = jnp.zeros((B, cfg.seq_len, 4), jnp.float32)   # unused, parity only

    fwd = jax.jit(lambda pk, x: forward(pk, cfg, x, x_mark_input))
    out = jax.block_until_ready(fwd(packed, x_input))

    assert out.shape == (B, cfg.pred_len, cfg.enc_in), out.shape
    assert bool(jnp.all(jnp.isfinite(out)))
    print("KERNEL_OK")
</pallas_src>

<mosaic_0001>
module attributes {stable_mosaic.version = 11 : i64} {
  func.func @_umixer_kernel(%arg0: memref<8x16xf32, #tpu.memory_space<vmem>>, %arg1: memref<8x1xf32, #tpu.memory_space<vmem>>, %arg2: memref<8x1xf32, #tpu.memory_space<vmem>>, %arg3: memref<16x32xf32, #tpu.memory_space<vmem>>, %arg4: memref<1x32xf32, #tpu.memory_space<vmem>>, %arg5: memref<32x160xf32, #tpu.memory_space<vmem>>, %arg6: memref<1x160xf32, #tpu.memory_space<vmem>>, %arg7: memref<16x96xf32, #tpu.memory_space<vmem>>, %arg8: memref<1x96xf32, #tpu.memory_space<vmem>>, %arg9: memref<3x160x160xf32, #tpu.memory_space<vmem>>, %arg10: memref<3x1x160xf32, #tpu.memory_space<vmem>>, %arg11: memref<3x160x160xf32, #tpu.memory_space<vmem>>, %arg12: memref<3x1x160xf32, #tpu.memory_space<vmem>>, %arg13: memref<3x1x160xf32, #tpu.memory_space<vmem>>, %arg14: memref<3x1x160xf32, #tpu.memory_space<vmem>>, %arg15: memref<3x160x160xf32, #tpu.memory_space<vmem>>, %arg16: memref<3x1x160xf32, #tpu.memory_space<vmem>>, %arg17: memref<3x160x160xf32, #tpu.memory_space<vmem>>, %arg18: memref<3x1x160xf32, #tpu.memory_space<vmem>>, %arg19: memref<3x1x160xf32, #tpu.memory_space<vmem>>, %arg20: memref<3x1x160xf32, #tpu.memory_space<vmem>>, %arg21: memref<160x160xf32, #tpu.memory_space<vmem>>, %arg22: memref<32x160xf32, #tpu.memory_space<vmem>>, %arg23: memref<1x96xf32, #tpu.memory_space<vmem>>, %arg24: memref<1x96xf32, #tpu.memory_space<vmem>>, %arg25: memref<1x1xf32, #tpu.memory_space<vmem>>, %arg26: memref<1x1xf32, #tpu.memory_space<vmem>>, %arg27: memref<160x16xf32, #tpu.memory_space<vmem>>, %arg28: memref<1x16xf32, #tpu.memory_space<vmem>>, %arg29: memref<8x16xf32, #tpu.memory_space<vmem>>) attributes {dimension_semantics = [], scalar_prefetch = 0 : i64, scratch_operands = 0 : i64, tpu.core_type = #tpu.core_type<tc>} {
    %c0 = arith.constant 0 : index
    %c0_0 = arith.constant 0 : index
    %0 = vector.load %arg0[%c0, %c0_0] : memref<8x16xf32, #tpu.memory_space<vmem>>, vector<8x16xf32>
    %cst = arith.constant dense<0.000000e+00> : vector<8xf32>
    %1 = vector.multi_reduction <add>, %0, %cst [1] : vector<8x16xf32> to vector<8xf32>
    %2 = vector.shape_cast %1 : vector<8xf32> to vector<8x1xf32>
    %cst_1 = arith.constant 1.600000e+01 : f32
    %3 = vector.broadcast %cst_1 : f32 to vector<8x1xf32>
    %4 = arith.divf %2, %3 : vector<8x1xf32>
    %5 = vector.broadcast %4 : vector<8x1xf32> to vector<8x16xf32>
    %6 = arith.subf %0, %5 : vector<8x16xf32>
    %7 = arith.mulf %6, %6 : vector<8x16xf32>
    %cst_2 = arith.constant dense<0.000000e+00> : vector<8xf32>
    %8 = vector.multi_reduction <add>, %7, %cst_2 [1] : vector<8x16xf32> to vector<8xf32>
    %9 = vector.shape_cast %8 : vector<8xf32> to vector<8x1xf32>
    %cst_3 = arith.constant 1.600000e+01 : f32
    %10 = vector.broadcast %cst_3 : f32 to vector<8x1xf32>
    %11 = arith.divf %9, %10 : vector<8x1xf32>
    %cst_4 = arith.constant 9.99999974E-6 : f32
    %12 = vector.broadcast %cst_4 : f32 to vector<8x1xf32>
    %13 = arith.addf %11, %12 : vector<8x1xf32>
    %14 = math.sqrt %13 : vector<8x1xf32>
    %15 = vector.broadcast %4 : vector<8x1xf32> to vector<8x16xf32>
    %16 = arith.subf %0, %15 : vector<8x16xf32>
    %17 = vector.broadcast %14 : vector<8x1xf32> to vector<8x16xf32>
    %18 = arith.divf %16, %17 : vector<8x16xf32>
    %c0_5 = arith.constant 0 : index
    %c0_6 = arith.constant 0 : index
    %19 = vector.load %arg1[%c0_5, %c0_6] : memref<8x1xf32, #tpu.memory_space<vmem>>, vector<8x1xf32>
    %20 = vector.broadcast %19 : vector<8x1xf32> to vector<8x16xf32>
    %21 = arith.mulf %18, %20 : vector<8x16xf32>
    %c0_7 = arith.constant 0 : index
    %c0_8 = arith.constant 0 : index
    %22 = vector.load %arg2[%c0_7, %c0_8] : memref<8x1xf32, #tpu.memory_space<vmem>>, vector<8x1xf32>
    %23 = vector.broadcast %22 : vector<8x1xf32> to vector<8x16xf32>
    %24 = arith.addf %21, %23 : vector<8x16xf32>
    %c0_9 = arith.constant 0 : index
    %c0_10 = arith.constant 0 : index
    %25 = vector.load %arg3[%c0_9, %c0_10] : memref<16x32xf32, #tpu.memory_space<vmem>>, vector<16x32xf32>
    %cst_11 = arith.constant dense<0.000000e+00> : vector<8x32xf32>
    %26 = tpu.matmul %24, %25, %cst_11 {dimension_numbers = #tpu.dot_dimension_numbers<[1], [0], [0], [1], [0, 0, 1, 1], [], []>} : vector<8x16xf32>, vector<16x32xf32>, vector<8x32xf32> -> vector<8x32xf32>
    %c0_12 = arith.constant 0 : index
    %c0_13 = arith.constant 0 : index
    %27 = vector.load %arg4[%c0_12, %c0_13] : memref<1x32xf32, #tpu.memory_space<vmem>>, vector<1x32xf32>
    %28 = vector.broadcast %27 : vector<1x32xf32> to vector<8x32xf32>
    %29 = arith.addf %26, %28 : vector<8x32xf32>
    %c0_14 = arith.constant 0 : index
    %c0_15 = arith.constant 0 : index
    %30 = vector.load %arg5[%c0_14, %c0_15] : memref<32x160xf32, #tpu.memory_space<vmem>>, vector<32x160xf32>
    %cst_16 = arith.constant dense<0.000000e+00> : vector<8x160xf32>
    %31 = tpu.matmul %29, %30, %cst_16 {dimension_numbers = #tpu.dot_dimension_numbers<[1], [0], [0], [1], [0, 0, 1, 1], [], []>} : vector<8x32xf32>, vector<32x160xf32>, vector<8x160xf32> -> vector<8x160xf32>
    %c0_17 = arith.constant 0 : index
    %c0_18 = arith.constant 0 : index
    %32 = vector.load %arg6[%c0_17, %c0_18] : memref<1x160xf32, #tpu.memory_space<vmem>>, vector<1x160xf32>
    %33 = vector.broadcast %32 : vector<1x160xf32> to vector<8x160xf32>
    %34 = arith.addf %31, %33 : vector<8x160xf32>
    %c0_19 = arith.constant 0 : index
    %c0_20 = arith.constant 0 : index
    %35 = vector.load %arg7[%c0_19, %c0_20] : memref<16x96xf32, #tpu.memory_space<vmem>>, vector<16x96xf32>
    %cst_21 = arith.constant dense<0.000000e+00> : vector<8x96xf32>
    %36 = tpu.matmul %0, %35, %cst_21 {dimension_numbers = #tpu.dot_dimension_numbers<[1], [0], [0], [1], [0, 0, 1, 1], [], []>} : vector<8x16xf32>, vector<16x96xf32>, vector<8x96xf32> -> vector<8x96xf32>
    %c0_22 = arith.constant 0 : index
    %c0_23 = arith.constant 0 : index
    %37 = vector.load %arg8[%c0_22, %c0_23] : memref<1x96xf32, #tpu.memory_space<vmem>>, vector<1x96xf32>
    %38 = vector.broadcast %37 : vector<1x96xf32> to vector<8x96xf32>
    %39 = arith.addf %36, %38 : vector<8x96xf32>
    %c0_24 = arith.constant 0 : index
    %c0_25 = arith.constant 0 : index
    %40 = vector.load %arg21[%c0_24, %c0_25] : memref<160x160xf32, #tpu.memory_space<vmem>>, vector<160x160xf32>
    %c0_26 = arith.constant 0 : index
    %c0_27 = arith.constant 0 : index
    %41 = vector.load %arg21[%c0_26, %c0_27] : memref<160x160xf32, #tpu.memory_space<vmem>>, vector<96x96xf32>
    %c0_28 = arith.constant 0 : index
    %c0_29 = arith.constant 0 : index
    %c0_30 = arith.constant 0 : index
    %42 = vector.load %arg9[%c0_28, %c0_29, %c0_30] : memref<3x160x160xf32, #tpu.memory_space<vmem>>, vector<1x160x160xf32>
    %43 = vector.shape_cast %42 : vector<1x160x160xf32> to vector<160x160xf32>
    %cst_31 = arith.constant dense<0.000000e+00> : vector<8x160xf32>
    %44 = tpu.matmul %34, %43, %cst_31 {dimension_numbers = #tpu.dot_dimension_numbers<[1], [0], [0], [1], [0, 0, 1, 1], [], []>} : vector<8x160xf32>, vector<160x160xf32>, vector<8x160xf32> -> vector<8x160xf32>
    %c0_32 = arith.constant 0 : index
    %c0_33 = arith.constant 0 : index
    %c0_34 = arith.constant 0 : index
    %45 = vector.load %arg10[%c0_32, %c0_33, %c0_34] : memref<3x1x160xf32, #tpu.memory_space<vmem>>, vector<1x1x160xf32>
    %46 = vector.shape_cast %45 : vector<1x1x160xf32> to vector<1x160xf32>
    %47 = vector.broadcast %46 : vector<1x160xf32> to vector<8x160xf32>
    %48 = arith.addf %44, %47 : vector<8x160xf32>
    %cst_35 = arith.constant 5.000000e-01 : f32
    %49 = vector.broadcast %cst_35 : f32 to vector<8x160xf32>
    %50 = arith.mulf %49, %48 : vector<8x160xf32>
    %cst_36 = arith.constant 0.707106769 : f32
    %51 = vector.broadcast %cst_36 : f32 to vector<8x160xf32>
    %52 = arith.mulf %48, %51 : vector<8x160xf32>
    %cst_37 = arith.constant 0.000000e+00 : f32
    %53 = vector.broadcast %cst_37 : f32 to vector<8x160xf32>
    %54 = arith.cmpf oge, %52, %53 : vector<8x160xf32>
    %cst_38 = arith.constant 1.000000e+00 : f32
    %cst_39 = arith.constant -1.000000e+00 : f32
    %55 = vector.broadcast %cst_38 : f32 to vector<8x160xf32>
    %56 = vector.broadcast %cst_39 : f32 to vector<8x160xf32>
    %57 = arith.select %54, %55, %56 : vector<8x160xi1>, vector<8x160xf32>
    %58 = math.absf %52 : vector<8x160xf32>
    %cst_40 = arith.constant 0.327591091 : f32
    %59 = vector.broadcast %cst_40 : f32 to vector<8x160xf32>
    %60 = arith.mulf %59, %58 : vector<8x160xf32>
    %cst_41 = arith.constant 1.000000e+00 : f32
    %61 = vector.broadcast %cst_41 : f32 to vector<8x160xf32>
    %62 = arith.addf %61, %60 : vector<8x160xf32>
    %cst_42 = arith.constant 1.000000e+00 : f32
    %63 = vector.broadcast %cst_42 : f32 to vector<8x160xf32>
    %64 = arith.divf %63, %62 : vector<8x160xf32>
    %cst_43 = arith.constant 1.06140542 : f32
    %65 = vector.broadcast %cst_43 : f32 to vector<8x160xf32>
    %66 = arith.mulf %65, %64 : vector<8x160xf32>
    %cst_44 = arith.constant -1.45315206 : f32
    %67 = vector.broadcast %cst_44 : f32 to vector<8x160xf32>
    %68 = arith.addf %66, %67 : vector<8x160xf32>
    %69 = arith.mulf %68, %64 : vector<8x160xf32>
    %cst_45 = arith.constant 1.42141378 : f32
    %70 = vector.broadcast %cst_45 : f32 to vector<8x160xf32>
    %71 = arith.addf %69, %70 : vector<8x160xf32>
    %72 = arith.mulf %71, %64 : vector<8x160xf32>
    %cst_46 = arith.constant -0.284496725 : f32
    %73 = vector.broadcast %cst_46 : f32 to vector<8x160xf32>
    %74 = arith.addf %72, %73 : vector<8x160xf32>
    %75 = arith.mulf %74, %64 : vector<8x160xf32>
    %cst_47 = arith.constant 0.254829586 : f32
    %76 = vector.broadcast %cst_47 : f32 to vector<8x160xf32>
    %77 = arith.addf %75, %76 : vector<8x160xf32>
    %78 = arith.mulf %77, %64 : vector<8x160xf32>
    %cst_48 = arith.constant 0.000000e+00 : f32
    %79 = vector.broadcast %cst_48 : f32 to vector<8x160xf32>
    %80 = arith.subf %79, %58 : vector<8x160xf32>
    %81 = arith.mulf %80, %58 : vector<8x160xf32>
    %82 = math.exp %81 : vector<8x160xf32>
    %83 = arith.mulf %78, %82 : vector<8x160xf32>
    %cst_49 = arith.constant 1.000000e+00 : f32
    %84 = vector.broadcast %cst_49 : f32 to vector<8x160xf32>
    %85 = arith.subf %84, %83 : vector<8x160xf32>
    %86 = arith.mulf %57, %85 : vector<8x160xf32>
    %cst_50 = arith.constant 1.000000e+00 : f32
    %87 = vector.broadcast %cst_50 : f32 to vector<8x160xf32>
    %88 = arith.addf %87, %86 : vector<8x160xf32>
    %89 = arith.mulf %50, %88 : vector<8x160xf32>
    %c0_51 = arith.constant 0 : index
    %c0_52 = arith.constant 0 : index
    %c0_53 = arith.constant 0 : index
    %90 = vector.load %arg11[%c0_51, %c0_52, %c0_53] : memref<3x160x160xf32, #tpu.memory_space<vmem>>, vector<1x160x160xf32>
    %91 = vector.shape_cast %90 : vector<1x160x160xf32> to vector<160x160xf32>
    %cst_54 = arith.constant dense<0.000000e+00> : vector<8x160xf32>
    %92 = tpu.matmul %89, %91, %cst_54 {dimension_numbers = #tpu.dot_dimension_numbers<[1], [0], [0], [1], [0, 0, 1, 1], [], []>} : vector<8x160xf32>, vector<160x160xf32>, vector<8x160xf32> -> vector<8x160xf32>
    %c0_55 = arith.constant 0 : index
    %c0_56 = arith.constant 0 : index
    %c0_57 = arith.constant 0 : index
    %93 = vector.load %arg12[%c0_55, %c0_56, %c0_57] : memref<3x1x160xf32, #tpu.memory_space<vmem>>, vector<1x1x160xf32>
    %94 = vector.shape_cast %93 : vector<1x1x160xf32> to vector<1x160xf32>
    %95 = vector.broadcast %94 : vector<1x160xf32> to vector<8x160xf32>
    %96 = arith.addf %92, %95 : vector<8x160xf32>
    %97 = arith.addf %96, %34 : vector<8x160xf32>
    %c0_58 = arith.constant 0 : index
    %c0_59 = arith.constant 0 : index
    %c0_60 = arith.constant 0 : index
    %98 = vector.load %arg13[%c0_58, %c0_59, %c0_60] : memref<3x1x160xf32, #tpu.memory_space<vmem>>, vector<1x1x160xf32>
    %99 = vector.shape_cast %98 : vector<1x1x160xf32> to vector<1x160xf32>
    %c0_61 = arith.constant 0 : index
    %c0_62 = arith.constant 0 : index
    %c0_63 = arith.constant 0 : index
    %100 = vector.load %arg14[%c0_61, %c0_62, %c0_63] : memref<3x1x160xf32, #tpu.memory_space<vmem>>, vector<1x1x160xf32>
    %101 = vector.shape_cast %100 : vector<1x1x160xf32> to vector<1x160xf32>
    %cst_64 = arith.constant dense<0.000000e+00> : vector<8x160xf32>
    %102 = tpu.matmul %97, %40, %cst_64 {dimension_numbers = #tpu.dot_dimension_numbers<[1], [0], [0], [1], [0, 0, 1, 1], [], []>} : vector<8x160xf32>, vector<160x160xf32>, vector<8x160xf32> -> vector<8x160xf32>
    %103 = arith.subf %97, %102 : vector<8x160xf32>
    %104 = arith.mulf %103, %103 : vector<8x160xf32>
    %cst_65 = arith.constant dense<0.000000e+00> : vector<8x160xf32>
    %105 = tpu.matmul %104, %40, %cst_65 {dimension_numbers = #tpu.dot_dimension_numbers<[1], [0], [0], [1], [0, 0, 1, 1], [], []>} : vector<8x160xf32>, vector<160x160xf32>, vector<8x160xf32> -> vector<8x160xf32>
    %cst_66 = arith.constant 9.99999974E-6 : f32
    %106 = vector.broadcast %cst_66 : f32 to vector<8x160xf32>
    %107 = arith.addf %105, %106 : vector<8x160xf32>
    %108 = math.rsqrt %107 : vector<8x160xf32>
    %109 = arith.mulf %103, %108 : vector<8x160xf32>
    %110 = vector.broadcast %99 : vector<1x160xf32> to vector<8x160xf32>
    %111 = arith.mulf %109, %110 : vector<8x160xf32>
    %112 = vector.broadcast %101 : vector<1x160xf32> to vector<8x160xf32>
    %113 = arith.addf %111, %112 : vector<8x160xf32>
    %c0_67 = arith.constant 0 : index
    %c0_68 = arith.constant 0 : index
    %c0_69 = arith.constant 0 : index
    %114 = vector.load %arg15[%c0_67, %c0_68, %c0_69] : memref<3x160x160xf32, #tpu.memory_space<vmem>>, vector<1x160x160xf32>
    %115 = vector.shape_cast %114 : vector<1x160x160xf32> to vector<160x160xf32>
    %cst_70 = arith.constant dense<0.000000e+00> : vector<8x160xf32>
    %116 = tpu.matmul %113, %115, %cst_70 {dimension_numbers = #tpu.dot_dimension_numbers<[1], [0], [0], [1], [0, 0, 1, 1], [], []>} : vector<8x160xf32>, vector<160x160xf32>, vector<8x160xf32> -> vector<8x160xf32>
    %c0_71 = arith.constant 0 : index
    %c0_72 = arith.constant 0 : index
    %c0_73 = arith.constant 0 : index
    %117 = vector.load %arg16[%c0_71, %c0_72, %c0_73] : memref<3x1x160xf32, #tpu.memory_space<vmem>>, vector<1x1x160xf32>
    %118 = vector.shape_cast %117 : vector<1x1x160xf32> to vector<1x160xf32>
    %119 = vector.broadcast %118 : vector<1x160xf32> to vector<8x160xf32>
    %120 = arith.addf %116, %119 : vector<8x160xf32>
    %cst_74 = arith.constant 5.000000e-01 : f32
    %121 = vector.broadcast %cst_74 : f32 to vector<8x160xf32>
    %122 = arith.mulf %121, %120 : vector<8x160xf32>
    %cst_75 = arith.constant 0.707106769 : f32
    %123 = vector.broadcast %cst_75 : f32 to vector<8x160xf32>
    %124 = arith.mulf %120, %123 : vector<8x160xf32>
    %cst_76 = arith.constant 0.000000e+00 : f32
    %125 = vector.broadcast %cst_76 : f32 to vector<8x160xf32>
    %126 = arith.cmpf oge, %124, %125 : vector<8x160xf32>
    %cst_77 = arith.constant 1.000000e+00 : f32
    %cst_78 = arith.constant -1.000000e+00 : f32
    %127 = vector.broadcast %cst_77 : f32 to vector<8x160xf32>
    %128 = vector.broadcast %cst_78 : f32 to vector<8x160xf32>
    %129 = arith.select %126, %127, %128 : vector<8x160xi1>, vector<8x160xf32>
    %130 = math.absf %124 : vector<8x160xf32>
    %cst_79 = arith.constant 0.327591091 : f32
    %131 = vector.broadcast %cst_79 : f32 to vector<8x160xf32>
    %132 = arith.mulf %131, %130 : vector<8x160xf32>
    %cst_80 = arith.constant 1.000000e+00 : f32
    %133 = vector.broadcast %cst_80 : f32 to vector<8x160xf32>
    %134 = arith.addf %133, %132 : vector<8x160xf32>
    %cst_81 = arith.constant 1.000000e+00 : f32
    %135 = vector.broadcast %cst_81 : f32 to vector<8x160xf32>
    %136 = arith.divf %135, %134 : vector<8x160xf32>
    %cst_82 = arith.constant 1.06140542 : f32
    %137 = vector.broadcast %cst_82 : f32 to vector<8x160xf32>
    %138 = arith.mulf %137, %136 : vector<8x160xf32>
    %cst_83 = arith.constant -1.45315206 : f32
    %139 = vector.broadcast %cst_83 : f32 to vector<8x160xf32>
    %140 = arith.addf %138, %139 : vector<8x160xf32>
    %141 = arith.mulf %140, %136 : vector<8x160xf32>
    %cst_84 = arith.constant 1.42141378 : f32
    %142 = vector.broadcast %cst_84 : f32 to vector<8x160xf32>
    %143 = arith.addf %141, %142 : vector<8x160xf32>
    %144 = arith.mulf %143, %136 : vector<8x160xf32>
    %cst_85 = arith.constant -0.284496725 : f32
    %145 = vector.broadcast %cst_85 : f32 to vector<8x160xf32>
    %146 = arith.addf %144, %145 : vector<8x160xf32>
    %147 = arith.mulf %146, %136 : vector<8x160xf32>
    %cst_86 = arith.constant 0.254829586 : f32
    %148 = vector.broadcast %cst_86 : f32 to vector<8x160xf32>
    %149 = arith.addf %147, %148 : vector<8x160xf32>
    %150 = arith.mulf %149, %136 : vector<8x160xf32>
    %cst_87 = arith.constant 0.000000e+00 : f32
    %151 = vector.broadcast %cst_87 : f32 to vector<8x160xf32>
    %152 = arith.subf %151, %130 : vector<8x160xf32>
    %153 = arith.mulf %152, %130 : vector<8x160xf32>
    %154 = math.exp %153 : vector<8x160xf32>
    %155 = arith.mulf %150, %154 : vector<8x160xf32>
    %cst_88 = arith.constant 1.000000e+00 : f32
    %156 = vector.broadcast %cst_88 : f32 to vector<8x160xf32>
    %157 = arith.subf %156, %155 : vector<8x160xf32>
    %158 = arith.mulf %129, %157 : vector<8x160xf32>
    %cst_89 = arith.constant 1.000000e+00 : f32
    %159 = vector.broadcast %cst_89 : f32 to vector<8x160xf32>
    %160 = arith.addf %159, %158 : vector<8x160xf32>
    %161 = arith.mulf %122, %160 : vector<8x160xf32>
    %c0_90 = arith.constant 0 : index
    %c0_91 = arith.constant 0 : index
    %c0_92 = arith.constant 0 : index
    %162 = vector.load %arg17[%c0_90, %c0_91, %c0_92] : memref<3x160x160xf32, #tpu.memory_space<vmem>>, vector<1x160x160xf32>
    %163 = vector.shape_cast %162 : vector<1x160x160xf32> to vector<160x160xf32>
    %cst_93 = arith.constant dense<0.000000e+00> : vector<8x160xf32>
    %164 = tpu.matmul %161, %163, %cst_93 {dimension_numbers = #tpu.dot_dimension_numbers<[1], [0], [0], [1], [0, 0, 1, 1], [], []>} : vector<8x160xf32>, vector<160x160xf32>, vector<8x160xf32> -> vector<8x160xf32>
    %c0_94 = arith.constant 0 : index
    %c0_95 = arith.constant 0 : index
    %c0_96 = arith.constant 0 : index
    %165 = vector.load %arg18[%c0_94, %c0_95, %c0_96] : memref<3x1x160xf32, #tpu.memory_space<vmem>>, vector<1x1x160xf32>
    %166 = vector.shape_cast %165 : vector<1x1x160xf32> to vector<1x160xf32>
    %167 = vector.broadcast %166 : vector<1x160xf32> to vector<8x160xf32>
    %168 = arith.addf %164, %167 : vector<8x160xf32>
    %169 = arith.addf %168, %113 : vector<8x160xf32>
    %c0_97 = arith.constant 0 : index
    %c0_98 = arith.constant 0 : index
    %c0_99 = arith.constant 0 : index
    %170 = vector.load %arg19[%c0_97, %c0_98, %c0_99] : memref<3x1x160xf32, #tpu.memory_space<vmem>>, vector<1x1x160xf32>
    %171 = vector.shape_cast %170 : vector<1x1x160xf32> to vector<1x160xf32>
    %c0_100 = arith.constant 0 : index
    %c0_101 = arith.constant 0 : index
    %c0_102 = arith.constant 0 : index
    %172 = vector.load %arg20[%c0_100, %c0_101, %c0_102] : memref<3x1x160xf32, #tpu.memory_space<vmem>>, vector<1x1x160xf32>
    %173 = vector.shape_cast %172 : vector<1x1x160xf32> to vector<1x160xf32>
    %cst_103 = arith.constant dense<0.000000e+00> : vector<8x160xf32>
    %174 = tpu.matmul %169, %40, %cst_103 {dimension_numbers = #tpu.dot_dimension_numbers<[1], [0], [0], [1], [0, 0, 1, 1], [], []>} : vector<8x160xf32>, vector<160x160xf32>, vector<8x160xf32> -> vector<8x160xf32>
    %175 = arith.subf %169, %174 : vector<8x160xf32>
    %176 = arith.mulf %175, %175 : vector<8x160xf32>
    %cst_104 = arith.constant dense<0.000000e+00> : vector<8x160xf32>
    %177 = tpu.matmul %176, %40, %cst_104 {dimension_numbers = #tpu.dot_dimension_numbers<[1], [0], [0], [1], [0, 0, 1, 1], [], []>} : vector<8x160xf32>, vector<160x160xf32>, vector<8x160xf32> -> vector<8x160xf32>
    %cst_105 = arith.constant 9.99999974E-6 : f32
    %178 = vector.broadcast %cst_105 : f32 to vector<8x160xf32>
    %179 = arith.addf %177, %178 : vector<8x160xf32>
    %180 = math.rsqrt %179 : vector<8x160xf32>
    %181 = arith.mulf %175, %180 : vector<8x160xf32>
    %182 = vector.broadcast %171 : vector<1x160xf32> to vector<8x160xf32>
    %183 = arith.mulf %181, %182 : vector<8x160xf32>
    %184 = vector.broadcast %173 : vector<1x160xf32> to vector<8x160xf32>
    %185 = arith.addf %183, %184 : vector<8x160xf32>
    %c1 = arith.constant 1 : index
    %c0_106 = arith.constant 0 : index
    %c0_107 = arith.constant 0 : index
    %186 = vector.load %arg9[%c1, %c0_106, %c0_107] : memref<3x160x160xf32, #tpu.memory_space<vmem>>, vector<1x160x160xf32>
    %187 = vector.shape_cast %186 : vector<1x160x160xf32> to vector<160x160xf32>
    %cst_108 = arith.constant dense<0.000000e+00> : vector<8x160xf32>
    %188 = tpu.matmul %185, %187, %cst_108 {dimension_numbers = #tpu.dot_dimension_numbers<[1], [0], [0], [1], [0, 0, 1, 1], [], []>} : vector<8x160xf32>, vector<160x160xf32>, vector<8x160xf32> -> vector<8x160xf32>
    %c1_109 = arith.constant 1 : index
    %c0_110 = arith.constant 0 : index
    %c0_111 = arith.constant 0 : index
    %189 = vector.load %arg10[%c1_109, %c0_110, %c0_111] : memref<3x1x160xf32, #tpu.memory_space<vmem>>, vector<1x1x160xf32>
    %190 = vector.shape_cast %189 : vector<1x1x160xf32> to vector<1x160xf32>
    %191 = vector.broadcast %190 : vector<1x160xf32> to vector<8x160xf32>
    %192 = arith.addf %188, %191 : vector<8x160xf32>
    %cst_112 = arith.constant 5.000000e-01 : f32
    %193 = vector.broadcast %cst_112 : f32 to vector<8x160xf32>
    %194 = arith.mulf %193, %192 : vector<8x160xf32>
    %cst_113 = arith.constant 0.707106769 : f32
    %195 = vector.broadcast %cst_113 : f32 to vector<8x160xf32>
    %196 = arith.mulf %192, %195 : vector<8x160xf32>
    %cst_114 = arith.constant 0.000000e+00 : f32
    %197 = vector.broadcast %cst_114 : f32 to vector<8x160xf32>
    %198 = arith.cmpf oge, %196, %197 : vector<8x160xf32>
    %cst_115 = arith.constant 1.000000e+00 : f32
    %cst_116 = arith.constant -1.000000e+00 : f32
    %199 = vector.broadcast %cst_115 : f32 to vector<8x160xf32>
    %200 = vector.broadcast %cst_116 : f32 to vector<8x160xf32>
    %201 = arith.select %198, %199, %200 : vector<8x160xi1>, vector<8x160xf32>
    %202 = math.absf %196 : vector<8x160xf32>
    %cst_117 = arith.constant 0.327591091 : f32
    %203 = vector.broadcast %cst_117 : f32 to vector<8x160xf32>
    %204 = arith.mulf %203, %202 : vector<8x160xf32>
    %cst_118 = arith.constant 1.000000e+00 : f32
    %205 = vector.broadcast %cst_118 : f32 to vector<8x160xf32>
    %206 = arith.addf %205, %204 : vector<8x160xf32>
    %cst_119 = arith.constant 1.000000e+00 : f32
    %207 = vector.broadcast %cst_119 : f32 to vector<8x160xf32>
    %208 = arith.divf %207, %206 : vector<8x160xf32>
    %cst_120 = arith.constant 1.06140542 : f32
    %209 = vector.broadcast %cst_120 : f32 to vector<8x160xf32>
    %210 = arith.mulf %209, %208 : vector<8x160xf32>
    %cst_121 = arith.constant -1.45315206 : f32
    %211 = vector.broadcast %cst_121 : f32 to vector<8x160xf32>
    %212 = arith.addf %210, %211 : vector<8x160xf32>
    %213 = arith.mulf %212, %208 : vector<8x160xf32>
    %cst_122 = arith.constant 1.42141378 : f32
    %214 = vector.broadcast %cst_122 : f32 to vector<8x160xf32>
    %215 = arith.addf %213, %214 : vector<8x160xf32>
    %216 = arith.mulf %215, %208 : vector<8x160xf32>
    %cst_123 = arith.constant -0.284496725 : f32
    %217 = vector.broadcast %cst_123 : f32 to vector<8x160xf32>
    %218 = arith.addf %216, %217 : vector<8x160xf32>
    %219 = arith.mulf %218, %208 : vector<8x160xf32>
    %cst_124 = arith.constant 0.254829586 : f32
    %220 = vector.broadcast %cst_124 : f32 to vector<8x160xf32>
    %221 = arith.addf %219, %220 : vector<8x160xf32>
    %222 = arith.mulf %221, %208 : vector<8x160xf32>
    %cst_125 = arith.constant 0.000000e+00 : f32
    %223 = vector.broadcast %cst_125 : f32 to vector<8x160xf32>
    %224 = arith.subf %223, %202 : vector<8x160xf32>
    %225 = arith.mulf %224, %202 : vector<8x160xf32>
    %226 = math.exp %225 : vector<8x160xf32>
    %227 = arith.mulf %222, %226 : vector<8x160xf32>
    %cst_126 = arith.constant 1.000000e+00 : f32
    %228 = vector.broadcast %cst_126 : f32 to vector<8x160xf32>
    %229 = arith.subf %228, %227 : vector<8x160xf32>
    %230 = arith.mulf %201, %229 : vector<8x160xf32>
    %cst_127 = arith.constant 1.000000e+00 : f32
    %231 = vector.broadcast %cst_127 : f32 to vector<8x160xf32>
    %232 = arith.addf %231, %230 : vector<8x160xf32>
    %233 = arith.mulf %194, %232 : vector<8x160xf32>
    %c1_128 = arith.constant 1 : index
    %c0_129 = arith.constant 0 : index
    %c0_130 = arith.constant 0 : index
    %234 = vector.load %arg11[%c1_128, %c0_129, %c0_130] : memref<3x160x160xf32, #tpu.memory_space<vmem>>, vector<1x160x160xf32>
    %235 = vector.shape_cast %234 : vector<1x160x160xf32> to vector<160x160xf32>
    %cst_131 = arith.constant dense<0.000000e+00> : vector<8x160xf32>
    %236 = tpu.matmul %233, %235, %cst_131 {dimension_numbers = #tpu.dot_dimension_numbers<[1], [0], [0], [1], [0, 0, 1, 1], [], []>} : vector<8x160xf32>, vector<160x160xf32>, vector<8x160xf32> -> vector<8x160xf32>
    %c1_132 = arith.constant 1 : index
    %c0_133 = arith.constant 0 : index
    %c0_134 = arith.constant 0 : index
    %237 = vector.load %arg12[%c1_132, %c0_133, %c0_134] : memref<3x1x160xf32, #tpu.memory_space<vmem>>, vector<1x1x160xf32>
    %238 = vector.shape_cast %237 : vector<1x1x160xf32> to vector<1x160xf32>
    %239 = vector.broadcast %238 : vector<1x160xf32> to vector<8x160xf32>
    %240 = arith.addf %236, %239 : vector<8x160xf32>
    %241 = arith.addf %240, %185 : vector<8x160xf32>
    %c1_135 = arith.constant 1 : index
    %c0_136 = arith.constant 0 : index
    %c0_137 = arith.constant 0 : index
    %242 = vector.load %arg13[%c1_135, %c0_136, %c0_137] : memref<3x1x160xf32, #tpu.memory_space<vmem>>, vector<1x1x160xf32>
    %243 = vector.shape_cast %242 : vector<1x1x160xf32> to vector<1x160xf32>
    %c1_138 = arith.constant 1 : index
    %c0_139 = arith.constant 0 : index
    %c0_140 = arith.constant 0 : index
    %244 = vector.load %arg14[%c1_138, %c0_139, %c0_140] : memref<3x1x160xf32, #tpu.memory_space<vmem>>, vector<1x1x160xf32>
    %245 = vector.shape_cast %244 : vector<1x1x160xf32> to vector<1x160xf32>
    %cst_141 = arith.constant dense<0.000000e+00> : vector<8x160xf32>
    %246 = tpu.matmul %241, %40, %cst_141 {dimension_numbers = #tpu.dot_dimension_numbers<[1], [0], [0], [1], [0, 0, 1, 1], [], []>} : vector<8x160xf32>, vector<160x160xf32>, vector<8x160xf32> -> vector<8x160xf32>
    %247 = arith.subf %241, %246 : vector<8x160xf32>
    %248 = arith.mulf %247, %247 : vector<8x160xf32>
    %cst_142 = arith.constant dense<0.000000e+00> : vector<8x160xf32>
    %249 = tpu.matmul %248, %40, %cst_142 {dimension_numbers = #tpu.dot_dimension_numbers<[1], [0], [0], [1], [0, 0, 1, 1], [], []>} : vector<8x160xf32>, vector<160x160xf32>, vector<8x160xf32> -> vector<8x160xf32>
    %cst_143 = arith.constant 9.99999974E-6 : f32
    %250 = vector.broadcast %cst_143 : f32 to vector<8x160xf32>
    %251 = arith.addf %249, %250 : vector<8x160xf32>
    %252 = math.rsqrt %251 : vector<8x160xf32>
    %253 = arith.mulf %247, %252 : vector<8x160xf32>
    %254 = vector.broadcast %243 : vector<1x160xf32> to vector<8x160xf32>
    %255 = arith.mulf %253, %254 : vector<8x160xf32>
    %256 = vector.broadcast %245 : vector<1x160xf32> to vector<8x160xf32>
    %257 = arith.addf %255, %256 : vector<8x160xf32>
    %c1_144 = arith.constant 1 : index
    %c0_145 = arith.constant 0 : index
    %c0_146 = arith.constant 0 : index
    %258 = vector.load %arg15[%c1_144, %c0_145, %c0_146] : memref<3x160x160xf32, #tpu.memory_space<vmem>>, vector<1x160x160xf32>
    %259 = vector.shape_cast %258 : vector<1x160x160xf32> to vector<160x160xf32>
    %cst_147 = arith.constant dense<0.000000e+00> : vector<8x160xf32>
    %260 = tpu.matmul %257, %259, %cst_147 {dimension_numbers = #tpu.dot_dimension_numbers<[1], [0], [0], [1], [0, 0, 1, 1], [], []>} : vector<8x160xf32>, vector<160x160xf32>, vector<8x160xf32> -> vector<8x160xf32>
    %c1_148 = arith.constant 1 : index
    %c0_149 = arith.constant 0 : index
    %c0_150 = arith.constant 0 : index
    %261 = vector.load %arg16[%c1_148, %c0_149, %c0_150] : memref<3x1x160xf32, #tpu.memory_space<vmem>>, vector<1x1x160xf32>
    %262 = vector.shape_cast %261 : vector<1x1x160xf32> to vector<1x160xf32>
    %263 = vector.broadcast %262 : vector<1x160xf32> to vector<8x160xf32>
    %264 = arith.addf %260, %263 : vector<8x160xf32>
    %cst_151 = arith.constant 5.000000e-01 : f32
    %265 = vector.broadcast %cst_151 : f32 to vector<8x160xf32>
    %266 = arith.mulf %265, %264 : vector<8x160xf32>
    %cst_152 = arith.constant 0.707106769 : f32
    %267 = vector.broadcast %cst_152 : f32 to vector<8x160xf32>
    %268 = arith.mulf %264, %267 : vector<8x160xf32>
    %cst_153 = arith.constant 0.000000e+00 : f32
    %269 = vector.broadcast %cst_153 : f32 to vector<8x160xf32>
    %270 = arith.cmpf oge, %268, %269 : vector<8x160xf32>
    %cst_154 = arith.constant 1.000000e+00 : f32
    %cst_155 = arith.constant -1.000000e+00 : f32
    %271 = vector.broadcast %cst_154 : f32 to vector<8x160xf32>
    %272 = vector.broadcast %cst_155 : f32 to vector<8x160xf32>
    %273 = arith.select %270, %271, %272 : vector<8x160xi1>, vector<8x160xf32>
    %274 = math.absf %268 : vector<8x160xf32>
    %cst_156 = arith.constant 0.327591091 : f32
    %275 = vector.broadcast %cst_156 : f32 to vector<8x160xf32>
    %276 = arith.mulf %275, %274 : vector<8x160xf32>
    %cst_157 = arith.constant 1.000000e+00 : f32
    %277 = vector.broadcast %cst_157 : f32 to vector<8x160xf32>
    %278 = arith.addf %277, %276 : vector<8x160xf32>
    %cst_158 = arith.constant 1.000000e+00 : f32
    %279 = vector.broadcast %cst_158 : f32 to vector<8x160xf32>
    %280 = arith.divf %279, %278 : vector<8x160xf32>
    %cst_159 = arith.constant 1.06140542 : f32
    %281 = vector.broadcast %cst_159 : f32 to vector<8x160xf32>
    %282 = arith.mulf %281, %280 : vector<8x160xf32>
    %cst_160 = arith.constant -1.45315206 : f32
    %283 = vector.broadcast %cst_160 : f32 to vector<8x160xf32>
    %284 = arith.addf %282, %283 : vector<8x160xf32>
    %285 = arith.mulf %284, %280 : vector<8x160xf32>
    %cst_161 = arith.constant 1.42141378 : f32
    %286 = vector.broadcast %cst_161 : f32 to vector<8x160xf32>
    %287 = arith.addf %285, %286 : vector<8x160xf32>
    %288 = arith.mulf %287, %280 : vector<8x160xf32>
    %cst_162 = arith.constant -0.284496725 : f32
    %289 = vector.broadcast %cst_162 : f32 to vector<8x160xf32>
    %290 = arith.addf %288, %289 : vector<8x160xf32>
    %291 = arith.mulf %290, %280 : vector<8x160xf32>
    %cst_163 = arith.constant 0.254829586 : f32
    %292 = vector.broadcast %cst_163 : f32 to vector<8x160xf32>
    %293 = arith.addf %291, %292 : vector<8x160xf32>
    %294 = arith.mulf %293, %280 : vector<8x160xf32>
    %cst_164 = arith.constant 0.000000e+00 : f32
    %295 = vector.broadcast %cst_164 : f32 to vector<8x160xf32>
    %296 = arith.subf %295, %274 : vector<8x160xf32>
    %297 = arith.mulf %296, %274 : vector<8x160xf32>
    %298 = math.exp %297 : vector<8x160xf32>
    %299 = arith.mulf %294, %298 : vector<8x160xf32>
    %cst_165 = arith.constant 1.000000e+00 : f32
    %300 = vector.broadcast %cst_165 : f32 to vector<8x160xf32>
    %301 = arith.subf %300, %299 : vector<8x160xf32>
    %302 = arith.mulf %273, %301 : vector<8x160xf32>
    %cst_166 = arith.constant 1.000000e+00 : f32
    %303 = vector.broadcast %cst_166 : f32 to vector<8x160xf32>
    %304 = arith.addf %303, %302 : vector<8x160xf32>
    %305 = arith.mulf %266, %304 : vector<8x160xf32>
    %c1_167 = arith.constant 1 : index
    %c0_168 = arith.constant 0 : index
    %c0_169 = arith.constant 0 : index
    %306 = vector.load %arg17[%c1_167, %c0_168, %c0_169] : memref<3x160x160xf32, #tpu.memory_space<vmem>>, vector<1x160x160xf32>
    %307 = vector.shape_cast %306 : vector<1x160x160xf32> to vector<160x160xf32>
    %cst_170 = arith.constant dense<0.000000e+00> : vector<8x160xf32>
    %308 = tpu.matmul %305, %307, %cst_170 {dimension_numbers = #tpu.dot_dimension_numbers<[1], [0], [0], [1], [0, 0, 1, 1], [], []>} : vector<8x160xf32>, vector<160x160xf32>, vector<8x160xf32> -> vector<8x160xf32>
    %c1_171 = arith.constant 1 : index
    %c0_172 = arith.constant 0 : index
    %c0_173 = arith.constant 0 : index
    %309 = vector.load %arg18[%c1_171, %c0_172, %c0_173] : memref<3x1x160xf32, #tpu.memory_space<vmem>>, vector<1x1x160xf32>
    %310 = vector.shape_cast %309 : vector<1x1x160xf32> to vector<1x160xf32>
    %311 = vector.broadcast %310 : vector<1x160xf32> to vector<8x160xf32>
    %312 = arith.addf %308, %311 : vector<8x160xf32>
    %313 = arith.addf %312, %257 : vector<8x160xf32>
    %c1_174 = arith.constant 1 : index
    %c0_175 = arith.constant 0 : index
    %c0_176 = arith.constant 0 : index
    %314 = vector.load %arg19[%c1_174, %c0_175, %c0_176] : memref<3x1x160xf32, #tpu.memory_space<vmem>>, vector<1x1x160xf32>
    %315 = vector.shape_cast %314 : vector<1x1x160xf32> to vector<1x160xf32>
    %c1_177 = arith.constant 1 : index
    %c0_178 = arith.constant 0 : index
    %c0_179 = arith.constant 0 : index
    %316 = vector.load %arg20[%c1_177, %c0_178, %c0_179] : memref<3x1x160xf32, #tpu.memory_space<vmem>>, vector<1x1x160xf32>
    %317 = vector.shape_cast %316 : vector<1x1x160xf32> to vector<1x160xf32>
    %cst_180 = arith.constant dense<0.000000e+00> : vector<8x160xf32>
    %318 = tpu.matmul %313, %40, %cst_180 {dimension_numbers = #tpu.dot_dimension_numbers<[1], [0], [0], [1], [0, 0, 1, 1], [], []>} : vector<8x160xf32>, vector<160x160xf32>, vector<8x160xf32> -> vector<8x160xf32>
    %319 = arith.subf %313, %318 : vector<8x160xf32>
    %320 = arith.mulf %319, %319 : vector<8x160xf32>
    %cst_181 = arith.constant dense<0.000000e+00> : vector<8x160xf32>
    %321 = tpu.matmul %320, %40, %cst_181 {dimension_numbers = #tpu.dot_dimension_numbers<[1], [0], [0], [1], [0, 0, 1, 1], [], []>} : vector<8x160xf32>, vector<160x160xf32>, vector<8x160xf32> -> vector<8x160xf32>
    %cst_182 = arith.constant 9.99999974E-6 : f32
    %322 = vector.broadcast %cst_182 : f32 to vector<8x160xf32>
    %323 = arith.addf %321, %322 : vector<8x160xf32>
    %324 = math.rsqrt %323 : vector<8x160xf32>
    %325 = arith.mulf %319, %324 : vector<8x160xf32>
    %326 = vector.broadcast %315 : vector<1x160xf32> to vector<8x160xf32>
    %327 = arith.mulf %325, %326 : vector<8x160xf32>
    %328 = vector.broadcast %317 : vector<1x160xf32> to vector<8x160xf32>
    %329 = arith.addf %327, %328 : vector<8x160xf32>
    %c2 = arith.constant 2 : index
    %c0_183 = arith.constant 0 : index
    %c0_184 = arith.constant 0 : index
    %330 = vector.load %arg9[%c2, %c0_183, %c0_184] : memref<3x160x160xf32, #tpu.memory_space<vmem>>, vector<1x160x160xf32>
    %331 = vector.shape_cast %330 : vector<1x160x160xf32> to vector<160x160xf32>
    %cst_185 = arith.constant dense<0.000000e+00> : vector<8x160xf32>
    %332 = tpu.matmul %329, %331, %cst_185 {dimension_numbers = #tpu.dot_dimension_numbers<[1], [0], [0], [1], [0, 0, 1, 1], [], []>} : vector<8x160xf32>, vector<160x160xf32>, vector<8x160xf32> -> vector<8x160xf32>
    %c2_186 = arith.constant 2 : index
    %c0_187 = arith.constant 0 : index
    %c0_188 = arith.constant 0 : index
    %333 = vector.load %arg10[%c2_186, %c0_187, %c0_188] : memref<3x1x160xf32, #tpu.memory_space<vmem>>, vector<1x1x160xf32>
    %334 = vector.shape_cast %333 : vector<1x1x160xf32> to vector<1x160xf32>
    %335 = vector.broadcast %334 : vector<1x160xf32> to vector<8x160xf32>
    %336 = arith.addf %332, %335 : vector<8x160xf32>
    %cst_189 = arith.constant 5.000000e-01 : f32
    %337 = vector.broadcast %cst_189 : f32 to vector<8x160xf32>
    %338 = arith.mulf %337, %336 : vector<8x160xf32>
    %cst_190 = arith.constant 0.707106769 : f32
    %339 = vector.broadcast %cst_190 : f32 to vector<8x160xf32>
    %340 = arith.mulf %336, %339 : vector<8x160xf32>
    %cst_191 = arith.constant 0.000000e+00 : f32
    %341 = vector.broadcast %cst_191 : f32 to vector<8x160xf32>
    %342 = arith.cmpf oge, %340, %341 : vector<8x160xf32>
    %cst_192 = arith.constant 1.000000e+00 : f32
    %cst_193 = arith.constant -1.000000e+00 : f32
    %343 = vector.broadcast %cst_192 : f32 to vector<8x160xf32>
    %344 = vector.broadcast %cst_193 : f32 to vector<8x160xf32>
    %345 = arith.select %342, %343, %344 : vector<8x160xi1>, vector<8x160xf32>
    %346 = math.absf %340 : vector<8x160xf32>
    %cst_194 = arith.constant 0.327591091 : f32
    %347 = vector.broadcast %cst_194 : f32 to vector<8x160xf32>
    %348 = arith.mulf %347, %346 : vector<8x160xf32>
    %cst_195 = arith.constant 1.000000e+00 : f32
    %349 = vector.broadcast %cst_195 : f32 to vector<8x160xf32>
    %350 = arith.addf %349, %348 : vector<8x160xf32>
    %cst_196 = arith.constant 1.000000e+00 : f32
    %351 = vector.broadcast %cst_196 : f32 to vector<8x160xf32>
    %352 = arith.divf %351, %350 : vector<8x160xf32>
    %cst_197 = arith.constant 1.06140542 : f32
    %353 = vector.broadcast %cst_197 : f32 to vector<8x160xf32>
    %354 = arith.mulf %353, %352 : vector<8x160xf32>
    %cst_198 = arith.constant -1.45315206 : f32
    %355 = vector.broadcast %cst_198 : f32 to vector<8x160xf32>
    %356 = arith.addf %354, %355 : vector<8x160xf32>
    %357 = arith.mulf %356, %352 : vector<8x160xf32>
    %cst_199 = arith.constant 1.42141378 : f32
    %358 = vector.broadcast %cst_199 : f32 to vector<8x160xf32>
    %359 = arith.addf %357, %358 : vector<8x160xf32>
    %360 = arith.mulf %359, %352 : vector<8x160xf32>
    %cst_200 = arith.constant -0.284496725 : f32
    %361 = vector.broadcast %cst_200 : f32 to vector<8x160xf32>
    %362 = arith.addf %360, %361 : vector<8x160xf32>
    %363 = arith.mulf %362, %352 : vector<8x160xf32>
    %cst_201 = arith.constant 0.254829586 : f32
    %364 = vector.broadcast %cst_201 : f32 to vector<8x160xf32>
    %365 = arith.addf %363, %364 : vector<8x160xf32>
    %366 = arith.mulf %365, %352 : vector<8x160xf32>
    %cst_202 = arith.constant 0.000000e+00 : f32
    %367 = vector.broadcast %cst_202 : f32 to vector<8x160xf32>
    %368 = arith.subf %367, %346 : vector<8x160xf32>
    %369 = arith.mulf %368, %346 : vector<8x160xf32>
    %370 = math.exp %369 : vector<8x160xf32>
    %371 = arith.mulf %366, %370 : vector<8x160xf32>
    %cst_203 = arith.constant 1.000000e+00 : f32
    %372 = vector.broadcast %cst_203 : f32 to vector<8x160xf32>
    %373 = arith.subf %372, %371 : vector<8x160xf32>
    %374 = arith.mulf %345, %373 : vector<8x160xf32>
    %cst_204 = arith.constant 1.000000e+00 : f32
    %375 = vector.broadcast %cst_204 : f32 to vector<8x160xf32>
    %376 = arith.addf %375, %374 : vector<8x160xf32>
    %377 = arith.mulf %338, %376 : vector<8x160xf32>
    %c2_205 = arith.constant 2 : index
    %c0_206 = arith.constant 0 : index
    %c0_207 = arith.constant 0 : index
    %378 = vector.load %arg11[%c2_205, %c0_206, %c0_207] : memref<3x160x160xf32, #tpu.memory_space<vmem>>, vector<1x160x160xf32>
    %379 = vector.shape_cast %378 : vector<1x160x160xf32> to vector<160x160xf32>
    %cst_208 = arith.constant dense<0.000000e+00> : vector<8x160xf32>
    %380 = tpu.matmul %377, %379, %cst_208 {dimension_numbers = #tpu.dot_dimension_numbers<[1], [0], [0], [1], [0, 0, 1, 1], [], []>} : vector<8x160xf32>, vector<160x160xf32>, vector<8x160xf32> -> vector<8x160xf32>
    %c2_209 = arith.constant 2 : index
    %c0_210 = arith.constant 0 : index
    %c0_211 = arith.constant 0 : index
    %381 = vector.load %arg12[%c2_209, %c0_210, %c0_211] : memref<3x1x160xf32, #tpu.memory_space<vmem>>, vector<1x1x160xf32>
    %382 = vector.shape_cast %381 : vector<1x1x160xf32> to vector<1x160xf32>
    %383 = vector.broadcast %382 : vector<1x160xf32> to vector<8x160xf32>
    %384 = arith.addf %380, %383 : vector<8x160xf32>
    %385 = arith.addf %384, %329 : vector<8x160xf32>
    %c2_212 = arith.constant 2 : index
    %c0_213 = arith.constant 0 : index
    %c0_214 = arith.constant 0 : index
    %386 = vector.load %arg13[%c2_212, %c0_213, %c0_214] : memref<3x1x160xf32, #tpu.memory_space<vmem>>, vector<1x1x160xf32>
    %387 = vector.shape_cast %386 : vector<1x1x160xf32> to vector<1x160xf32>
    %c2_215 = arith.constant 2 : index
    %c0_216 = arith.constant 0 : index
    %c0_217 = arith.constant 0 : index
    %388 = vector.load %arg14[%c2_215, %c0_216, %c0_217] : memref<3x1x160xf32, #tpu.memory_space<vmem>>, vector<1x1x160xf32>
    %389 = vector.shape_cast %388 : vector<1x1x160xf32> to vector<1x160xf32>
    %cst_218 = arith.constant dense<0.000000e+00> : vector<8x160xf32>
    %390 = tpu.matmul %385, %40, %cst_218 {dimension_numbers = #tpu.dot_dimension_numbers<[1], [0], [0], [1], [0, 0, 1, 1], [], []>} : vector<8x160xf32>, vector<160x160xf32>, vector<8x160xf32> -> vector<8x160xf32>
    %391 = arith.subf %385, %390 : vector<8x160xf32>
    %392 = arith.mulf %391, %391 : vector<8x160xf32>
    %cst_219 = arith.constant dense<0.000000e+00> : vector<8x160xf32>
    %393 = tpu.matmul %392, %40, %cst_219 {dimension_numbers = #tpu.dot_dimension_numbers<[1], [0], [0], [1], [0, 0, 1, 1], [], []>} : vector<8x160xf32>, vector<160x160xf32>, vector<8x160xf32> -> vector<8x160xf32>
    %cst_220 = arith.constant 9.99999974E-6 : f32
    %394 = vector.broadcast %cst_220 : f32 to vector<8x160xf32>
    %395 = arith.addf %393, %394 : vector<8x160xf32>
    %396 = math.rsqrt %395 : vector<8x160xf32>
    %397 = arith.mulf %391, %396 : vector<8x160xf32>
    %398 = vector.broadcast %387 : vector<1x160xf32> to vector<8x160xf32>
    %399 = arith.mulf %397, %398 : vector<8x160xf32>
    %400 = vector.broadcast %389 : vector<1x160xf32> to vector<8x160xf32>
    %401 = arith.addf %399, %400 : vector<8x160xf32>
    %c2_221 = arith.constant 2 : index
    %c0_222 = arith.constant 0 : index
    %c0_223 = arith.constant 0 : index
    %402 = vector.load %arg15[%c2_221, %c0_222, %c0_223] : memref<3x160x160xf32, #tpu.memory_space<vmem>>, vector<1x160x160xf32>
    %403 = vector.shape_cast %402 : vector<1x160x160xf32> to vector<160x160xf32>
    %cst_224 = arith.constant dense<0.000000e+00> : vector<8x160xf32>
    %404 = tpu.matmul %401, %403, %cst_224 {dimension_numbers = #tpu.dot_dimension_numbers<[1], [0], [0], [1], [0, 0, 1, 1], [], []>} : vector<8x160xf32>, vector<160x160xf32>, vector<8x160xf32> -> vector<8x160xf32>
    %c2_225 = arith.constant 2 : index
    %c0_226 = arith.constant 0 : index
    %c0_227 = arith.constant 0 : index
    %405 = vector.load %arg16[%c2_225, %c0_226, %c0_227] : memref<3x1x160xf32, #tpu.memory_space<vmem>>, vector<1x1x160xf32>
    %406 = vector.shape_cast %405 : vector<1x1x160xf32> to vector<1x160xf32>
    %407 = vector.broadcast %406 : vector<1x160xf32> to vector<8x160xf32>
    %408 = arith.addf %404, %407 : vector<8x160xf32>
    %cst_228 = arith.constant 5.000000e-01 : f32
    %409 = vector.broadcast %cst_228 : f32 to vector<8x160xf32>
    %410 = arith.mulf %409, %408 : vector<8x160xf32>
    %cst_229 = arith.constant 0.707106769 : f32
    %411 = vector.broadcast %cst_229 : f32 to vector<8x160xf32>
    %412 = arith.mulf %408, %411 : vector<8x160xf32>
    %cst_230 = arith.constant 0.000000e+00 : f32
    %413 = vector.broadcast %cst_230 : f32 to vector<8x160xf32>
    %414 = arith.cmpf oge, %412, %413 : vector<8x160xf32>
    %cst_231 = arith.constant 1.000000e+00 : f32
    %cst_232 = arith.constant -1.000000e+00 : f32
    %415 = vector.broadcast %cst_231 : f32 to vector<8x160xf32>
    %416 = vector.broadcast %cst_232 : f32 to vector<8x160xf32>
    %417 = arith.select %414, %415, %416 : vector<8x160xi1>, vector<8x160xf32>
    %418 = math.absf %412 : vector<8x160xf32>
    %cst_233 = arith.constant 0.327591091 : f32
    %419 = vector.broadcast %cst_233 : f32 to vector<8x160xf32>
    %420 = arith.mulf %419, %418 : vector<8x160xf32>
    %cst_234 = arith.constant 1.000000e+00 : f32
    %421 = vector.broadcast %cst_234 : f32 to vector<8x160xf32>
    %422 = arith.addf %421, %420 : vector<8x160xf32>
    %cst_235 = arith.constant 1.000000e+00 : f32
    %423 = vector.broadcast %cst_235 : f32 to vector<8x160xf32>
    %424 = arith.divf %423, %422 : vector<8x160xf32>
    %cst_236 = arith.constant 1.06140542 : f32
    %425 = vector.broadcast %cst_236 : f32 to vector<8x160xf32>
    %426 = arith.mulf %425, %424 : vector<8x160xf32>
    %cst_237 = arith.constant -1.45315206 : f32
    %427 = vector.broadcast %cst_237 : f32 to vector<8x160xf32>
    %428 = arith.addf %426, %427 : vector<8x160xf32>
    %429 = arith.mulf %428, %424 : vector<8x160xf32>
    %cst_238 = arith.constant 1.42141378 : f32
    %430 = vector.broadcast %cst_238 : f32 to vector<8x160xf32>
    %431 = arith.addf %429, %430 : vector<8x160xf32>
    %432 = arith.mulf %431, %424 : vector<8x160xf32>
    %cst_239 = arith.constant -0.284496725 : f32
    %433 = vector.broadcast %cst_239 : f32 to vector<8x160xf32>
    %434 = arith.addf %432, %433 : vector<8x160xf32>
    %435 = arith.mulf %434, %424 : vector<8x160xf32>
    %cst_240 = arith.constant 0.254829586 : f32
    %436 = vector.broadcast %cst_240 : f32 to vector<8x160xf32>
    %437 = arith.addf %435, %436 : vector<8x160xf32>
    %438 = arith.mulf %437, %424 : vector<8x160xf32>
    %cst_241 = arith.constant 0.000000e+00 : f32
    %439 = vector.broadcast %cst_241 : f32 to vector<8x160xf32>
    %440 = arith.subf %439, %418 : vector<8x160xf32>
    %441 = arith.mulf %440, %418 : vector<8x160xf32>
    %442 = math.exp %441 : vector<8x160xf32>
    %443 = arith.mulf %438, %442 : vector<8x160xf32>
    %cst_242 = arith.constant 1.000000e+00 : f32
    %444 = vector.broadcast %cst_242 : f32 to vector<8x160xf32>
    %445 = arith.subf %444, %443 : vector<8x160xf32>
    %446 = arith.mulf %417, %445 : vector<8x160xf32>
    %cst_243 = arith.constant 1.000000e+00 : f32
    %447 = vector.broadcast %cst_243 : f32 to vector<8x160xf32>
    %448 = arith.addf %447, %446 : vector<8x160xf32>
    %449 = arith.mulf %410, %448 : vector<8x160xf32>
    %c2_244 = arith.constant 2 : index
    %c0_245 = arith.constant 0 : index
    %c0_246 = arith.constant 0 : index
    %450 = vector.load %arg17[%c2_244, %c0_245, %c0_246] : memref<3x160x160xf32, #tpu.memory_space<vmem>>, vector<1x160x160xf32>
    %451 = vector.shape_cast %450 : vector<1x160x160xf32> to vector<160x160xf32>
    %cst_247 = arith.constant dense<0.000000e+00> : vector<8x160xf32>
    %452 = tpu.matmul %449, %451, %cst_247 {dimension_numbers = #tpu.dot_dimension_numbers<[1], [0], [0], [1], [0, 0, 1, 1], [], []>} : vector<8x160xf32>, vector<160x160xf32>, vector<8x160xf32> -> vector<8x160xf32>
    %c2_248 = arith.constant 2 : index
    %c0_249 = arith.constant 0 : index
    %c0_250 = arith.constant 0 : index
    %453 = vector.load %arg18[%c2_248, %c0_249, %c0_250] : memref<3x1x160xf32, #tpu.memory_space<vmem>>, vector<1x1x160xf32>
    %454 = vector.shape_cast %453 : vector<1x1x160xf32> to vector<1x160xf32>
    %455 = vector.broadcast %454 : vector<1x160xf32> to vector<8x160xf32>
    %456 = arith.addf %452, %455 : vector<8x160xf32>
    %457 = arith.addf %456, %401 : vector<8x160xf32>
    %c2_251 = arith.constant 2 : index
    %c0_252 = arith.constant 0 : index
    %c0_253 = arith.constant 0 : index
    %458 = vector.load %arg19[%c2_251, %c0_252, %c0_253] : memref<3x1x160xf32, #tpu.memory_space<vmem>>, vector<1x1x160xf32>
    %459 = vector.shape_cast %458 : vector<1x1x160xf32> to vector<1x160xf32>
    %c2_254 = arith.constant 2 : index
    %c0_255 = arith.constant 0 : index
    %c0_256 = arith.constant 0 : index
    %460 = vector.load %arg20[%c2_254, %c0_255, %c0_256] : memref<3x1x160xf32, #tpu.memory_space<vmem>>, vector<1x1x160xf32>
    %461 = vector.shape_cast %460 : vector<1x1x160xf32> to vector<1x160xf32>
    %cst_257 = arith.constant dense<0.000000e+00> : vector<8x160xf32>
    %462 = tpu.matmul %457, %40, %cst_257 {dimension_numbers = #tpu.dot_dimension_numbers<[1], [0], [0], [1], [0, 0, 1, 1], [], []>} : vector<8x160xf32>, vector<160x160xf32>, vector<8x160xf32> -> vector<8x160xf32>
    %463 = arith.subf %457, %462 : vector<8x160xf32>
    %464 = arith.mulf %463, %463 : vector<8x160xf32>
    %cst_258 = arith.constant dense<0.000000e+00> : vector<8x160xf32>
    %465 = tpu.matmul %464, %40, %cst_258 {dimension_numbers = #tpu.dot_dimension_numbers<[1], [0], [0], [1], [0, 0, 1, 1], [], []>} : vector<8x160xf32>, vector<160x160xf32>, vector<8x160xf32> -> vector<8x160xf32>
    %cst_259 = arith.constant 9.99999974E-6 : f32
    %466 = vector.broadcast %cst_259 : f32 to vector<8x160xf32>
    %467 = arith.addf %465, %466 : vector<8x160xf32>
    %468 = math.rsqrt %467 : vector<8x160xf32>
    %469 = arith.mulf %463, %468 : vector<8x160xf32>
    %470 = vector.broadcast %459 : vector<1x160xf32> to vector<8x160xf32>
    %471 = arith.mulf %469, %470 : vector<8x160xf32>
    %472 = vector.broadcast %461 : vector<1x160xf32> to vector<8x160xf32>
    %473 = arith.addf %471, %472 : vector<8x160xf32>
    %c0_260 = arith.constant 0 : index
    %c0_261 = arith.constant 0 : index
    %474 = vector.load %arg25[%c0_260, %c0_261] : memref<1x1xf32, #tpu.memory_space<vmem>>, vector<1x1xf32>
    %475 = vector.broadcast %474 : vector<1x1xf32> to vector<8x160xf32>
    %476 = arith.mulf %473, %475 : vector<8x160xf32>
    %c0_262 = arith.constant 0 : index
    %c0_263 = arith.constant 0 : index
    %477 = vector.load %arg26[%c0_262, %c0_263] : memref<1x1xf32, #tpu.memory_space<vmem>>, vector<1x1xf32>
    %478 = vector.broadcast %477 : vector<1x1xf32> to vector<8x160xf32>
    %479 = arith.addf %476, %478 : vector<8x160xf32>
    %c0_264 = arith.constant 0 : index
    %c0_265 = arith.constant 0 : index
    %480 = vector.load %arg23[%c0_264, %c0_265] : memref<1x96xf32, #tpu.memory_space<vmem>>, vector<1x96xf32>
    %c0_266 = arith.constant 0 : index
    %c0_267 = arith.constant 0 : index
    %481 = vector.load %arg24[%c0_266, %c0_267] : memref<1x96xf32, #tpu.memory_space<vmem>>, vector<1x96xf32>
    %cst_268 = arith.constant dense<0.000000e+00> : vector<8x96xf32>
    %482 = tpu.matmul %39, %41, %cst_268 {dimension_numbers = #tpu.dot_dimension_numbers<[1], [0], [0], [1], [0, 0, 1, 1], [], []>} : vector<8x96xf32>, vector<96x96xf32>, vector<8x96xf32> -> vector<8x96xf32>
    %483 = arith.subf %39, %482 : vector<8x96xf32>
    %484 = arith.mulf %483, %483 : vector<8x96xf32>
    %cst_269 = arith.constant dense<0.000000e+00> : vector<8x96xf32>
    %485 = tpu.matmul %484, %41, %cst_269 {dimension_numbers = #tpu.dot_dimension_numbers<[1], [0], [0], [1], [0, 0, 1, 1], [], []>} : vector<8x96xf32>, vector<96x96xf32>, vector<8x96xf32> -> vector<8x96xf32>
    %cst_270 = arith.constant 9.99999974E-6 : f32
    %486 = vector.broadcast %cst_270 : f32 to vector<8x96xf32>
    %487 = arith.addf %485, %486 : vector<8x96xf32>
    %488 = math.rsqrt %487 : vector<8x96xf32>
    %489 = arith.mulf %483, %488 : vector<8x96xf32>
    %490 = vector.broadcast %480 : vector<1x96xf32> to vector<8x96xf32>
    %491 = arith.mulf %489, %490 : vector<8x96xf32>
    %492 = vector.broadcast %481 : vector<1x96xf32> to vector<8x96xf32>
    %493 = arith.addf %491, %492 : vector<8x96xf32>
    %494 = vector.extract_strided_slice %479 {offsets = [0, 0], sizes = [8, 96], strides = [1, 1]} : vector<8x160xf32> to vector<8x96xf32>
    %c0_271 = arith.constant 0 : index
    %c0_272 = arith.constant 0 : index
    %495 = vector.load %arg23[%c0_271, %c0_272] : memref<1x96xf32, #tpu.memory_space<vmem>>, vector<1x96xf32>
    %c0_273 = arith.constant 0 : index
    %c0_274 = arith.constant 0 : index
    %496 = vector.load %arg24[%c0_273, %c0_274] : memref<1x96xf32, #tpu.memory_space<vmem>>, vector<1x96xf32>
    %cst_275 = arith.constant dense<0.000000e+00> : vector<8x96xf32>
    %497 = tpu.matmul %494, %41, %cst_275 {dimension_numbers = #tpu.dot_dimension_numbers<[1], [0], [0], [1], [0, 0, 1, 1], [], []>} : vector<8x96xf32>, vector<96x96xf32>, vector<8x96xf32> -> vector<8x96xf32>
    %498 = arith.subf %494, %497 : vector<8x96xf32>
    %499 = arith.mulf %498, %498 : vector<8x96xf32>
    %cst_276 = arith.constant dense<0.000000e+00> : vector<8x96xf32>
    %500 = tpu.matmul %499, %41, %cst_276 {dimension_numbers = #tpu.dot_dimension_numbers<[1], [0], [0], [1], [0, 0, 1, 1], [], []>} : vector<8x96xf32>, vector<96x96xf32>, vector<8x96xf32> -> vector<8x96xf32>
    %cst_277 = arith.constant 9.99999974E-6 : f32
    %501 = vector.broadcast %cst_277 : f32 to vector<8x96xf32>
    %502 = arith.addf %500, %501 : vector<8x96xf32>
    %503 = math.rsqrt %502 : vector<8x96xf32>
    %504 = arith.mulf %498, %503 : vector<8x96xf32>
    %505 = vector.broadcast %495 : vector<1x96xf32> to vector<8x96xf32>
    %506 = arith.mulf %504, %505 : vector<8x96xf32>
    %507 = vector.broadcast %496 : vector<1x96xf32> to vector<8x96xf32>
    %508 = arith.addf %506, %507 : vector<8x96xf32>
    %509 = vector.extract_strided_slice %493 {offsets = [0, 0], sizes = [8, 32], strides = [1, 1]} : vector<8x96xf32> to vector<8x32xf32>
    %510 = vector.extract_strided_slice %493 {offsets = [0, 32], sizes = [8, 32], strides = [1, 1]} : vector<8x96xf32> to vector<8x32xf32>
    %511 = vector.extract_strided_slice %493 {offsets = [0, 64], sizes = [8, 32], strides = [1, 1]} : vector<8x96xf32> to vector<8x32xf32>
    %512 = vector.extract_strided_slice %508 {offsets = [0, 0], sizes = [8, 32], strides = [1, 1]} : vector<8x96xf32> to vector<8x32xf32>
    %513 = vector.extract_strided_slice %508 {offsets = [0, 32], sizes = [8, 32], strides = [1, 1]} : vector<8x96xf32> to vector<8x32xf32>
    %514 = vector.extract_strided_slice %508 {offsets = [0, 64], sizes = [8, 32], strides = [1, 1]} : vector<8x96xf32> to vector<8x32xf32>
    %cst_278 = arith.constant 0.000000e+00 : f32
    %515 = vector.broadcast %cst_278 : f32 to vector<8x32xf32>
    %cst_279 = arith.constant 0.000000e+00 : f32
    %516 = vector.broadcast %cst_279 : f32 to vector<8x32xf32>
    %cst_280 = arith.constant 1.000000e+00 : f32
    %517 = vector.broadcast %cst_280 : f32 to vector<8x32xf32>
    %518 = arith.mulf %509, %517 : vector<8x32xf32>
    %519 = arith.addf %515, %518 : vector<8x32xf32>
    %cst_281 = arith.constant 0.000000e+00 : f32
    %520 = vector.broadcast %cst_281 : f32 to vector<8x32xf32>
    %521 = arith.mulf %509, %520 : vector<8x32xf32>
    %522 = arith.subf %516, %521 : vector<8x32xf32>
    %cst_282 = arith.constant 1.000000e+00 : f32
    %523 = vector.broadcast %cst_282 : f32 to vector<8x32xf32>
    %524 = arith.mulf %510, %523 : vector<8x32xf32>
    %525 = arith.addf %519, %524 : vector<8x32xf32>
    %cst_283 = arith.constant 0.000000e+00 : f32
    %526 = vector.broadcast %cst_283 : f32 to vector<8x32xf32>
    %527 = arith.mulf %510, %526 : vector<8x32xf32>
    %528 = arith.subf %522, %527 : vector<8x32xf32>
    %cst_284 = arith.constant 1.000000e+00 : f32
    %529 = vector.broadcast %cst_284 : f32 to vector<8x32xf32>
    %530 = arith.mulf %511, %529 : vector<8x32xf32>
    %531 = arith.addf %525, %530 : vector<8x32xf32>
    %cst_285 = arith.constant 0.000000e+00 : f32
    %532 = vector.broadcast %cst_285 : f32 to vector<8x32xf32>
    %533 = arith.mulf %511, %532 : vector<8x32xf32>
    %534 = arith.subf %528, %533 : vector<8x32xf32>
    %535 = arith.mulf %531, %531 : vector<8x32xf32>
    %536 = arith.mulf %534, %534 : vector<8x32xf32>
    %537 = arith.addf %535, %536 : vector<8x32xf32>
    %cst_286 = arith.constant 0.333333343 : f32
    %538 = vector.broadcast %cst_286 : f32 to vector<8x32xf32>
    %539 = arith.mulf %537, %538 : vector<8x32xf32>
    %cst_287 = arith.constant 0.000000e+00 : f32
    %540 = vector.broadcast %cst_287 : f32 to vector<8x32xf32>
    %cst_288 = arith.constant 0.000000e+00 : f32
    %541 = vector.broadcast %cst_288 : f32 to vector<8x32xf32>
    %cst_289 = arith.constant 1.000000e+00 : f32
    %542 = vector.broadcast %cst_289 : f32 to vector<8x32xf32>
    %543 = arith.mulf %509, %542 : vector<8x32xf32>
    %544 = arith.addf %540, %543 : vector<8x32xf32>
    %cst_290 = arith.constant 0.000000e+00 : f32
    %545 = vector.broadcast %cst_290 : f32 to vector<8x32xf32>
    %546 = arith.mulf %509, %545 : vector<8x32xf32>
    %547 = arith.subf %541, %546 : vector<8x32xf32>
    %cst_291 = arith.constant -5.000000e-01 : f32
    %548 = vector.broadcast %cst_291 : f32 to vector<8x32xf32>
    %549 = arith.mulf %510, %548 : vector<8x32xf32>
    %550 = arith.addf %544, %549 : vector<8x32xf32>
    %cst_292 = arith.constant 0.866025388 : f32
    %551 = vector.broadcast %cst_292 : f32 to vector<8x32xf32>
    %552 = arith.mulf %510, %551 : vector<8x32xf32>
    %553 = arith.subf %547, %552 : vector<8x32xf32>
    %cst_293 = arith.constant -5.000000e-01 : f32
    %554 = vector.broadcast %cst_293 : f32 to vector<8x32xf32>
    %555 = arith.mulf %511, %554 : vector<8x32xf32>
    %556 = arith.addf %550, %555 : vector<8x32xf32>
    %cst_294 = arith.constant -0.866025388 : f32
    %557 = vector.broadcast %cst_294 : f32 to vector<8x32xf32>
    %558 = arith.mulf %511, %557 : vector<8x32xf32>
    %559 = arith.subf %553, %558 : vector<8x32xf32>
    %560 = arith.mulf %556, %556 : vector<8x32xf32>
    %561 = arith.mulf %559, %559 : vector<8x32xf32>
    %562 = arith.addf %560, %561 : vector<8x32xf32>
    %cst_295 = arith.constant 0.333333343 : f32
    %563 = vector.broadcast %cst_295 : f32 to vector<8x32xf32>
    %564 = arith.mulf %562, %563 : vector<8x32xf32>
    %cst_296 = arith.constant 1.000000e+00 : f32
    %565 = vector.broadcast %cst_296 : f32 to vector<8x32xf32>
    %566 = arith.mulf %565, %564 : vector<8x32xf32>
    %567 = arith.addf %539, %566 : vector<8x32xf32>
    %cst_297 = arith.constant 5.000000e-01 : f32
    %568 = vector.broadcast %cst_297 : f32 to vector<8x32xf32>
    %569 = arith.mulf %567, %568 : vector<8x32xf32>
    %cst_298 = arith.constant 0.000000e+00 : f32
    %570 = vector.broadcast %cst_298 : f32 to vector<8x32xf32>
    %571 = arith.maximumf %569, %570 : vector<8x32xf32>
    %cst_299 = arith.constant -1.000000e+00 : f32
    %572 = vector.broadcast %cst_299 : f32 to vector<8x32xf32>
    %573 = arith.mulf %572, %564 : vector<8x32xf32>
    %574 = arith.addf %539, %573 : vector<8x32xf32>
    %cst_300 = arith.constant 5.000000e-01 : f32
    %575 = vector.broadcast %cst_300 : f32 to vector<8x32xf32>
    %576 = arith.mulf %574, %575 : vector<8x32xf32>
    %cst_301 = arith.constant 0.000000e+00 : f32
    %577 = vector.broadcast %cst_301 : f32 to vector<8x32xf32>
    %578 = arith.maximumf %576, %577 : vector<8x32xf32>
    %cst_302 = arith.constant 0.000000e+00 : f32
    %579 = vector.broadcast %cst_302 : f32 to vector<8x32xf32>
    %cst_303 = arith.constant 0.000000e+00 : f32
    %580 = vector.broadcast %cst_303 : f32 to vector<8x32xf32>
    %cst_304 = arith.constant 1.000000e+00 : f32
    %581 = vector.broadcast %cst_304 : f32 to vector<8x32xf32>
    %582 = arith.mulf %512, %581 : vector<8x32xf32>
    %583 = arith.addf %579, %582 : vector<8x32xf32>
    %cst_305 = arith.constant 0.000000e+00 : f32
    %584 = vector.broadcast %cst_305 : f32 to vector<8x32xf32>
    %585 = arith.mulf %512, %584 : vector<8x32xf32>
    %586 = arith.subf %580, %585 : vector<8x32xf32>
    %cst_306 = arith.constant 1.000000e+00 : f32
    %587 = vector.broadcast %cst_306 : f32 to vector<8x32xf32>
    %588 = arith.mulf %513, %587 : vector<8x32xf32>
    %589 = arith.addf %583, %588 : vector<8x32xf32>
    %cst_307 = arith.constant 0.000000e+00 : f32
    %590 = vector.broadcast %cst_307 : f32 to vector<8x32xf32>
    %591 = arith.mulf %513, %590 : vector<8x32xf32>
    %592 = arith.subf %586, %591 : vector<8x32xf32>
    %cst_308 = arith.constant 1.000000e+00 : f32
    %593 = vector.broadcast %cst_308 : f32 to vector<8x32xf32>
    %594 = arith.mulf %514, %593 : vector<8x32xf32>
    %595 = arith.addf %589, %594 : vector<8x32xf32>
    %cst_309 = arith.constant 0.000000e+00 : f32
    %596 = vector.broadcast %cst_309 : f32 to vector<8x32xf32>
    %597 = arith.mulf %514, %596 : vector<8x32xf32>
    %598 = arith.subf %592, %597 : vector<8x32xf32>
    %599 = arith.mulf %595, %595 : vector<8x32xf32>
    %600 = arith.mulf %598, %598 : vector<8x32xf32>
    %601 = arith.addf %599, %600 : vector<8x32xf32>
    %cst_310 = arith.constant 0.333333343 : f32
    %602 = vector.broadcast %cst_310 : f32 to vector<8x32xf32>
    %603 = arith.mulf %601, %602 : vector<8x32xf32>
    %cst_311 = arith.constant 0.000000e+00 : f32
    %604 = vector.broadcast %cst_311 : f32 to vector<8x32xf32>
    %cst_312 = arith.constant 0.000000e+00 : f32
    %605 = vector.broadcast %cst_312 : f32 to vector<8x32xf32>
    %cst_313 = arith.constant 1.000000e+00 : f32
    %606 = vector.broadcast %cst_313 : f32 to vector<8x32xf32>
    %607 = arith.mulf %512, %606 : vector<8x32xf32>
    %608 = arith.addf %604, %607 : vector<8x32xf32>
    %cst_314 = arith.constant 0.000000e+00 : f32
    %609 = vector.broadcast %cst_314 : f32 to vector<8x32xf32>
    %610 = arith.mulf %512, %609 : vector<8x32xf32>
    %611 = arith.subf %605, %610 : vector<8x32xf32>
    %cst_315 = arith.constant -5.000000e-01 : f32
    %612 = vector.broadcast %cst_315 : f32 to vector<8x32xf32>
    %613 = arith.mulf %513, %612 : vector<8x32xf32>
    %614 = arith.addf %608, %613 : vector<8x32xf32>
    %cst_316 = arith.constant 0.866025388 : f32
    %615 = vector.broadcast %cst_316 : f32 to vector<8x32xf32>
    %616 = arith.mulf %513, %615 : vector<8x32xf32>
    %617 = arith.subf %611, %616 : vector<8x32xf32>
    %cst_317 = arith.constant -5.000000e-01 : f32
    %618 = vector.broadcast %cst_317 : f32 to vector<8x32xf32>
    %619 = arith.mulf %514, %618 : vector<8x32xf32>
    %620 = arith.addf %614, %619 : vector<8x32xf32>
    %cst_318 = arith.constant -0.866025388 : f32
    %621 = vector.broadcast %cst_318 : f32 to vector<8x32xf32>
    %622 = arith.mulf %514, %621 : vector<8x32xf32>
    %623 = arith.subf %617, %622 : vector<8x32xf32>
    %624 = arith.mulf %620, %620 : vector<8x32xf32>
    %625 = arith.mulf %623, %623 : vector<8x32xf32>
    %626 = arith.addf %624, %625 : vector<8x32xf32>
    %cst_319 = arith.constant 0.333333343 : f32
    %627 = vector.broadcast %cst_319 : f32 to vector<8x32xf32>
    %628 = arith.mulf %626, %627 : vector<8x32xf32>
    %cst_320 = arith.constant 1.000000e+00 : f32
    %629 = vector.broadcast %cst_320 : f32 to vector<8x32xf32>
    %630 = arith.mulf %629, %628 : vector<8x32xf32>
    %631 = arith.addf %603, %630 : vector<8x32xf32>
    %cst_321 = arith.constant 5.000000e-01 : f32
    %632 = vector.broadcast %cst_321 : f32 to vector<8x32xf32>
    %633 = arith.mulf %631, %632 : vector<8x32xf32>
    %cst_322 = arith.constant 0.000000e+00 : f32
    %634 = vector.broadcast %cst_322 : f32 to vector<8x32xf32>
    %635 = arith.maximumf %633, %634 : vector<8x32xf32>
    %cst_323 = arith.constant -1.000000e+00 : f32
    %636 = vector.broadcast %cst_323 : f32 to vector<8x32xf32>
    %637 = arith.mulf %636, %628 : vector<8x32xf32>
    %638 = arith.addf %603, %637 : vector<8x32xf32>
    %cst_324 = arith.constant 5.000000e-01 : f32
    %639 = vector.broadcast %cst_324 : f32 to vector<8x32xf32>
    %640 = arith.mulf %638, %639 : vector<8x32xf32>
    %cst_325 = arith.constant 0.000000e+00 : f32
    %641 = vector.broadcast %cst_325 : f32 to vector<8x32xf32>
    %642 = arith.maximumf %640, %641 : vector<8x32xf32>
    %643 = arith.mulf %571, %635 : vector<8x32xf32>
    %644 = arith.mulf %635, %635 : vector<8x32xf32>
    %645 = arith.mulf %578, %642 : vector<8x32xf32>
    %646 = arith.addf %643, %645 : vector<8x32xf32>
    %647 = arith.mulf %642, %642 : vector<8x32xf32>
    %648 = arith.addf %644, %647 : vector<8x32xf32>
    %cst_326 = arith.constant 1.000000e-03 : f32
    %649 = vector.broadcast %cst_326 : f32 to vector<8x32xf32>
    %650 = arith.addf %648, %649 : vector<8x32xf32>
    %651 = arith.divf %646, %650 : vector<8x32xf32>
    %652 = math.sqrt %651 : vector<8x32xf32>
    %c0_327 = arith.constant 0 : index
    %c0_328 = arith.constant 0 : index
    %653 = vector.load %arg22[%c0_327, %c0_328] : memref<32x160xf32, #tpu.memory_space<vmem>>, vector<32x160xf32>
    %cst_329 = arith.constant dense<0.000000e+00> : vector<8x160xf32>
    %654 = tpu.matmul %652, %653, %cst_329 {dimension_numbers = #tpu.dot_dimension_numbers<[1], [0], [0], [1], [0, 0, 1, 1], [], []>} : vector<8x32xf32>, vector<32x160xf32>, vector<8x160xf32> -> vector<8x160xf32>
    %655 = arith.mulf %479, %654 : vector<8x160xf32>
    %c0_330 = arith.constant 0 : index
    %c0_331 = arith.constant 0 : index
    %656 = vector.load %arg27[%c0_330, %c0_331] : memref<160x16xf32, #tpu.memory_space<vmem>>, vector<160x16xf32>
    %cst_332 = arith.constant dense<0.000000e+00> : vector<8x16xf32>
    %657 = tpu.matmul %655, %656, %cst_332 {dimension_numbers = #tpu.dot_dimension_numbers<[1], [0], [0], [1], [0, 0, 1, 1], [], []>} : vector<8x160xf32>, vector<160x16xf32>, vector<8x16xf32> -> vector<8x16xf32>
    %c0_333 = arith.constant 0 : index
    %c0_334 = arith.constant 0 : index
    %658 = vector.load %arg28[%c0_333, %c0_334] : memref<1x16xf32, #tpu.memory_space<vmem>>, vector<1x16xf32>
    %659 = vector.broadcast %658 : vector<1x16xf32> to vector<8x16xf32>
    %660 = arith.addf %657, %659 : vector<8x16xf32>
    %c0_335 = arith.constant 0 : index
    %c0_336 = arith.constant 0 : index
    %661 = vector.load %arg2[%c0_335, %c0_336] : memref<8x1xf32, #tpu.memory_space<vmem>>, vector<8x1xf32>
    %662 = vector.broadcast %661 : vector<8x1xf32> to vector<8x16xf32>
    %663 = arith.subf %660, %662 : vector<8x16xf32>
    %c0_337 = arith.constant 0 : index
    %c0_338 = arith.constant 0 : index
    %664 = vector.load %arg1[%c0_337, %c0_338] : memref<8x1xf32, #tpu.memory_space<vmem>>, vector<8x1xf32>
    %cst_339 = arith.constant 1.000000e-10 : f32
    %665 = vector.broadcast %cst_339 : f32 to vector<8x1xf32>
    %666 = arith.addf %664, %665 : vector<8x1xf32>
    %667 = vector.broadcast %666 : vector<8x1xf32> to vector<8x16xf32>
    %668 = arith.divf %663, %667 : vector<8x16xf32>
    %669 = vector.broadcast %14 : vector<8x1xf32> to vector<8x16xf32>
    %670 = arith.mulf %668, %669 : vector<8x16xf32>
    %671 = vector.broadcast %4 : vector<8x1xf32> to vector<8x16xf32>
    %672 = arith.addf %670, %671 : vector<8x16xf32>
    %c0_340 = arith.constant 0 : index
    %c0_341 = arith.constant 0 : index
    %673 = vector.load %arg29[%c0_340, %c0_341] : memref<8x16xf32, #tpu.memory_space<vmem>>, vector<8x16xf32>
    tpu.vector_store %arg29[%c0_340, %c0_341], %672 {strides = array<i32>} : memref<8x16xf32, #tpu.memory_space<vmem>>, vector<8x16xf32>,
    return
  }
}

</mosaic_0001>

<bundles_post_ra>
// kernel: tile.0
= control target key start
LH: loop header
LB: loop body
LE: loop exit
PB: predicated region body
PF: predicated region fallthrough
CT: control target
= control target key end

     0   :  { %s34_s8 = smov 125   ;;  %vm7_vm0 = vcmask 7168   ;;  %s35_s11 = smov 126   ;;  %s61_s0 = inlined_call_operand.vmem [shape: f32[2,4], index: 0, kind: input, shape index: {}]   ;;  %s62_s1 = inlined_call_operand.vmem [shape: f32[8,1], index: 1, kind: output, shape index: {}]  }
   0x1   :  { %v4_v0 = vld [vmem:[%s61_s0] sm:$0x3]  ;;  %s33_s0 = smov 127  }
   0x2   :  { %5 = vst [vmem:[#allocation0] sm:$0x3] %v4_v0 }
   0x9   :  { %v9_v1 = vld [vmem:[#allocation0] sm:$0x3]  }
   0xa   :  { %v21_v2 = vld [vmem:[#allocation0] sm:$0x3]   ;;  %10 = vrot.lane.b32.xlu0 %v9_v1, %s33_s0 }
   0xb   :  { %22 = vrot.lane.b32.xlu1 %v21_v2, %s34_s8  ;;  %v6_v3 = vld [vmem:[#allocation0] sm:$0x3]  }
   0xc   :  { %v15_v4 = vld [vmem:[#allocation0] sm:$0x3]   ;;  %8 = vst.msk [vmem:[%s62_s1] ss:$4 sm:$0x3] %vm7_vm0, %v6_v3  }
   0xe   :  { %16 = vrot.lane.b32.xlu0 %v15_v4, %s35_s11 }
  0x7c   :  { %v11_v5 = vpop.permute.xlu0 %10  }
  0x7d   :  { %v23_v6 = vpop.permute.xlu1 %22   ;;  %27 = vst.msk [vmem:[%s62_s1 + $0x1] ss:$4 sm:$0x3] %vm7_vm0, %v11_v5  }
  0x7e   :  { %29 = vst.msk [vmem:[%s62_s1 + $0x3] ss:$4 sm:$0x3] %vm7_vm0, %v23_v6  }
  0x80   :  { %v17_v7 = vpop.permute.xlu0 %16  }
  0x81   :  { %28 = vst.msk [vmem:[%s62_s1 + $0x2] ss:$4 sm:$0x3] %vm7_vm0, %v17_v7  }

// kernel: tile.18
= control target key start
LH: loop header
LB: loop body
LE: loop exit
PB: predicated region body
PF: predicated region fallthrough
CT: control target
= control target key end

     0   :  { %s22_s0 = inlined_call_operand.vmem [shape: f32[4], index: 0, kind: input, shape index: {}]   ;;  %s23_s1 = inlined_call_operand.vmem [shape: f32[2,4], index: 1, kind: output, shape index: {}]  }
   0x1   :  { %v4_v0 = vld [vmem:[%s22_s0] ss:$0 sm:$0xff] }
   0x2   :  { %5 = vst [vmem:[%s23_s1] sm:$0x3] %v4_v0 }

// kernel: _lambda_.1
= control target key start
LH: loop header
LB: loop body
LE: loop exit
PB: predicated region body
PF: predicated region fallthrough
CT: control target
= control target key end

     0   :  { %s5817_s6 = smov 1   ;;  %s5818_s10 = smov 2   ;;  %s6725_s0 = inlined_call_operand.smem [shape: u32[30], index: -1, kind: input, shape index: {}] }
   0x1   :  { %s5869_s5 = sld [smem:[%s6725_s0]]   ;;  %s5819_s14 = smov 3  }
   0x2   :  { %s5874_s9 = sld [smem:[%s6725_s0 + %s5817_s6]]   ;;  %s5820_s18 = smov 4  }
   0x3   :  { %s5879_s13 = sld [smem:[%s6725_s0 + %s5818_s10]]   ;;  %s5821_s22 = smov 5  }
   0x4   :  { %s5884_s17 = sld [smem:[%s6725_s0 + %s5819_s14]]   ;;  %s5822_s26 = smov 6  }
   0x5   :  { %s5889_s21 = sld [smem:[%s6725_s0 + %s5820_s18]]   ;;  %s5823_s30 = smov 7  }
   0x6   :  { %s5894_s25 = sld [smem:[%s6725_s0 + %s5821_s22]]   ;;  %s5824_s4 = smov 8  }
   0x7   :  { %s5899_s29 = sld [smem:[%s6725_s0 + %s5822_s26]]   ;;  %s5825_s10 = smov 9  }
   0x8   :  { %s5904_s3 = sld [smem:[%s6725_s0 + %s5823_s30]]   ;;  %s5826_s15 = smov 10  }
   0x9   :  { %s5909_s8 = sld [smem:[%s6725_s0 + %s5824_s4]]   ;;  %s5827_s20 = smov 11  }
   0xa   :  { %s5914_s14 = sld [smem:[%s6725_s0 + %s5825_s10]]   ;;  %s5828_s26 = smov 12  }
   0xb   :  { %s5919_s19 = sld [smem:[%s6725_s0 + %s5826_s15]]   ;;  %s5829_s1 = smov 13  }
   0xc   :  { %s5924_s24 = sld [smem:[%s6725_s0 + %s5827_s20]]   ;;  %s5830_s7 = smov 14  }
   0xd   :  { %s5929_s30 = sld [smem:[%s6725_s0 + %s5828_s26]]   ;;  %s5831_s15 = smov 15  }
   0xe   :  { %s5934_s6 = sld [smem:[%s6725_s0 + %s5829_s1]]   ;;  %s5832_s22 = smov 16  }
   0xf   :  { %6735 = sst [smem:[#allocation18_spill]] %s5909_s8  ;;  %s5833_s28 = smov 17  }
  0x10   :  { %s5939_s12 = sld [smem:[%s6725_s0 + %s5830_s7]]   ;;  %s5834_s7 = smov 18  }
  0x11   :  { %6736 = sst [smem:[#allocation19_spill]] %s5919_s19  ;;  %s5842_s10 = smov 27  }
  0x12   :  { %s5944_s20 = sld [smem:[%s6725_s0 + %s5831_s15]]   ;;  %s5835_s15 = smov 19  }
  0x13   :  { %6737 = sst [smem:[#allocation20_spill]] %s5929_s30  ;;  %s5843_s16 = smov 28  }
  0x14   :  { %6738 = sst [smem:[#allocation21_spill]] %s5934_s6  ;;  %s5844_s23 = smov 29  }
  0x15   :  { %s5949_s27 = sld [smem:[%s6725_s0 + %s5832_s22]]   ;;  %s5836_s22 = smov 20  }
  0x16   :  { %6739 = sst [smem:[#allocation22_spill]] %s5939_s12  ;;  %s5845_s1 = smov 26  }
  0x17   :  { %s5954_s4 = sld [smem:[%s6725_s0 + %s5833_s28]]   ;;  %s5837_s28 = smov 21  }
  0x18   :  { %s5959_s8 = sld [smem:[%s6725_s0 + %s5834_s7]]   ;;  %s5838_s7 = smov 22  }
  0x19   :  { %s5964_s12 = sld [smem:[%s6725_s0 + %s5835_s15]]   ;;  %s5839_s15 = smov 23  }
  0x1a   :  { %s5974_s6 = sld [smem:[%s6725_s0 + %s5837_s28]]   ;;  %s5841_s28 = smov 25  }
  0x1b   :  { %6740 = sst [smem:[#allocation23_spill]] %s5949_s27 }
  0x1c   :  { %s5969_s27 = sld [smem:[%s6725_s0 + %s5836_s22]]   ;;  %s5840_s22 = smov 24  }
  0x1d   :  { %s4219_s30 = sld [smem:[%s6725_s0 + %s5841_s28]]  }
  0x1e   :  { %6741 = sst [smem:[#allocation24_spill]] %s5959_s8 }
  0x1f   :  { %6742 = sst [smem:[#allocation25_spill]] %s5964_s12 }
  0x20   :  { %s5979_s8 = sld [smem:[%s6725_s0 + %s5838_s7]]  }
  0x21   :  { %s5984_s12 = sld [smem:[%s6725_s0 + %s5839_s15]]  }
  0x22   :  { %6743 = sst [smem:[#allocation26_spill]] %s5969_s27 }
  0x23   :  { %s5989_s27 = sld [smem:[%s6725_s0 + %s5840_s22]]   ;;  %v64_v0 = vstv %s4219_s30 }
  0x24   :  { %s4220_s19 = sld [smem:[%s6725_s0 + %s5845_s1]]   ;;  %65 = vst [vmem:[#allocation2] sm:$0x1] %v64_v0 }
  0x26   :  { %6744 = sst [smem:[#allocation27_spill]] %s5979_s8 }
  0x27   :  { %6745 = sst [smem:[#allocation28_spill]] %s5984_s12 }
  0x28   :  { %s5997_s8 = sld [smem:[%s6725_s0 + %s5842_s10]]  }
  0x29   :  { %6746 = sst [smem:[#allocation29_spill]] %s5989_s27 }
  0x2a   :  { %s6002_s12 = sld [smem:[%s6725_s0 + %s5843_s16]]   ;;  %v66_v1 = vstv %s4220_s19 }
  0x2b   :  { %s6007_s27 = sld [smem:[%s6725_s0 + %s5844_s23]]   ;;  %67 = vst [vmem:[#allocation3] sm:$0x1] %v66_v1 }
  0x2c   :  { %68 = vsyncpa [#allocation5], 0 }
  0x2d   :  { %69 = vsyncpa [#allocation8], 0 }
  0x2e   :  { %70 = vsyncpa [#allocation11], 0 }
  0x2f   :  { %71 = vsyncpa [#allocation6], 0  ;;  %s5846_s10 = smov [#allocation7]   ;;  %s5847_s11 = smov [#allocation10]  }
  0x30   :  { %s109_s7 = sshll.u32 %s5846_s10, 4  ;;  %s141_s16 = sshll.u32 %s5847_s11, 4  ;;  %s110_s7 = int_to_ptr.vmem [resolvable:$true] %s109_s7  ;;  %s6012_s16 = int_to_ptr.vmem [resolvable:$true] %s141_s16 }
  0x31   :  { %s5677_s15 = scalar_lea.hbm %s5924_s24, 15360 }
  0x32   :  { %p5678_p0 = scmp.ne.s32.totalorder %s5924_s24, %s5677_s15  ;;  %p5681_p1 = scmp.lt.u32.totalorder %s5677_s15, %s5924_s24 }
  0x34   :  { %p5683_p2 = pnand %p5681_p1, %p5678_p0 }
  0x36   :  { %5686 = shalt.err (!%p5683_p2)
}
  0x37   :  { %s5687_s0 = scalar_lea.vmem %s110_s7, 15360  ;;  %p5692_p4 = scmp.lt.s32.totalorder %s110_s7, %s110_s7 }
  0x38   :  { %p5688_p3 = scmp.ne.s32.totalorder %s110_s7, %s5687_s0  ;;  %p5693_p5 = scmp.lt.s32.totalorder %s5687_s0, %s5687_s0 }
  0x3a   :  { %p5694_p6 = por %p5693_p5, %p5692_p4 }
  0x3c   :  { %p5695_p7 = pnand %p5694_p6, %p5688_p3 }
  0x3e   :  { %5698 = shalt.err (!%p5695_p7)
}
  0x3f   :  { %s5848_s19 = smov 256   ;;  %s5849_s30 = smov 16  }
  0x40   :  { %115 = dma.hbm_to_vmem [thread:$0]  %s5924_s24, 15360, %s110_s7, [#allocation8], %s5848_s19, %s5848_s19, %s5849_s30  }
  0x41   :  { %s5699_s18 = scalar_lea.hbm %s5954_s4, 15360 }
  0x42   :  { %p5700_p8 = scmp.ne.s32.totalorder %s5954_s4, %s5699_s18  ;;  %p5703_p9 = scmp.lt.u32.totalorder %s5699_s18, %s5954_s4 }
  0x44   :  { %p5705_p10 = pnand %p5703_p9, %p5700_p8 }
  0x46   :  { %5708 = shalt.err (!%p5705_p10)
}
  0x47   :  { %s5709_s23 = scalar_lea.vmem %s6012_s16, 15360  ;;  %p5714_p12 = scmp.lt.s32.totalorder %s6012_s16, %s6012_s16 }
  0x48   :  { %p5710_p11 = scmp.ne.s32.totalorder %s6012_s16, %s5709_s23  ;;  %p5715_p13 = scmp.lt.s32.totalorder %s5709_s23, %s5709_s23 }
  0x4a   :  { %p5716_p0 = por %p5715_p13, %p5714_p12 }
  0x4c   :  { %p5717_p1 = pnand %p5716_p0, %p5710_p11 }
  0x4e   :  { %5720 = shalt.err (!%p5717_p1)
}
  0x4f   :  { %147 = dma.hbm_to_vmem [thread:$0]  %s5954_s4, 15360, %s6012_s16, [#allocation11], %s5848_s19, %s5848_s19, %s5849_s30  }
  0x50   :  { %s5850_s24 = smov [#allocation4]   ;;  %s5851_s26 = smov [#allocation9]  }
  0x51   :  { %s95_s22 = sshll.u32 %s5850_s24, 4  ;;  %s127_s1 = sshll.u32 %s5851_s26, 4  ;;  %s96_s22 = int_to_ptr.vmem [resolvable:$true] %s95_s22  ;;  %s6033_s1 = int_to_ptr.vmem [resolvable:$true] %s127_s1 }
  0x52   :  { %s5721_s28 = scalar_lea.hbm %s5914_s14, 15360 }
  0x53   :  { %p5722_p2 = scmp.ne.s32.totalorder %s5914_s14, %s5721_s28  ;;  %p5725_p3 = scmp.lt.u32.totalorder %s5721_s28, %s5914_s14 }
  0x55   :  { %p5727_p4 = pnand %p5725_p3, %p5722_p2 }
  0x57   :  { %5730 = shalt.err (!%p5727_p4)
}
  0x58   :  { %s5731_s2 = scalar_lea.vmem %s96_s22, 15360  ;;  %p5736_p6 = scmp.lt.s32.totalorder %s96_s22, %s96_s22 }
  0x59   :  { %p5732_p5 = scmp.ne.s32.totalorder %s96_s22, %s5731_s2  ;;  %p5737_p7 = scmp.lt.s32.totalorder %s5731_s2, %s5731_s2 }
  0x5b   :  { %p5738_p8 = por %p5737_p7, %p5736_p6 }
  0x5d   :  { %p5739_p9 = pnand %p5738_p8, %p5732_p5 }
  0x5f   :  { %5742 = shalt.err (!%p5739_p9)
}
  0x60   :  { %101 = dma.hbm_to_vmem [thread:$0]  %s5914_s14, 15360, %s96_s22, [#allocation5], %s5848_s19, %s5848_s19, %s5849_s30  }
  0x61   :  { %s5743_s4 = scalar_lea.hbm %s5944_s20, 15360 }
  0x62   :  { %p5744_p10 = scmp.ne.s32.totalorder %s5944_s20, %s5743_s4  ;;  %p5747_p11 = scmp.lt.u32.totalorder %s5743_s4, %s5944_s20 }
  0x64   :  { %p5749_p12 = pnand %p5747_p11, %p5744_p10 }
  0x66   :  { %5752 = shalt.err (!%p5749_p12)
}
  0x67   :  { %s5753_s10 = scalar_lea.vmem %s6033_s1, 15360  ;;  %p5758_p0 = scmp.lt.s32.totalorder %s6033_s1, %s6033_s1 }
  0x68   :  { %p5754_p13 = scmp.ne.s32.totalorder %s6033_s1, %s5753_s10  ;;  %p5759_p1 = scmp.lt.s32.totalorder %s5753_s10, %s5753_s10 }
  0x6a   :  { %p5760_p2 = por %p5759_p1, %p5758_p0 }
  0x6c   :  { %p5761_p3 = pnand %p5760_p2, %p5754_p13 }
  0x6e   :  { %5764 = shalt.err (!%p5761_p3)
}
  0x6f   :  { %133 = dma.hbm_to_vmem [thread:$0]  %s5944_s20, 15360, %s6033_s1, [#allocation8], %s5848_s19, %s5848_s19, %s5849_s30  }
  0x70   :  { %s5852_s14 = smov [#allocation12]   ;;  %s5765_s11 = scalar_lea.hbm %s5974_s6, 5120 }
  0x71   :  { %s159_s7 = sshll.u32 %s5852_s14, 4  ;;  %p5766_p4 = scmp.ne.s32.totalorder %s5974_s6, %s5765_s11  ;;  %s160_s7 = int_to_ptr.vmem [resolvable:$true] %s159_s7 }
  0x72   :  { %p5769_p5 = scmp.lt.u32.totalorder %s5765_s11, %s5974_s6 }
  0x74   :  { %p5771_p6 = pnand %p5769_p5, %p5766_p4 }
  0x76   :  { %5774 = shalt.err (!%p5771_p6)
}
  0x77   :  { %s5775_s16 = scalar_lea.vmem %s160_s7, 5120  ;;  %p5780_p8 = scmp.lt.s32.totalorder %s160_s7, %s160_s7 }
  0x78   :  { %p5776_p7 = scmp.ne.s32.totalorder %s160_s7, %s5775_s16  ;;  %p5781_p9 = scmp.lt.s32.totalorder %s5775_s16, %s5775_s16 }
  0x7a   :  { %p5782_p10 = por %p5781_p9, %p5780_p8 }
  0x7c   :  { %p5783_p11 = pnand %p5782_p10, %p5776_p7 }
  0x7e   :  { %5786 = shalt.err (!%p5783_p11)
}
  0x7f   :  { %165 = dma.hbm_to_vmem [thread:$0]  %s5974_s6, 5120, %s160_s7, [#allocation11], %s5848_s19, %s5848_s19, %s5849_s30  }
  0x80   :  { %5809 = dma.done.wait [#allocation5], 15360  }
  0x81   :  { %5810 = vsyncadd [#allocation5], 4294951936 }
  0x82   :  { %5811 = dma.done.wait [#allocation8], 30720  }
  0x83   :  { %5812 = vsyncadd [#allocation8], 4294936576 }
  0x84   :  { %5813 = dma.done.wait [#allocation11], 20480  }
  0x85   :  { %5814 = vsyncadd [#allocation11], 4294946816  ;;  %vm196_vm0 = vcmask 130048   ;;  %v6062_v2 = vld [vmem:[%s5869_s5] sm:$0xff]  ;;  %v5853_v5 = vmov 0   ;;  %v233_v14 = vld [vmem:[%s5884_s17 + $0x8] sm:$0xff] }
  0x86   :  { %v197_v3 = vsel %vm196_vm0, %v6062_v2, 0.0  ;;  %v218_v4 = vld [vmem:[%s5874_s9] sm:$0xff]  ;;  %5588 = vset.pattern.permute.xlu1 %v5853_v5  ;;  %5589 = vset.pattern.permute.xlu0 %v5853_v5  ;;  %v5854_v16 = vmov 0.0|0.0   ;;  %vm5855_vm1 = vmmov 0   ;;  %v5856_v17 = vmov 0.0   ;;  %v315_v18 = vld [vmem:[%s5894_s25 + $0x8] sm:$0xff] }
  0x87   :  { %198 = vadd.xlane.f32.xlu0 %v197_v3  ;;  %221 = vperm.xlu1 %5588, %v218_v4   ;;  %v225_v6 = vld [vmem:[%s5879_s13] sm:$0xff]  ;;  %v317_v19 = vld [vmem:[%s5894_s25 + $0x18] sm:$0xff]  ;;  %v316_v33 = vld [vmem:[%s5894_s25 + $0x10] sm:$0xff]  ;;  %vm334_vm4 = vcmask 261120   ;;  %s6747_s5 = sld [smem:[#allocation19_spill]]  ;;  %s6748_s13 = sld [smem:[#allocation20_spill]] }
  0x88   :  { %v4270_v7 = vld [vmem:[#allocation3] ss:$0 sm:$0xff]  ;;  %4460 = vmatprep.subr.bf16.mxu0 %v5854_v16  ;;  %4342 = vmatprep.mubr.msk.f32.mxu0 %vm5855_vm1, %v5856_v17  ;;  %v4463_v20 = vpack.c.bf16 %v317_v19, %v315_v18  ;;  %v319_v34 = vld [vmem:[%s5894_s25 + $0x28] sm:$0xff]  ;;  %v321_v35 = vld [vmem:[%s5894_s25 + $0x38] sm:$0xff]  ;;  %s6754_s6 = sld [smem:[#allocation26_spill]]  ;;  %s6756_s15 = sld [smem:[#allocation28_spill]] }
  0x89   :  { %v232_v13 = vld [vmem:[%s5884_s17] sm:$0xff]  ;;  %v4467_v40 = vpack.c.bf16 %v321_v35, %v319_v34  ;;  %v320_v42 = vld [vmem:[%s5894_s25 + $0x30] sm:$0xff]  ;;  %v410_v45 = vld [vmem:[%s5904_s3 + $0x8] sm:$0xff]  ;;  %s6749_s17 = sld [smem:[#allocation21_spill]]  ;;  %s6755_s20 = sld [smem:[#allocation18_spill]] }
  0x8a   :  { %v4461_v15 = vpack.c.bf16 %v233_v14, %v232_v13  ;;  %v314_v32 = vld [vmem:[%s5894_s25] sm:$0xff]  ;;  %v532_v47 = vld [vmem:[#allocation4 + $0x8] sm:$0xff]  ;;  %v533_v55 = vld [vmem:[#allocation4 + $0x10] sm:$0xff]  ;;  %s6757_s0 = sld [smem:[#allocation29_spill]]  ;;  %s5858_s19 = smov 96  }
  0x8b   :  { %228 = vperm.xlu1 %5588, %v225_v6   ;;  %v4465_v38 = vpack.c.bf16 %v316_v33, %v314_v32  ;;  %v318_v41 = vld [vmem:[%s5894_s25 + $0x20] sm:$0xff]  ;;  %v536_v56 = vld [vmem:[#allocation4 + $0x28] sm:$0xff]  ;;  %v537_v61 = vld [vmem:[#allocation4 + $0x30] sm:$0xff]  ;;  %s6751_s25 = sld [smem:[#allocation23_spill]]  ;;  %s5859_s30 = smov 64  }
  0x8c   :  { %4462 = vmatpush3.bf16.msra.mxu0 %v4461_v15  ;;  %v4469_v43 = vpack.c.bf16 %v320_v42, %v318_v41  ;;  %v409_v44 = vld [vmem:[%s5904_s3] sm:$0xff]  ;;  %v540_v62 = vld [vmem:[#allocation4 + $0x48] sm:$0xff]  ;;  %v541_v4 = vld [vmem:[#allocation4 + $0x50] sm:$0xff]  ;;  %s6753_s3 = sld [smem:[#allocation25_spill]] }
  0x8d   :  { %4464 = vmatprep.subr.bf16.mxu0 %v4463_v20  ;;  %v4224_v46 = vld [vmem:[%s5889_s21] ss:$0 sm:$0xff]  ;;  %v4472_v50 = vpack.c.bf16 %v410_v45, %v409_v44  ;;  %v531_v54 = vld [vmem:[#allocation4] sm:$0xff]  ;;  %v544_v5 = vld [vmem:[#allocation4 + $0x68] sm:$0xff]  ;;  %s6750_s21 = sld [smem:[#allocation22_spill]] }
  0x8e   :  { %v534_v48 = vld [vmem:[#allocation4 + $0x18] sm:$0xff]  ;;  %v4476_v58 = vpack.c.bf16 %v533_v55, %v531_v54  ;;  %v535_v60 = vld [vmem:[#allocation4 + $0x20] sm:$0xff]  ;;  %v549_v18 = vld [vmem:[#allocation4 + $0x90] sm:$0xff] }
  0x8f   :  { %3526 = vperm.xlu1 %5588, %v4270_v7   ;;  %v4474_v53 = vpack.c.bf16 %v534_v48, %v532_v47  ;;  %v538_v57 = vld [vmem:[#allocation4 + $0x38] sm:$0xff]  ;;  %v4480_v0 = vpack.c.bf16 %v537_v61, %v535_v60  ;;  %v539_v3 = vld [vmem:[#allocation4 + $0x40] sm:$0xff]  ;;  %v552_v19 = vld [vmem:[#allocation4 + $0xa8] sm:$0xff] }
  0x90   :  { %v4478_v59 = vpack.c.bf16 %v538_v57, %v536_v56  ;;  %v542_v63 = vld [vmem:[#allocation4 + $0x58] sm:$0xff]  ;;  %v4484_v7 = vpack.c.bf16 %v541_v4, %v539_v3  ;;  %v547_v15 = vld [vmem:[#allocation4 + $0x80] sm:$0xff]  ;;  %v560_v32 = vld [vmem:[#allocation4 + $0xe8] sm:$0xff] }
  0x91   :  { %v4482_v1 = vpack.c.bf16 %v542_v63, %v540_v62  ;;  %v546_v6 = vld [vmem:[#allocation4 + $0x78] sm:$0xff]  ;;  %v565_v44 = vld [vmem:[#allocation4 + $0x110] sm:$0xff] }
  0x92   :  { %v550_v13 = vld [vmem:[#allocation4 + $0x98] sm:$0xff] }
  0x93   :  { %v554_v20 = vld [vmem:[#allocation4 + $0xb8] sm:$0xff] }
  0x94   :  { %v562_v33 = vld [vmem:[#allocation4 + $0xf8] sm:$0xff] }
  0x95   :  { %v4502_v35 = vpack.c.bf16 %v562_v33, %v560_v32  ;;  %v570_v47 = vld [vmem:[#allocation4 + $0x138] sm:$0xff]  ;;  %v727_v32 = vld [vmem:[#allocation7 + $0x80] sm:$0xff]  ;;  %v729_v33 = vld [vmem:[#allocation7 + $0x90] sm:$0xff] }
  0x96   :  { %v322_v55 = vld [vmem:[%s5899_s29] sm:$0x3]  ;;  %s6752_s29 = sld [smem:[#allocation24_spill]] }
  0x97   :  { %v714_v3 = vld [vmem:[#allocation7 + $0x18] sm:$0xff] }
 0x106   :  { %v222_v29 = vpop.permute.xlu1 %221 }
 0x10a   :  { %v6087_v37 = vpop.permute.xlu1 %228 }
 0x114   :  { %v199_v8 = vpop.xlane.xlu0 %198 }
 0x115   :  { %v6068_v9 = vmul.f32 0.0625, %v199_v8  ;;  %v4486_v8 = vpack.c.bf16 %v546_v6, %v544_v5  ;;  %v711_v5 = vld [vmem:[#allocation7] sm:$0xff]  ;;  %v713_v6 = vld [vmem:[#allocation7 + $0x10] sm:$0xff] }
 0x117   :  { %v202_v10 = vsub.f32 %v6062_v2, %v6068_v9 }
 0x119   :  { %v203_v11 = vmul.f32 %v202_v10, %v202_v10 }
 0x11b   :  { %v204_v12 = vsel %vm196_vm0, %v203_v11, 0.0  ;;  %v545_v11 = vld [vmem:[#allocation4 + $0x70] sm:$0xff] }
 0x11c   :  { %205 = vadd.xlane.f32.xlu0 %v204_v12  ;;  %v548_v12 = vld [vmem:[#allocation4 + $0x88] sm:$0xff] }
 0x1a9   :  { %v206_v21 = vpop.xlane.xlu0 %205 }
 0x1aa   :  { %v207_v22 = vmul.f32 0.0625, %v206_v21  ;;  %v4492_v21 = vpack.c.bf16 %v549_v18, %v547_v15  ;;  %v722_v15 = vld [vmem:[#allocation7 + $0x58] sm:$0xff]  ;;  %v719_v18 = vld [vmem:[#allocation7 + $0x40] sm:$0xff] }
 0x1ac   :  { %v208_v23 = vadd.f32 1e-05, %v207_v22  ;;  %v4494_v22 = vpack.c.bf16 %v554_v20, %v552_v19  ;;  %v721_v19 = vld [vmem:[#allocation7 + $0x50] sm:$0xff] }
 0x1ae   :  { %5590 = vrsqrt.f32 %v208_v23  ;;  %vm211_vm2 = vcmp.eq.f32.partialorder %v208_v23, inf  ;;  %v214_v26 = vand.u32 2147483648, %v208_v23  ;;  %vm213_vm3 = vcmp.eq.f32.partialorder %v208_v23, 0.0 }
 0x1b8   :  { %v5591_v24 = vpop.eup %5590 }
 0x1b9   :  { %v210_v25 = vmul.f32 %v5591_v24, %v208_v23  ;;  %v553_v24 = vld [vmem:[#allocation4 + $0xb0] sm:$0xff] }
 0x1bb   :  { %v212_v27 = vsel %vm211_vm2, %v208_v23, %v210_v25  ;;  %v551_v23 = vld [vmem:[#allocation4 + $0xa0] sm:$0xff]  ;;  %v556_v25 = vld [vmem:[#allocation4 + $0xc8] sm:$0xff] }
 0x1bc   :  { %v6080_v28 = vsel %vm213_vm3, %v214_v26, %v212_v27  ;;  %v558_v26 = vld [vmem:[#allocation4 + $0xd8] sm:$0xff]  ;;  %v4496_v27 = vpack.c.bf16 %v553_v24, %v551_v23  ;;  %v4524_v23 = vpack.c.bf16 %v721_v19, %v719_v18  ;;  %v495_v19 = vld [vmem:[#allocation12 + $0x20] sm:$0xff]  ;;  %vm3533_vm3 = vcmask 785408  }
 0x1bd   :  { %5592 = vrcp.f32 %v6080_v28 }
 0x1c7   :  { %v5593_v30 = vpop.eup %5592 }
 0x1c8   :  { %v217_v31 = vmul.f32 %v5593_v30, %v202_v10  ;;  %v543_v10 = vld [vmem:[#allocation4 + $0x60] sm:$0xff] }
 0x1c9   :  { %v4488_v14 = vpack.c.bf16 %v545_v11, %v543_v10  ;;  %v555_v30 = vld [vmem:[#allocation4 + $0xc0] sm:$0xff]  ;;  %v718_v10 = vld [vmem:[#allocation7 + $0x38] sm:$0xff] }
 0x1ca   :  { %v224_v36 = vmul.f32 %v222_v29, %v217_v31  ;;  %v4498_v29 = vpack.c.bf16 %v558_v26, %v556_v25  ;;  %v557_v31 = vld [vmem:[#allocation4 + $0xd0] sm:$0xff]  ;;  %v723_v25 = vld [vmem:[#allocation7 + $0x60] sm:$0xff] }
 0x1cb   :  { %v4500_v34 = vpack.c.bf16 %v557_v31, %v555_v30  ;;  %v725_v26 = vld [vmem:[#allocation7 + $0x70] sm:$0xff] }
 0x1cc   :  { %v231_v39 = vadd.f32 %v6087_v37, %v224_v36  ;;  %v559_v36 = vld [vmem:[#allocation4 + $0xe0] sm:$0xff]  ;;  %v4528_v30 = vpack.c.bf16 %v725_v26, %v723_v25  ;;  %v501_v26 = vld [vmem:[#allocation12 + $0x50] sm:$0xff] }
 0x1cd   :  { %v499_v25 = vld [vmem:[#allocation12 + $0x40] sm:$0xff] }
 0x1ce   :  { %4343 = vmatmul.mubr.msk.f32.vlgmr.msra.gmra.mrb[0].mxu0 %vm196_vm0, %v231_v39  ;;  %v564_v39 = vld [vmem:[#allocation4 + $0x108] sm:$0xff] }
 0x1cf   :  { %4466 = vmatpush1.bf16.msra.mxu0 %v4465_v38  ;;  %402 = vmatprep.mubr.f32.mxu0 %v5856_v17  ;;  %v561_v38 = vld [vmem:[#allocation4 + $0xf0] sm:$0xff] }
 0x1d0   :  { %4468 = vmatprep.subr.bf16.mxu0 %v4467_v40  ;;  %v566_v40 = vld [vmem:[#allocation4 + $0x118] sm:$0xff]  ;;  %v4504_v41 = vpack.c.bf16 %v561_v38, %v559_v36  ;;  %v4532_v36 = vpack.c.bf16 %v729_v33, %v727_v32  ;;  %v503_v32 = vld [vmem:[#allocation12 + $0x60] sm:$0xff]  ;;  %v505_v33 = vld [vmem:[#allocation12 + $0x70] sm:$0xff] }
 0x1d1   :  { %v4506_v42 = vpack.c.bf16 %v566_v40, %v564_v39  ;;  %v731_v39 = vld [vmem:[#allocation7 + $0xa0] sm:$0xff]  ;;  %v733_v40 = vld [vmem:[#allocation7 + $0xb0] sm:$0xff] }
 0x1d3   :  { %4470 = vmatpush1.bf16.msra.mxu0 %v4469_v43  ;;  %v563_v43 = vld [vmem:[#allocation4 + $0x100] sm:$0xff] }
 0x1d4   :  { %4471 = vmatprep.subr.bf16.mxu0 %v5854_v16  ;;  %v4508_v45 = vpack.c.bf16 %v565_v44, %v563_v43  ;;  %v4536_v43 = vpack.c.bf16 %v733_v40, %v731_v39  ;;  %v507_v39 = vld [vmem:[#allocation12 + $0x80] sm:$0xff]  ;;  %v509_v40 = vld [vmem:[#allocation12 + $0x90] sm:$0xff] }
 0x2a1   :  { %v310_v49 = vpop.f32.mrb[0].mxu0 }
 0x2a2   :  { %v311_v51 = vadd.f32 %v4224_v46, %v310_v49  ;;  %v4344_v52 = vpop.f32.mrb[1].mxu0  ;;  %v568_v46 = vld [vmem:[#allocation4 + $0x128] sm:$0xff]  ;;  %v567_v49 = vld [vmem:[#allocation4 + $0x120] sm:$0xff] }
 0x2a3   :  { %v4510_v48 = vpack.c.bf16 %v570_v47, %v568_v46  ;;  %v324_v52 = vlaneseq  ;;  %v737_v46 = vld [vmem:[#allocation7 + $0xd0] sm:$0xff]  ;;  %v740_v47 = vld [vmem:[#allocation7 + $0xe8] sm:$0xff] }
 0x2a4   :  { %4226 = vmatmul.mubr.msk.f32.vlgmr.msra.gmra.mrb[2].mxu0 %vm334_vm4, %v311_v51 }
 0x2a5   :  { %4473 = vmatpush3.bf16.msra.mxu0 %v4472_v50  ;;  %4349 = vmatprep.mubr.msk.f32.mxu0 %vm5855_vm1, %v5856_v17  ;;  %v569_v50 = vld [vmem:[#allocation4 + $0x130] sm:$0xff] }
 0x2a6   :  { %4475 = vmatprep.subr.bf16.mxu0 %v4474_v53  ;;  %v4512_v51 = vpack.c.bf16 %v569_v50, %v567_v49  ;;  %v325_v53 = vshrl.u32 %v324_v52, 7  ;;  %v741_v52 = vld [vmem:[#allocation7 + $0xf0] sm:$0xff] }
 0x2a8   :  { %4350 = vmatmul.mubr.msk.f32.vlgmr.msra.gmra.mrb[4].mxu0 %vm196_vm0, %v6062_v2  ;;  %v4490_v2 = vpack.c.bf16 %v550_v13, %v548_v12  ;;  %v6103_v54 = vsub.s32 1, %v325_v53  ;;  %v6106_v56 = vsub.s32 0, %v325_v53  ;;  %v715_v12 = vld [vmem:[#allocation7 + $0x20] sm:$0xff]  ;;  %v717_v13 = vld [vmem:[#allocation7 + $0x30] sm:$0xff]  ;;  %v744_v53 = vld [vmem:[#allocation7 + $0x108] sm:$0xff] }
 0x2a9   :  { %4477 = vmatpush1.bf16.msra.mxu0 %v4476_v58 }
 0x2aa   :  { %4479 = vmatprep.subr.bf16.mxu0 %v4478_v59  ;;  %v331_v57 = vrot.slane %v322_v55, %v6103_v54  ;;  %v327_v58 = vrot.slane %v322_v55, %v6106_v56  ;;  %v746_v55 = vld [vmem:[#allocation7 + $0x118] sm:$0xff] }
 0x2ad   :  { %4481 = vmatpush1.bf16.msra.mxu0 %v4480_v0 }
 0x2ae   :  { %4483 = vmatprep.subr.bf16.mxu0 %v4482_v1  ;;  %v712_v1 = vld [vmem:[#allocation7 + $0x8] sm:$0xff] }
 0x2af   :  { %v4514_v4 = vpack.c.bf16 %v714_v3, %v712_v1  ;;  %v750_v1 = vld [vmem:[#allocation7 + $0x138] sm:$0xff] }
 0x2b1   :  { %4485 = vmatpush1.bf16.msra.mxu0 %v4484_v7  ;;  %v4516_v7 = vpack.c.bf16 %v713_v6, %v711_v5  ;;  %4515 = vmatprep.subr.bf16.mxu1 %v4514_v4  ;;  %v747_v5 = vld [vmem:[#allocation7 + $0x120] sm:$0xff]  ;;  %v749_v6 = vld [vmem:[#allocation7 + $0x130] sm:$0xff] }
 0x2b2   :  { %4487 = vmatprep.subr.bf16.mxu0 %v4486_v8  ;;  %v716_v8 = vld [vmem:[#allocation7 + $0x28] sm:$0xff] }
 0x2b3   :  { %4517 = vmatpush1.bf16.msra.mxu1 %v4516_v7  ;;  %v4518_v11 = vpack.c.bf16 %v718_v10, %v716_v8  ;;  %v4552_v7 = vpack.c.bf16 %v749_v6, %v747_v5  ;;  %v492_v8 = vld [vmem:[#allocation12 + $0x8] sm:$0xff]  ;;  %v494_v10 = vld [vmem:[#allocation12 + $0x18] sm:$0xff] }
 0x2b4   :  { %v571_v5 = vld [vmem:[%s6747_s5] sm:$0x3] }
 0x2b5   :  { %4489 = vmatpush1.bf16.msra.mxu0 %v4488_v14  ;;  %v720_v14 = vld [vmem:[#allocation7 + $0x48] sm:$0xff]  ;;  %4519 = vmatprep.subr.bf16.mxu1 %v4518_v11  ;;  %v491_v11 = vld [vmem:[#allocation12] sm:$0xff]  ;;  %v576_v6 = vrot.slane %v571_v5, %v6106_v56 }
 0x2b6   :  { %4491 = vmatprep.subr.bf16.mxu0 %v4490_v2  ;;  %v4520_v2 = vpack.c.bf16 %v717_v13, %v715_v12  ;;  %v4522_v20 = vpack.c.bf16 %v722_v15, %v720_v14  ;;  %v6119_v12 = vpack.c.bf16 %v494_v10, %v492_v8  ;;  %v493_v13 = vld [vmem:[#allocation12 + $0x10] sm:$0xff]  ;;  %v496_v14 = vld [vmem:[#allocation12 + $0x28] sm:$0xff] }
 0x2b7   :  { %v6121_v15 = vpack.c.bf16 %v493_v13, %v491_v11 }
 0x2b8   :  { %4521 = vmatpush1.bf16.msra.mxu1 %v4520_v2  ;;  %v498_v2 = vld [vmem:[#allocation12 + $0x38] sm:$0xff] }
 0x2b9   :  { %4493 = vmatpush1.bf16.msra.mxu0 %v4492_v21  ;;  %v724_v21 = vld [vmem:[#allocation7 + $0x68] sm:$0xff]  ;;  %4523 = vmatprep.subr.bf16.mxu1 %v4522_v20  ;;  %v6123_v18 = vpack.c.bf16 %v498_v2, %v496_v14  ;;  %v497_v20 = vld [vmem:[#allocation12 + $0x30] sm:$0xff] }
 0x2ba   :  { %4495 = vmatprep.subr.bf16.mxu0 %v4494_v22  ;;  %v726_v22 = vld [vmem:[#allocation7 + $0x78] sm:$0xff] }
 0x2bb   :  { %v4526_v24 = vpack.c.bf16 %v726_v22, %v724_v21  ;;  %v500_v21 = vld [vmem:[#allocation12 + $0x48] sm:$0xff]  ;;  %v502_v22 = vld [vmem:[#allocation12 + $0x58] sm:$0xff] }
 0x2bc   :  { %4525 = vmatpush1.bf16.msra.mxu1 %v4524_v23  ;;  %v6128_v23 = vpack.c.bf16 %v497_v20, %v495_v19 }
 0x2bd   :  { %4497 = vmatpush1.bf16.msra.mxu0 %v4496_v27  ;;  %v728_v27 = vld [vmem:[#allocation7 + $0x88] sm:$0xff]  ;;  %4527 = vmatprep.subr.bf16.mxu1 %v4526_v24  ;;  %v6131_v24 = vpack.c.bf16 %v502_v22, %v500_v21 }
 0x2be   :  { %4499 = vmatprep.subr.bf16.mxu0 %v4498_v29  ;;  %v730_v29 = vld [vmem:[#allocation7 + $0x98] sm:$0xff] }
 0x2bf   :  { %v4530_v31 = vpack.c.bf16 %v730_v29, %v728_v27  ;;  %v504_v27 = vld [vmem:[#allocation12 + $0x68] sm:$0xff]  ;;  %v506_v29 = vld [vmem:[#allocation12 + $0x78] sm:$0xff] }
 0x2c0   :  { %4529 = vmatpush1.bf16.msra.mxu1 %v4528_v30  ;;  %v6134_v30 = vpack.c.bf16 %v501_v26, %v499_v25 }
 0x2c1   :  { %4501 = vmatpush1.bf16.msra.mxu0 %v4500_v34  ;;  %v732_v34 = vld [vmem:[#allocation7 + $0xa8] sm:$0xff]  ;;  %4531 = vmatprep.subr.bf16.mxu1 %v4530_v31  ;;  %v6137_v31 = vpack.c.bf16 %v506_v29, %v504_v27 }
 0x2c2   :  { %4503 = vmatprep.subr.bf16.mxu0 %v4502_v35  ;;  %v734_v35 = vld [vmem:[#allocation7 + $0xb8] sm:$0xff] }
 0x2c3   :  { %v4534_v38 = vpack.c.bf16 %v734_v35, %v732_v34  ;;  %v508_v34 = vld [vmem:[#allocation12 + $0x88] sm:$0xff]  ;;  %v510_v35 = vld [vmem:[#allocation12 + $0x98] sm:$0xff] }
 0x2c4   :  { %4533 = vmatpush1.bf16.msra.mxu1 %v4532_v36  ;;  %v6140_v36 = vpack.c.bf16 %v505_v33, %v503_v32 }
 0x2c5   :  { %4505 = vmatpush1.bf16.msra.mxu0 %v4504_v41  ;;  %v736_v41 = vld [vmem:[#allocation7 + $0xc8] sm:$0xff]  ;;  %4535 = vmatprep.subr.bf16.mxu1 %v4534_v38  ;;  %v6143_v38 = vpack.c.bf16 %v510_v35, %v508_v34 }
 0x2c6   :  { %4507 = vmatprep.subr.bf16.mxu0 %v4506_v42  ;;  %v738_v42 = vld [vmem:[#allocation7 + $0xd8] sm:$0xff] }
 0x2c7   :  { %v4538_v44 = vpack.c.bf16 %v738_v42, %v736_v41  ;;  %v512_v41 = vld [vmem:[#allocation12 + $0xa8] sm:$0xff]  ;;  %v514_v42 = vld [vmem:[#allocation12 + $0xb8] sm:$0xff] }
 0x2c8   :  { %4537 = vmatpush1.bf16.msra.mxu1 %v4536_v43  ;;  %v6146_v43 = vpack.c.bf16 %v509_v40, %v507_v39 }
 0x2c9   :  { %4509 = vmatpush1.bf16.msra.mxu0 %v4508_v45  ;;  %v735_v45 = vld [vmem:[#allocation7 + $0xc0] sm:$0xff]  ;;  %4539 = vmatprep.subr.bf16.mxu1 %v4538_v44  ;;  %v6149_v44 = vpack.c.bf16 %v514_v42, %v512_v41 }
 0x2ca   :  { %4511 = vmatprep.subr.bf16.mxu0 %v4510_v48  ;;  %v742_v48 = vld [vmem:[#allocation7 + $0xf8] sm:$0xff]  ;;  %v4540_v49 = vpack.c.bf16 %v737_v46, %v735_v45  ;;  %v511_v45 = vld [vmem:[#allocation12 + $0xa0] sm:$0xff]  ;;  %v513_v46 = vld [vmem:[#allocation12 + $0xb0] sm:$0xff] }
 0x2cb   :  { %v4542_v50 = vpack.c.bf16 %v742_v48, %v740_v47  ;;  %v516_v47 = vld [vmem:[#allocation12 + $0xc8] sm:$0xff]  ;;  %v518_v48 = vld [vmem:[#allocation12 + $0xd8] sm:$0xff] }
 0x2cc   :  { %4541 = vmatpush1.bf16.msra.mxu1 %v4540_v49  ;;  %v6152_v49 = vpack.c.bf16 %v513_v46, %v511_v45 }
 0x2cd   :  { %4513 = vmatpush1.bf16.msra.mxu0 %v4512_v51  ;;  %v739_v51 = vld [vmem:[#allocation7 + $0xe0] sm:$0xff]  ;;  %4543 = vmatprep.subr.bf16.mxu1 %v4542_v50  ;;  %v6155_v50 = vpack.c.bf16 %v518_v48, %v516_v47 }
 0x2ce   :  { %4555 = vmatprep.subr.bf16.mxu0 %v6119_v12 }
 0x377   :  { %v404_v59 = vpop.f32.mrb[2].mxu0 }
 0x378   :  { %v406_v60 = vpop.f32.mrb[3].mxu0  ;;  %v6112_v62 = vadd.f32 %v404_v59, %v327_v58  ;;  %v4546_v58 = vpack.c.bf16 %v746_v55, %v744_v53  ;;  %v743_v59 = vld [vmem:[#allocation7 + $0x100] sm:$0xff]  ;;  %v520_v53 = vld [vmem:[#allocation12 + $0xe8] sm:$0xff]  ;;  %v522_v55 = vld [vmem:[#allocation12 + $0xf8] sm:$0xff] }
 0x379   :  { %v6110_v61 = vadd.f32 %v406_v60, %v331_v57  ;;  %v4544_v57 = vpack.c.bf16 %v741_v52, %v739_v51  ;;  %v745_v60 = vld [vmem:[#allocation7 + $0x110] sm:$0xff]  ;;  %v515_v51 = vld [vmem:[#allocation12 + $0xc0] sm:$0xff] }
 0x37a   :  { %v4548_v3 = vpack.c.bf16 %v745_v60, %v743_v59  ;;  %v517_v52 = vld [vmem:[#allocation12 + $0xd0] sm:$0xff]  ;;  %v519_v59 = vld [vmem:[#allocation12 + $0xe0] sm:$0xff] }
 0x37b   :  { %4229 = vmatprep.mubr.msk.f32.mxu0 %vm334_vm4, %v6110_v61  ;;  %v6116_v63 = vpop.f32.mrb[4].mxu0  ;;  %4545 = vmatpush1.bf16.msra.mxu1 %v4544_v57  ;;  %v6158_v57 = vpack.c.bf16 %v517_v52, %v515_v51  ;;  %v521_v60 = vld [vmem:[#allocation12 + $0xf0] sm:$0xff] }
 0x37c   :  { %651 = vmatmul.mubr.f32.vlgmr.msra.gmra.mrb[6].mxu0 %v6112_v62  ;;  %v4351_v0 = vpop.f32.mrb[5].mxu0  ;;  %4547 = vmatprep.subr.bf16.mxu1 %v4546_v58  ;;  %v6161_v58 = vpack.c.bf16 %v522_v55, %v520_v53 }
 0x37d   :  { %v748_v0 = vld [vmem:[#allocation7 + $0x128] sm:$0xff]  ;;  %4557 = vmatpush1.bf16.msra.mxu0 %v6121_v15 }
 0x37e   :  { %v4550_v4 = vpack.c.bf16 %v750_v1, %v748_v0  ;;  %4559 = vmatprep.subr.bf16.mxu0 %v6123_v18  ;;  %v524_v0 = vld [vmem:[#allocation12 + $0x108] sm:$0xff]  ;;  %v526_v1 = vld [vmem:[#allocation12 + $0x118] sm:$0xff] }
 0x37f   :  { %4549 = vmatpush1.bf16.msra.mxu1 %v4548_v3  ;;  %v6164_v3 = vpack.c.bf16 %v521_v60, %v519_v59 }
 0x380   :  { %4551 = vmatprep.subr.bf16.mxu1 %v4550_v4  ;;  %v6167_v4 = vpack.c.bf16 %v526_v1, %v524_v0 }
 0x381   :  { %4561 = vmatpush1.bf16.msra.mxu0 %v6128_v23 }
 0x382   :  { %4563 = vmatprep.subr.bf16.mxu0 %v6131_v24 }
 0x383   :  { %4553 = vmatpush1.bf16.msra.mxu1 %v4552_v7  ;;  %v580_v7 = vrot.slane %v571_v5, %v6103_v54 }
 0x384   :  { %4595 = vmatprep.subr.bf16.mxu1 %v6119_v12 }
 0x385   :  { %4565 = vmatpush1.bf16.msra.mxu0 %v6134_v30 }
 0x386   :  { %4567 = vmatprep.subr.bf16.mxu0 %v6137_v31 }
 0x389   :  { %4569 = vmatpush1.bf16.msra.mxu0 %v6140_v36 }
 0x38a   :  { %4571 = vmatprep.subr.bf16.mxu0 %v6143_v38 }
 0x38d   :  { %4573 = vmatpush1.bf16.msra.mxu0 %v6146_v43 }
 0x38e   :  { %4575 = vmatprep.subr.bf16.mxu0 %v6149_v44 }
 0x391   :  { %4577 = vmatpush1.bf16.msra.mxu0 %v6152_v49 }
 0x392   :  { %4579 = vmatprep.subr.bf16.mxu0 %v6155_v50 }
 0x395   :  { %4581 = vmatpush1.bf16.msra.mxu0 %v6158_v57 }
 0x396   :  { %4583 = vmatprep.subr.bf16.mxu0 %v6161_v58 }
 0x399   :  { %4585 = vmatpush1.bf16.msra.mxu0 %v6164_v3 }
 0x39a   :  { %4587 = vmatprep.subr.bf16.mxu0 %v6167_v4 }
 0x44f   :  { %v652_v8 = vpop.f32.mrb[6].mxu0 }
 0x450   :  { %v653_v10 = vadd.f32 %v652_v8, %v576_v6  ;;  %v654_v11 = vpop.f32.mrb[7].mxu0 }
 0x451   :  { %v655_v13 = vadd.f32 %v654_v11, %v580_v7 }
 0x452   :  { %v659_v14 = vmul.f32 0.70710677, %v653_v10 }
 0x453   :  { %v660_v2 = vmul.f32 0.70710677, %v655_v13 }
 0x454   :  { %v665_v19 = vand.u32 2147483647, %v659_v14  ;;  %vm661_vm5 = vcmp.ge.f32.partialorder %v659_v14, 0.0 }
 0x455   :  { %v666_v20 = vand.u32 2147483647, %v660_v2  ;;  %vm662_vm6 = vcmp.ge.f32.partialorder %v660_v2, 0.0  ;;  %v528_v2 = vld [vmem:[#allocation12 + $0x128] sm:$0xff] }
 0x456   :  { %v667_v21 = vmul.f32 0.3275911, %v665_v19  ;;  %v693_v27 = vsub.f32 0.0, %v665_v19 }
 0x457   :  { %v668_v22 = vmul.f32 0.3275911, %v666_v20  ;;  %v694_v29 = vsub.f32 0.0, %v666_v20 }
 0x458   :  { %v669_v25 = vadd.f32 1.0, %v667_v21  ;;  %v695_v33 = vmul.f32 %v693_v27, %v665_v19 }
 0x459   :  { %v670_v26 = vadd.f32 1.0, %v668_v22  ;;  %v696_v35 = vmul.f32 %v694_v29, %v666_v20 }
 0x45a   :  { %5594 = vrcp.f32 %v669_v25  ;;  %v697_v42 = vmul.f32 1.442695, %v695_v33  ;;  %v5857_v25 = vmov -1.0  }
 0x45b   :  { %5596 = vrcp.f32 %v670_v26  ;;  %v699_v46 = vmul.f32 1.442695, %v696_v35  ;;  %v663_v26 = vsel %vm661_vm5, 1.0, %v5857_v25  ;;  %v664_v29 = vsel %vm662_vm6, 1.0, %v5857_v25 }
 0x45c   :  { %5598 = vpow2.f32 %v697_v42 }
 0x45d   :  { %5600 = vpow2.f32 %v699_v46 }
 0x464   :  { %v5595_v32 = vpop.eup %5594 }
 0x465   :  { %v5597_v34 = vpop.eup %5596  ;;  %v675_v39 = vmul.f32 1.0614054, %v5595_v32 }
 0x466   :  { %v676_v40 = vmul.f32 1.0614054, %v5597_v34  ;;  %v5599_v8 = vpop.eup %5598 }
 0x467   :  { %v677_v41 = vadd.f32 -1.4531521, %v675_v39  ;;  %v5601_v19 = vpop.eup %5600 }
 0x468   :  { %v678_v45 = vadd.f32 -1.4531521, %v676_v40  ;;  %v658_v40 = vmul.f32 0.5, %v655_v13  ;;  %v525_v13 = vld [vmem:[#allocation12 + $0x110] sm:$0xff] }
 0x469   :  { %v679_v47 = vmul.f32 %v5595_v32, %v677_v41 }
 0x46a   :  { %v680_v48 = vmul.f32 %v5597_v34, %v678_v45  ;;  %v530_v45 = vld [vmem:[#allocation12 + $0x138] sm:$0xff] }
 0x46b   :  { %v681_v51 = vadd.f32 1.4214138, %v679_v47  ;;  %v6197_v46 = vpack.c.bf16 %v530_v45, %v528_v2  ;;  %v527_v47 = vld [vmem:[#allocation12 + $0x120] sm:$0xff]  ;;  %v1037_v2 = vld [vmem:[#allocation9 + $0x70] sm:$0xff]  ;;  %v1040_v45 = vld [vmem:[#allocation9 + $0x88] sm:$0xff] }
 0x46c   :  { %v682_v52 = vadd.f32 1.4214138, %v680_v48  ;;  %v529_v48 = vld [vmem:[#allocation12 + $0x130] sm:$0xff] }
 0x46d   :  { %v683_v53 = vmul.f32 %v5595_v32, %v681_v51  ;;  %v6199_v51 = vpack.c.bf16 %v529_v48, %v527_v47  ;;  %v1042_v47 = vld [vmem:[#allocation9 + $0x98] sm:$0xff] }
 0x46e   :  { %v684_v55 = vmul.f32 %v5597_v34, %v682_v52  ;;  %v751_v52 = vld [vmem:[%s6748_s13] sm:$0x3] }
 0x46f   :  { %v685_v59 = vadd.f32 -0.28449672, %v683_v53  ;;  %v756_v53 = vrot.slane %v751_v52, %v6106_v56 }
 0x470   :  { %v686_v60 = vadd.f32 -0.28449672, %v684_v55  ;;  %v760_v55 = vrot.slane %v751_v52, %v6103_v54  ;;  %v4650_v52 = vpack.c.bf16 %v1042_v47, %v1040_v45  ;;  %v1057_v45 = vld [vmem:[#allocation9 + $0x110] sm:$0xff]  ;;  %v1060_v47 = vld [vmem:[#allocation9 + $0x128] sm:$0xff] }
 0x471   :  { %v687_v0 = vmul.f32 %v5595_v32, %v685_v59 }
 0x472   :  { %v688_v1 = vmul.f32 %v5597_v34, %v686_v60 }
 0x473   :  { %v689_v5 = vadd.f32 0.2548296, %v687_v0 }
 0x474   :  { %v690_v6 = vadd.f32 0.2548296, %v688_v1 }
 0x475   :  { %v691_v7 = vmul.f32 %v5595_v32, %v689_v5  ;;  %v657_v32 = vmul.f32 0.5, %v653_v10  ;;  %v523_v10 = vld [vmem:[#allocation12 + $0x100] sm:$0xff] }
 0x476   :  { %v692_v11 = vmul.f32 %v5597_v34, %v690_v6  ;;  %v6193_v14 = vpack.c.bf16 %v525_v13, %v523_v10  ;;  %v1035_v13 = vld [vmem:[#allocation9 + $0x60] sm:$0xff] }
 0x477   :  { %v701_v20 = vmul.f32 %v5599_v8, %v691_v7  ;;  %v1024_v7 = vld [vmem:[#allocation9 + $0x8] sm:$0xff]  ;;  %v1026_v8 = vld [vmem:[#allocation9 + $0x18] sm:$0xff]  ;;  %v4648_v48 = vpack.c.bf16 %v1037_v2, %v1035_v13  ;;  %v1055_v2 = vld [vmem:[#allocation9 + $0x100] sm:$0xff] }
 0x478   :  { %v702_v21 = vmul.f32 %v5601_v19, %v692_v11  ;;  %4589 = vmatpush1.bf16.msra.mxu0 %v6193_v14  ;;  %v1023_v11 = vld [vmem:[#allocation9] sm:$0xff]  ;;  %v4634_v19 = vpack.c.bf16 %v1026_v8, %v1024_v7 }
 0x479   :  { %v703_v22 = vsub.f32 1.0, %v701_v20  ;;  %4591 = vmatprep.subr.bf16.mxu0 %v6197_v46  ;;  %v1025_v20 = vld [vmem:[#allocation9 + $0x10] sm:$0xff] }
 0x47a   :  { %v704_v27 = vsub.f32 1.0, %v702_v21  ;;  %v1028_v21 = vld [vmem:[#allocation9 + $0x28] sm:$0xff] }
 0x47b   :  { %v705_v33 = vmul.f32 %v703_v22, %v663_v26  ;;  %v1030_v22 = vld [vmem:[#allocation9 + $0x38] sm:$0xff]  ;;  %v4636_v26 = vpack.c.bf16 %v1025_v20, %v1023_v11 }
 0x47c   :  { %v706_v35 = vmul.f32 %v704_v27, %v664_v29  ;;  %4593 = vmatpush1.bf16.msra.mxu0 %v6199_v51  ;;  %v4638_v27 = vpack.c.bf16 %v1030_v22, %v1028_v21  ;;  %v1027_v29 = vld [vmem:[#allocation9 + $0x20] sm:$0xff]  ;;  %v1046_v20 = vld [vmem:[#allocation9 + $0xb8] sm:$0xff] }
 0x47d   :  { %v707_v39 = vadd.f32 1.0, %v705_v33  ;;  %v1029_v33 = vld [vmem:[#allocation9 + $0x30] sm:$0xff]  ;;  %4635 = vmatprep.subr.bf16.mxu0 %v4634_v19  ;;  %v1044_v19 = vld [vmem:[#allocation9 + $0xa8] sm:$0xff]  ;;  %v1043_v22 = vld [vmem:[#allocation9 + $0xa0] sm:$0xff] }
 0x47e   :  { %v708_v41 = vadd.f32 1.0, %v706_v35  ;;  %v1032_v35 = vld [vmem:[#allocation9 + $0x48] sm:$0xff]  ;;  %v4654_v21 = vpack.c.bf16 %v1046_v20, %v1044_v19  ;;  %v839_v20 = vld [vmem:[%s6749_s17] sm:$0x3] }
 0x47f   :  { %v709_v34 = vmul.f32 %v707_v39, %v657_v32  ;;  %v1034_v39 = vld [vmem:[#allocation9 + $0x58] sm:$0xff]  ;;  %v1036_v32 = vld [vmem:[#allocation9 + $0x68] sm:$0xff] }
 0x480   :  { %v710_v42 = vmul.f32 %v708_v41, %v658_v40  ;;  %v1031_v40 = vld [vmem:[#allocation9 + $0x40] sm:$0xff]  ;;  %v1033_v41 = vld [vmem:[#allocation9 + $0x50] sm:$0xff] }
 0x482   :  { %4230 = vmatprep.mubr.msk.f32.mxu1 %vm334_vm4, %v710_v42  ;;  %v1038_v42 = vld [vmem:[#allocation9 + $0x78] sm:$0xff] }
 0x483   :  { %831 = vmatmul.mubr.f32.vlgmr.msra.gmra.mrb[0].mxu1 %v709_v34  ;;  %v4644_v34 = vpack.c.bf16 %v1033_v41, %v1031_v40  ;;  %v4646_v10 = vpack.c.bf16 %v1038_v42, %v1036_v32  ;;  %v1051_v40 = vld [vmem:[#allocation9 + $0xe0] sm:$0xff]  ;;  %v1053_v41 = vld [vmem:[#allocation9 + $0xf0] sm:$0xff]  ;;  %v1056_v42 = vld [vmem:[#allocation9 + $0x108] sm:$0xff] }
 0x484   :  { %4597 = vmatpush1.bf16.msra.mxu1 %v6121_v15 }
 0x485   :  { %4599 = vmatprep.subr.bf16.mxu1 %v6123_v18 }
 0x488   :  { %4601 = vmatpush1.bf16.msra.mxu1 %v6128_v23 }
 0x489   :  { %4603 = vmatprep.subr.bf16.mxu1 %v6131_v24 }
 0x48c   :  { %4605 = vmatpush1.bf16.msra.mxu1 %v6134_v30 }
 0x48d   :  { %4607 = vmatprep.subr.bf16.mxu1 %v6137_v31 }
 0x490   :  { %4609 = vmatpush1.bf16.msra.mxu1 %v6140_v36 }
 0x491   :  { %4611 = vmatprep.subr.bf16.mxu1 %v6143_v38 }
 0x494   :  { %4613 = vmatpush1.bf16.msra.mxu1 %v6146_v43 }
 0x495   :  { %4615 = vmatprep.subr.bf16.mxu1 %v6149_v44 }
 0x498   :  { %4617 = vmatpush1.bf16.msra.mxu1 %v6152_v49 }
 0x499   :  { %4619 = vmatprep.subr.bf16.mxu1 %v6155_v50 }
 0x49c   :  { %4621 = vmatpush1.bf16.msra.mxu1 %v6158_v57 }
 0x49d   :  { %4623 = vmatprep.subr.bf16.mxu1 %v6161_v58 }
 0x4a0   :  { %4625 = vmatpush1.bf16.msra.mxu1 %v6164_v3 }
 0x4a1   :  { %4627 = vmatprep.subr.bf16.mxu1 %v6167_v4 }
 0x4a4   :  { %4629 = vmatpush1.bf16.msra.mxu1 %v6193_v14 }
 0x4a5   :  { %4631 = vmatprep.subr.bf16.mxu1 %v6197_v46 }
 0x4a8   :  { %4633 = vmatpush1.bf16.msra.mxu1 %v6199_v51 }
 0x556   :  { %v832_v59 = vpop.f32.mrb[0].mxu1 }
 0x557   :  { %v833_v60 = vadd.f32 %v832_v59, %v756_v53  ;;  %v834_v0 = vpop.f32.mrb[1].mxu1  ;;  %v1039_v53 = vld [vmem:[#allocation9 + $0x80] sm:$0xff] }
 0x558   :  { %v835_v1 = vadd.f32 %v834_v0, %v760_v55  ;;  %v1041_v55 = vld [vmem:[#allocation9 + $0x90] sm:$0xff] }
 0x559   :  { %v837_v6 = vadd.f32 %v833_v60, %v6112_v62  ;;  %v4642_v62 = vpack.c.bf16 %v1034_v39, %v1032_v35  ;;  %v4652_v59 = vpack.c.bf16 %v1041_v55, %v1039_v53  ;;  %v1047_v39 = vld [vmem:[#allocation9 + $0xc0] sm:$0xff] }
 0x55a   :  { %v838_v5 = vadd.f32 %v835_v1, %v6110_v61  ;;  %v4640_v61 = vpack.c.bf16 %v1029_v33, %v1027_v29  ;;  %v1048_v29 = vld [vmem:[#allocation9 + $0xc8] sm:$0xff]  ;;  %v1050_v33 = vld [vmem:[#allocation9 + $0xd8] sm:$0xff]  ;;  %v1059_v55 = vld [vmem:[#allocation9 + $0x120] sm:$0xff] }
 0x55b   :  { %v4658_v35 = vpack.c.bf16 %v1050_v33, %v1048_v29 }
 0x55c   :  { %4231 = vmatprep.mubr.msk.f32.mxu0 %vm334_vm4, %v838_v5 }
 0x55d   :  { %909 = vmatmul.mubr.f32.vlgmr.msra.gmra.mrb[8].mxu0 %v837_v6 }
 0x55e   :  { %4637 = vmatpush1.bf16.msra.mxu0 %v4636_v26  ;;  %v1045_v26 = vld [vmem:[#allocation9 + $0xb0] sm:$0xff] }
 0x55f   :  { %4639 = vmatprep.subr.bf16.mxu0 %v4638_v27  ;;  %v4656_v27 = vpack.c.bf16 %v1045_v26, %v1043_v22  ;;  %v1001_v22 = vrot.slane %v839_v20, %v6106_v56 }
 0x562   :  { %4641 = vmatpush1.bf16.msra.mxu0 %v4640_v61  ;;  %v1052_v61 = vld [vmem:[#allocation9 + $0xe8] sm:$0xff] }
 0x563   :  { %4643 = vmatprep.subr.bf16.mxu0 %v4642_v62  ;;  %v1054_v62 = vld [vmem:[#allocation9 + $0xf8] sm:$0xff] }
 0x564   :  { %v4662_v32 = vpack.c.bf16 %v1054_v62, %v1052_v61 }
 0x566   :  { %4645 = vmatpush1.bf16.msra.mxu0 %v4644_v34  ;;  %v1058_v34 = vld [vmem:[#allocation9 + $0x118] sm:$0xff] }
 0x567   :  { %4647 = vmatprep.subr.bf16.mxu0 %v4646_v10  ;;  %v4664_v10 = vpack.c.bf16 %v1053_v41, %v1051_v40  ;;  %v4666_v13 = vpack.c.bf16 %v1058_v34, %v1056_v42  ;;  %v1205_v42 = vld [vmem:[#allocation10 + $0x10] sm:$0xff] }
 0x56a   :  { %4649 = vmatpush1.bf16.msra.mxu0 %v4648_v48  ;;  %v1062_v48 = vld [vmem:[#allocation9 + $0x138] sm:$0xff] }
 0x56b   :  { %4651 = vmatprep.subr.bf16.mxu0 %v4650_v52  ;;  %v4668_v52 = vpack.c.bf16 %v1057_v45, %v1055_v2  ;;  %v4670_v53 = vpack.c.bf16 %v1062_v48, %v1060_v47  ;;  %v1207_v45 = vld [vmem:[#allocation10 + $0x20] sm:$0xff]  ;;  %v1209_v47 = vld [vmem:[#allocation10 + $0x30] sm:$0xff] }
 0x56c   :  { %v4680_v48 = vpack.c.bf16 %v1209_v47, %v1207_v45  ;;  %v1232_v45 = vld [vmem:[#allocation10 + $0xe8] sm:$0xff]  ;;  %v1234_v47 = vld [vmem:[#allocation10 + $0xf8] sm:$0xff] }
 0x56e   :  { %4653 = vmatpush1.bf16.msra.mxu0 %v4652_v59  ;;  %v1061_v59 = vld [vmem:[#allocation9 + $0x130] sm:$0xff] }
 0x56f   :  { %4655 = vmatprep.subr.bf16.mxu0 %v4654_v21  ;;  %v840_v21 = vld [vmem:[%s6750_s21] sm:$0x3] }
 0x570   :  { %v1014_v61 = vrot.slane %v840_v21, %v6106_v56 }
 0x572   :  { %4657 = vmatpush1.bf16.msra.mxu0 %v4656_v27  ;;  %v1005_v27 = vrot.slane %v839_v20, %v6103_v54  ;;  %v1215_v20 = vld [vmem:[#allocation10 + $0x60] sm:$0xff] }
 0x573   :  { %4659 = vmatprep.subr.bf16.mxu0 %v4658_v35 }
 0x630   :  { %v910_v60 = vpop.f32.mrb[8].mxu0 }
 0x631   :  { %v915_v0 = vsub.f32 %v837_v6, %v910_v60  ;;  %v912_v1 = vpop.f32.mrb[9].mxu0  ;;  %v1049_v6 = vld [vmem:[#allocation9 + $0xd0] sm:$0xff]  ;;  %v4672_v60 = vpack.c.bf16 %v1061_v59, %v1059_v55  ;;  %v1211_v59 = vld [vmem:[#allocation10 + $0x40] sm:$0xff] }
 0x632   :  { %v916_v7 = vsub.f32 %v838_v5, %v912_v1  ;;  %v4660_v5 = vpack.c.bf16 %v1049_v6, %v1047_v39  ;;  %v1018_v39 = vrot.slane %v840_v21, %v6103_v54  ;;  %v1217_v21 = vld [vmem:[#allocation10 + $0x70] sm:$0xff] }
 0x633   :  { %v917_v11 = vmul.f32 %v915_v0, %v915_v0 }
 0x634   :  { %v918_v8 = vmul.f32 %v916_v7, %v916_v7  ;;  %4661 = vmatpush1.bf16.msra.mxu0 %v4660_v5 }
 0x635   :  { %4663 = vmatprep.subr.bf16.mxu0 %v4662_v32  ;;  %v1203_v32 = vld [vmem:[#allocation10] sm:$0xff] }
 0x636   :  { %4232 = vmatprep.mubr.msk.f32.mxu1 %vm334_vm4, %v918_v8  ;;  %v4676_v34 = vpack.c.bf16 %v1205_v42, %v1203_v32  ;;  %v1228_v32 = vld [vmem:[#allocation10 + $0xc8] sm:$0xff]  ;;  %v1230_v42 = vld [vmem:[#allocation10 + $0xd8] sm:$0xff] }
 0x637   :  { %987 = vmatmul.mubr.f32.vlgmr.msra.gmra.mrb[2].mxu1 %v917_v11 }
 0x638   :  { %4665 = vmatpush1.bf16.msra.mxu0 %v4664_v10  ;;  %v1208_v10 = vld [vmem:[#allocation10 + $0x28] sm:$0xff] }
 0x639   :  { %4667 = vmatprep.subr.bf16.mxu0 %v4666_v13  ;;  %v1210_v13 = vld [vmem:[#allocation10 + $0x38] sm:$0xff] }
 0x63a   :  { %v4678_v2 = vpack.c.bf16 %v1210_v13, %v1208_v10  ;;  %v1227_v10 = vld [vmem:[#allocation10 + $0xc0] sm:$0xff]  ;;  %v1229_v13 = vld [vmem:[#allocation10 + $0xd0] sm:$0xff] }
 0x63c   :  { %4669 = vmatpush1.bf16.msra.mxu0 %v4668_v52  ;;  %v1212_v52 = vld [vmem:[#allocation10 + $0x48] sm:$0xff] }
 0x63d   :  { %4671 = vmatprep.subr.bf16.mxu0 %v4670_v53  ;;  %v1214_v53 = vld [vmem:[#allocation10 + $0x58] sm:$0xff] }
 0x63e   :  { %v4682_v55 = vpack.c.bf16 %v1214_v53, %v1212_v52  ;;  %v1231_v52 = vld [vmem:[#allocation10 + $0xe0] sm:$0xff]  ;;  %v1233_v53 = vld [vmem:[#allocation10 + $0xf0] sm:$0xff] }
 0x640   :  { %4673 = vmatpush1.bf16.msra.mxu0 %v4672_v60  ;;  %v1213_v60 = vld [vmem:[#allocation10 + $0x50] sm:$0xff] }
 0x641   :  { %4715 = vmatprep.subr.bf16.mxu0 %v6119_v12 }
 0x70a   :  { %v988_v1 = vpop.f32.mrb[2].mxu1 }
 0x70b   :  { %v989_v8 = vadd.f32 1e-05, %v988_v1  ;;  %v990_v11 = vpop.f32.mrb[3].mxu1  ;;  %v4684_v1 = vpack.c.bf16 %v1213_v60, %v1211_v59  ;;  %v1236_v59 = vld [vmem:[#allocation10 + $0x108] sm:$0xff]  ;;  %v1238_v60 = vld [vmem:[#allocation10 + $0x118] sm:$0xff] }
 0x70c   :  { %v991_v19 = vadd.f32 1e-05, %v990_v11  ;;  %v1218_v11 = vld [vmem:[#allocation10 + $0x78] sm:$0xff] }
 0x70d   :  { %5602 = vrsqrt.f32 %v989_v8  ;;  %v1216_v8 = vld [vmem:[#allocation10 + $0x68] sm:$0xff] }
 0x70e   :  { %5604 = vrsqrt.f32 %v991_v19  ;;  %v4686_v19 = vpack.c.bf16 %v1218_v11, %v1216_v8  ;;  %v1235_v8 = vld [vmem:[#allocation10 + $0x100] sm:$0xff]  ;;  %v1237_v11 = vld [vmem:[#allocation10 + $0x110] sm:$0xff] }
 0x717   :  { %v5603_v26 = vpop.eup %5602 }
 0x718   :  { %v5605_v29 = vpop.eup %5604  ;;  %v995_v33 = vmul.f32 %v5603_v26, %v915_v0  ;;  %v1204_v0 = vld [vmem:[#allocation10 + $0x8] sm:$0xff] }
 0x719   :  { %v996_v35 = vmul.f32 %v5605_v29, %v916_v7  ;;  %v1206_v7 = vld [vmem:[#allocation10 + $0x18] sm:$0xff]  ;;  %v1220_v26 = vld [vmem:[#allocation10 + $0x88] sm:$0xff] }
 0x71a   :  { %v1008_v6 = vmul.f32 %v1001_v22, %v995_v33  ;;  %v4674_v41 = vpack.c.bf16 %v1206_v7, %v1204_v0  ;;  %v4688_v22 = vpack.c.bf16 %v1217_v21, %v1215_v20  ;;  %v1219_v33 = vld [vmem:[#allocation10 + $0x80] sm:$0xff]  ;;  %v1225_v7 = vld [vmem:[#allocation10 + $0xb0] sm:$0xff]  ;;  %v1240_v20 = vld [vmem:[#allocation10 + $0x128] sm:$0xff] }
 0x71b   :  { %v1009_v5 = vmul.f32 %v1005_v27, %v996_v35  ;;  %v1222_v27 = vld [vmem:[#allocation10 + $0x98] sm:$0xff]  ;;  %v1221_v35 = vld [vmem:[#allocation10 + $0x90] sm:$0xff]  ;;  %v1223_v0 = vld [vmem:[#allocation10 + $0xa0] sm:$0xff] }
 0x71c   :  { %v6221_v40 = vadd.f32 %v1014_v61, %v1008_v6  ;;  %4675 = vmatprep.subr.bf16.mxu1 %v4674_v41  ;;  %v4690_v29 = vpack.c.bf16 %v1222_v27, %v1220_v26  ;;  %v1224_v6 = vld [vmem:[#allocation10 + $0xa8] sm:$0xff]  ;;  %v1226_v61 = vld [vmem:[#allocation10 + $0xb8] sm:$0xff]  ;;  %v4696_v41 = vpack.c.bf16 %v1225_v7, %v1223_v0  ;;  %v1239_v26 = vld [vmem:[#allocation10 + $0x120] sm:$0xff] }
 0x71d   :  { %v6219_v62 = vadd.f32 %v1018_v39, %v1009_v5  ;;  %4677 = vmatpush1.bf16.msra.mxu1 %v4676_v34  ;;  %v4692_v39 = vpack.c.bf16 %v1221_v35, %v1219_v33  ;;  %v4694_v5 = vpack.c.bf16 %v1226_v61, %v1224_v6  ;;  %v4698_v34 = vpack.c.bf16 %v1230_v42, %v1228_v32  ;;  %v1242_v21 = vld [vmem:[#allocation10 + $0x138] sm:$0xff]  ;;  %v1241_v27 = vld [vmem:[#allocation10 + $0x130] sm:$0xff] }
 0x71e   :  { %4679 = vmatprep.subr.bf16.mxu1 %v4678_v2  ;;  %v4700_v2 = vpack.c.bf16 %v1229_v13, %v1227_v10  ;;  %v1063_v33 = vld [vmem:[%s6751_s25] sm:$0x3] }
 0x71f   :  { %4233 = vmatprep.mubr.msk.f32.mxu0 %vm334_vm4, %v6219_v62  ;;  %v1068_v35 = vrot.slane %v1063_v33, %v6106_v56 }
 0x720   :  { %1143 = vmatmul.mubr.f32.vlgmr.msra.gmra.mrb[10].mxu0 %v6221_v40 }
 0x721   :  { %4717 = vmatpush1.bf16.msra.mxu0 %v6121_v15  ;;  %4681 = vmatpush1.bf16.msra.mxu1 %v4680_v48  ;;  %v4702_v48 = vpack.c.bf16 %v1234_v47, %v1232_v45 }
 0x722   :  { %4719 = vmatprep.subr.bf16.mxu0 %v6123_v18  ;;  %4683 = vmatprep.subr.bf16.mxu1 %v4682_v55  ;;  %v4704_v55 = vpack.c.bf16 %v1233_v53, %v1231_v52 }
 0x725   :  { %4721 = vmatpush1.bf16.msra.mxu0 %v6128_v23  ;;  %4685 = vmatpush1.bf16.msra.mxu1 %v4684_v1  ;;  %v4706_v1 = vpack.c.bf16 %v1238_v60, %v1236_v59 }
 0x726   :  { %4723 = vmatprep.subr.bf16.mxu0 %v6131_v24  ;;  %4687 = vmatprep.subr.bf16.mxu1 %v4686_v19  ;;  %v4708_v19 = vpack.c.bf16 %v1237_v11, %v1235_v8 }
 0x729   :  { %4725 = vmatpush1.bf16.msra.mxu0 %v6134_v30  ;;  %4689 = vmatpush1.bf16.msra.mxu1 %v4688_v22  ;;  %v4710_v22 = vpack.c.bf16 %v1242_v21, %v1240_v20 }
 0x72a   :  { %4727 = vmatprep.subr.bf16.mxu0 %v6137_v31  ;;  %4691 = vmatprep.subr.bf16.mxu1 %v4690_v29  ;;  %v4712_v29 = vpack.c.bf16 %v1241_v27, %v1239_v26 }
 0x72d   :  { %4729 = vmatpush1.bf16.msra.mxu0 %v6140_v36  ;;  %4693 = vmatpush1.bf16.msra.mxu1 %v4692_v39  ;;  %v1072_v39 = vrot.slane %v1063_v33, %v6103_v54 }
 0x72e   :  { %4731 = vmatprep.subr.bf16.mxu0 %v6143_v38  ;;  %4695 = vmatprep.subr.bf16.mxu1 %v4694_v5 }
 0x731   :  { %4733 = vmatpush1.bf16.msra.mxu0 %v6146_v43  ;;  %4697 = vmatpush1.bf16.msra.mxu1 %v4696_v41 }
 0x732   :  { %4735 = vmatprep.subr.bf16.mxu0 %v6149_v44  ;;  %4699 = vmatprep.subr.bf16.mxu1 %v4698_v34 }
 0x735   :  { %4737 = vmatpush1.bf16.msra.mxu0 %v6152_v49  ;;  %4701 = vmatpush1.bf16.msra.mxu1 %v4700_v2 }
 0x736   :  { %4739 = vmatprep.subr.bf16.mxu0 %v6155_v50  ;;  %4703 = vmatprep.subr.bf16.mxu1 %v4702_v48 }
 0x739   :  { %4741 = vmatpush1.bf16.msra.mxu0 %v6158_v57  ;;  %4705 = vmatpush1.bf16.msra.mxu1 %v4704_v55 }
 0x73a   :  { %4743 = vmatprep.subr.bf16.mxu0 %v6161_v58  ;;  %4707 = vmatprep.subr.bf16.mxu1 %v4706_v1 }
 0x73d   :  { %4745 = vmatpush1.bf16.msra.mxu0 %v6164_v3  ;;  %4709 = vmatpush1.bf16.msra.mxu1 %v4708_v19 }
 0x73e   :  { %4747 = vmatprep.subr.bf16.mxu0 %v6167_v4  ;;  %4711 = vmatprep.subr.bf16.mxu1 %v4710_v22 }
 0x741   :  { %4749 = vmatpush1.bf16.msra.mxu0 %v6193_v14  ;;  %4713 = vmatpush1.bf16.msra.mxu1 %v4712_v29 }
 0x742   :  { %4751 = vmatprep.subr.bf16.mxu0 %v6197_v46  ;;  %4755 = vmatprep.subr.bf16.mxu1 %v6119_v12 }
 0x745   :  { %4753 = vmatpush1.bf16.msra.mxu0 %v6199_v51 }
 0x7f3   :  { %v1144_v6 = vpop.f32.mrb[10].mxu0 }
 0x7f4   :  { %v1145_v61 = vadd.f32 %v1144_v6, %v1068_v35  ;;  %v1146_v5 = vpop.f32.mrb[11].mxu0 }
 0x7f5   :  { %v1147_v0 = vadd.f32 %v1146_v5, %v1072_v39 }
 0x7f6   :  { %v1151_v7 = vmul.f32 0.70710677, %v1145_v61 }
 0x7f7   :  { %v1152_v41 = vmul.f32 0.70710677, %v1147_v0 }
 0x7f8   :  { %v1157_v32 = vand.u32 2147483647, %v1151_v7  ;;  %vm1153_vm7 = vcmp.ge.f32.partialorder %v1151_v7, 0.0 }
 0x7f9   :  { %v1158_v42 = vand.u32 2147483647, %v1152_v41  ;;  %vm1154_vm8 = vcmp.ge.f32.partialorder %v1152_v41, 0.0 }
 0x7fa   :  { %v1159_v34 = vmul.f32 0.3275911, %v1157_v32  ;;  %v1185_v45 = vsub.f32 0.0, %v1157_v32 }
 0x7fb   :  { %v1160_v10 = vmul.f32 0.3275911, %v1158_v42  ;;  %v1186_v47 = vsub.f32 0.0, %v1158_v42 }
 0x7fc   :  { %v1161_v13 = vadd.f32 1.0, %v1159_v34  ;;  %v1187_v52 = vmul.f32 %v1185_v45, %v1157_v32 }
 0x7fd   :  { %v1162_v2 = vadd.f32 1.0, %v1160_v10  ;;  %v1188_v59 = vmul.f32 %v1186_v47, %v1158_v42 }
 0x7fe   :  { %5606 = vrcp.f32 %v1161_v13  ;;  %v1189_v8 = vmul.f32 1.442695, %v1187_v52  ;;  %v1155_v52 = vsel %vm1153_vm7, 1.0, %v5857_v25 }
 0x7ff   :  { %5608 = vrcp.f32 %v1162_v2  ;;  %v1191_v20 = vmul.f32 1.442695, %v1188_v59 }
 0x800   :  { %5610 = vpow2.f32 %v1189_v8 }
 0x801   :  { %5612 = vpow2.f32 %v1191_v20  ;;  %v1149_v20 = vmul.f32 0.5, %v1145_v61  ;;  %v1243_v61 = vld [vmem:[%s6752_s29] sm:$0x3] }
 0x802   :  { %v1252_v7 = vrot.slane %v1243_v61, %v6103_v54 }
 0x808   :  { %v5607_v48 = vpop.eup %5606 }
 0x809   :  { %v5609_v53 = vpop.eup %5608  ;;  %v1167_v55 = vmul.f32 1.0614054, %v5607_v48 }
 0x80a   :  { %v1168_v60 = vmul.f32 1.0614054, %v5609_v53  ;;  %v5611_v34 = vpop.eup %5610 }
 0x80b   :  { %v1169_v1 = vadd.f32 -1.4531521, %v1167_v55  ;;  %v5613_v13 = vpop.eup %5612 }
 0x80c   :  { %v1170_v11 = vadd.f32 -1.4531521, %v1168_v60  ;;  %v1156_v60 = vsel %vm1154_vm8, 1.0, %v5857_v25 }
 0x80d   :  { %v1171_v19 = vmul.f32 %v5607_v48, %v1169_v1 }
 0x80e   :  { %v1172_v21 = vmul.f32 %v5609_v53, %v1170_v11  ;;  %v1150_v11 = vmul.f32 0.5, %v1147_v0  ;;  %v1248_v0 = vrot.slane %v1243_v61, %v6106_v56 }
 0x80f   :  { %v1173_v22 = vadd.f32 1.4214138, %v1171_v19 }
 0x810   :  { %v1174_v26 = vadd.f32 1.4214138, %v1172_v21 }
 0x811   :  { %v1175_v27 = vmul.f32 %v5607_v48, %v1173_v22 }
 0x812   :  { %v1176_v29 = vmul.f32 %v5609_v53, %v1174_v26 }
 0x813   :  { %v1177_v33 = vadd.f32 -0.28449672, %v1175_v27 }
 0x814   :  { %v1178_v35 = vadd.f32 -0.28449672, %v1176_v29 }
 0x815   :  { %v1179_v39 = vmul.f32 %v5607_v48, %v1177_v33  ;;  %v1517_v33 = vld [vmem:[#allocation4 + $0x148] sm:$0xff] }
 0x816   :  { %v1180_v6 = vmul.f32 %v5609_v53, %v1178_v35  ;;  %v1519_v35 = vld [vmem:[#allocation4 + $0x158] sm:$0xff] }
 0x817   :  { %v1181_v5 = vadd.f32 0.2548296, %v1179_v39  ;;  %v1516_v39 = vld [vmem:[#allocation4 + $0x140] sm:$0xff] }
 0x818   :  { %v1182_v32 = vadd.f32 0.2548296, %v1180_v6  ;;  %v4794_v6 = vpack.c.bf16 %v1519_v35, %v1517_v33 }
 0x819   :  { %v1183_v42 = vmul.f32 %v5607_v48, %v1181_v5  ;;  %v1518_v5 = vld [vmem:[#allocation4 + $0x150] sm:$0xff] }
 0x81a   :  { %v1184_v10 = vmul.f32 %v5609_v53, %v1182_v32  ;;  %v1521_v32 = vld [vmem:[#allocation4 + $0x168] sm:$0xff]  ;;  %4795 = vmatprep.subr.bf16.mxu0 %v4794_v6 }
 0x81b   :  { %v1193_v2 = vmul.f32 %v5611_v34, %v1183_v42  ;;  %v1523_v42 = vld [vmem:[#allocation4 + $0x178] sm:$0xff]  ;;  %v4796_v34 = vpack.c.bf16 %v1518_v5, %v1516_v39  ;;  %v1537_v6 = vld [vmem:[#allocation4 + $0x1e8] sm:$0xff] }
 0x81c   :  { %v1194_v45 = vmul.f32 %v5613_v13, %v1184_v10  ;;  %v4798_v10 = vpack.c.bf16 %v1523_v42, %v1521_v32  ;;  %v1520_v13 = vld [vmem:[#allocation4 + $0x160] sm:$0xff]  ;;  %v1539_v5 = vld [vmem:[#allocation4 + $0x1f8] sm:$0xff] }
 0x81d   :  { %v1195_v47 = vsub.f32 1.0, %v1193_v2  ;;  %v1522_v2 = vld [vmem:[#allocation4 + $0x170] sm:$0xff]  ;;  %v4814_v32 = vpack.c.bf16 %v1539_v5, %v1537_v6  ;;  %v1536_v42 = vld [vmem:[#allocation4 + $0x1e0] sm:$0xff]  ;;  %v1331_v5 = vld [vmem:[%s6753_s3] sm:$0x3] }
 0x81e   :  { %v1196_v55 = vsub.f32 1.0, %v1194_v45  ;;  %v1525_v45 = vld [vmem:[#allocation4 + $0x188] sm:$0xff] }
 0x81f   :  { %v1197_v59 = vmul.f32 %v1195_v47, %v1155_v52  ;;  %v1527_v47 = vld [vmem:[#allocation4 + $0x198] sm:$0xff]  ;;  %v1524_v52 = vld [vmem:[#allocation4 + $0x180] sm:$0xff] }
 0x820   :  { %v1198_v1 = vmul.f32 %v1196_v55, %v1156_v60  ;;  %v1526_v55 = vld [vmem:[#allocation4 + $0x190] sm:$0xff]  ;;  %v1531_v60 = vld [vmem:[#allocation4 + $0x1b8] sm:$0xff] }
 0x821   :  { %v1199_v8 = vadd.f32 1.0, %v1197_v59  ;;  %v1529_v59 = vld [vmem:[#allocation4 + $0x1a8] sm:$0xff] }
 0x822   :  { %v1200_v19 = vadd.f32 1.0, %v1198_v1  ;;  %v4804_v1 = vpack.c.bf16 %v1526_v55, %v1524_v52  ;;  %v1544_v52 = vld [vmem:[#allocation4 + $0x220] sm:$0xff]  ;;  %v1546_v55 = vld [vmem:[#allocation4 + $0x230] sm:$0xff] }
 0x823   :  { %v1201_v21 = vmul.f32 %v1199_v8, %v1149_v20  ;;  %v4806_v8 = vpack.c.bf16 %v1531_v60, %v1529_v59  ;;  %v1533_v20 = vld [vmem:[#allocation4 + $0x1c8] sm:$0xff] }
 0x824   :  { %v1202_v48 = vmul.f32 %v1200_v19, %v1150_v11  ;;  %v1528_v11 = vld [vmem:[#allocation4 + $0x1a0] sm:$0xff]  ;;  %v1530_v19 = vld [vmem:[#allocation4 + $0x1b0] sm:$0xff]  ;;  %v1549_v60 = vld [vmem:[#allocation4 + $0x248] sm:$0xff] }
 0x826   :  { %4234 = vmatprep.mubr.msk.f32.mxu1 %vm334_vm4, %v1202_v48  ;;  %v1535_v48 = vld [vmem:[#allocation4 + $0x1d8] sm:$0xff] }
 0x827   :  { %1323 = vmatmul.mubr.f32.vlgmr.msra.gmra.mrb[4].mxu1 %v1201_v21  ;;  %v4808_v21 = vpack.c.bf16 %v1530_v19, %v1528_v11  ;;  %v4810_v61 = vpack.c.bf16 %v1535_v48, %v1533_v20  ;;  %v1548_v19 = vld [vmem:[#allocation4 + $0x240] sm:$0xff]  ;;  %v1550_v20 = vld [vmem:[#allocation4 + $0x250] sm:$0xff]  ;;  %v1553_v48 = vld [vmem:[#allocation4 + $0x268] sm:$0xff] }
 0x828   :  { %4757 = vmatpush1.bf16.msra.mxu1 %v6121_v15 }
 0x829   :  { %4759 = vmatprep.subr.bf16.mxu1 %v6123_v18 }
 0x82c   :  { %4761 = vmatpush1.bf16.msra.mxu1 %v6128_v23 }
 0x82d   :  { %4763 = vmatprep.subr.bf16.mxu1 %v6131_v24 }
 0x830   :  { %4765 = vmatpush1.bf16.msra.mxu1 %v6134_v30 }
 0x831   :  { %4767 = vmatprep.subr.bf16.mxu1 %v6137_v31 }
 0x834   :  { %4769 = vmatpush1.bf16.msra.mxu1 %v6140_v36 }
 0x835   :  { %4771 = vmatprep.subr.bf16.mxu1 %v6143_v38 }
 0x838   :  { %4773 = vmatpush1.bf16.msra.mxu1 %v6146_v43 }
 0x839   :  { %4775 = vmatprep.subr.bf16.mxu1 %v6149_v44 }
 0x83c   :  { %4777 = vmatpush1.bf16.msra.mxu1 %v6152_v49 }
 0x83d   :  { %4779 = vmatprep.subr.bf16.mxu1 %v6155_v50 }
 0x840   :  { %4781 = vmatpush1.bf16.msra.mxu1 %v6158_v57 }
 0x841   :  { %4783 = vmatprep.subr.bf16.mxu1 %v6161_v58 }
 0x844   :  { %4785 = vmatpush1.bf16.msra.mxu1 %v6164_v3 }
 0x845   :  { %4787 = vmatprep.subr.bf16.mxu1 %v6167_v4 }
 0x848   :  { %4789 = vmatpush1.bf16.msra.mxu1 %v6193_v14 }
 0x849   :  { %4791 = vmatprep.subr.bf16.mxu1 %v6197_v46 }
 0x84c   :  { %4793 = vmatpush1.bf16.msra.mxu1 %v6199_v51 }
 0x8fa   :  { %v1324_v41 = vpop.f32.mrb[4].mxu1 }
 0x8fb   :  { %v1325_v53 = vadd.f32 %v1324_v41, %v1248_v0  ;;  %v1326_v22 = vpop.f32.mrb[5].mxu1  ;;  %v1532_v0 = vld [vmem:[#allocation4 + $0x1c0] sm:$0xff] }
 0x8fc   :  { %v1327_v26 = vadd.f32 %v1326_v22, %v1252_v7  ;;  %v1534_v7 = vld [vmem:[#allocation4 + $0x1d0] sm:$0xff] }
 0x8fd   :  { %v1329_v29 = vadd.f32 %v1325_v53, %v6221_v40  ;;  %v4802_v40 = vpack.c.bf16 %v1527_v47, %v1525_v45  ;;  %v4812_v41 = vpack.c.bf16 %v1534_v7, %v1532_v0  ;;  %v1540_v47 = vld [vmem:[#allocation4 + $0x200] sm:$0xff] }
 0x8fe   :  { %v1330_v27 = vadd.f32 %v1327_v26, %v6219_v62  ;;  %v4800_v62 = vpack.c.bf16 %v1522_v2, %v1520_v13  ;;  %v1541_v13 = vld [vmem:[#allocation4 + $0x208] sm:$0xff]  ;;  %v1543_v2 = vld [vmem:[#allocation4 + $0x218] sm:$0xff]  ;;  %v1552_v7 = vld [vmem:[#allocation4 + $0x260] sm:$0xff] }
 0x8ff   :  { %v4818_v45 = vpack.c.bf16 %v1543_v2, %v1541_v13 }
 0x900   :  { %4235 = vmatprep.mubr.msk.f32.mxu0 %vm334_vm4, %v1330_v27 }
 0x901   :  { %1401 = vmatmul.mubr.f32.vlgmr.msra.gmra.mrb[12].mxu0 %v1329_v29 }
 0x902   :  { %4797 = vmatpush1.bf16.msra.mxu0 %v4796_v34  ;;  %v1538_v34 = vld [vmem:[#allocation4 + $0x1f0] sm:$0xff] }
 0x903   :  { %4799 = vmatprep.subr.bf16.mxu0 %v4798_v10  ;;  %v4816_v10 = vpack.c.bf16 %v1538_v34, %v1536_v42  ;;  %v1493_v42 = vrot.slane %v1331_v5, %v6106_v56 }
 0x906   :  { %4801 = vmatpush1.bf16.msra.mxu0 %v4800_v62  ;;  %v1545_v62 = vld [vmem:[#allocation4 + $0x228] sm:$0xff] }
 0x907   :  { %4803 = vmatprep.subr.bf16.mxu0 %v4802_v40  ;;  %v1547_v40 = vld [vmem:[#allocation4 + $0x238] sm:$0xff] }
 0x908   :  { %v4822_v59 = vpack.c.bf16 %v1547_v40, %v1545_v62 }
 0x90a   :  { %4805 = vmatpush1.bf16.msra.mxu0 %v4804_v1  ;;  %v1551_v1 = vld [vmem:[#allocation4 + $0x258] sm:$0xff] }
 0x90b   :  { %4807 = vmatprep.subr.bf16.mxu0 %v4806_v8  ;;  %v4824_v8 = vpack.c.bf16 %v1546_v55, %v1544_v52  ;;  %v4826_v11 = vpack.c.bf16 %v1551_v1, %v1549_v60  ;;  %v1700_v60 = vld [vmem:[#allocation7 + $0x150] sm:$0xff] }
 0x90e   :  { %4809 = vmatpush1.bf16.msra.mxu0 %v4808_v21  ;;  %v1555_v21 = vld [vmem:[#allocation4 + $0x278] sm:$0xff] }
 0x90f   :  { %4811 = vmatprep.subr.bf16.mxu0 %v4810_v61  ;;  %v4828_v61 = vpack.c.bf16 %v1550_v20, %v1548_v19  ;;  %v4830_v0 = vpack.c.bf16 %v1555_v21, %v1553_v48  ;;  %v1702_v20 = vld [vmem:[#allocation7 + $0x160] sm:$0xff]  ;;  %v1704_v48 = vld [vmem:[#allocation7 + $0x170] sm:$0xff] }
 0x910   :  { %v4840_v21 = vpack.c.bf16 %v1704_v48, %v1702_v20  ;;  %v1727_v20 = vld [vmem:[#allocation7 + $0x228] sm:$0xff]  ;;  %v1729_v48 = vld [vmem:[#allocation7 + $0x238] sm:$0xff] }
 0x912   :  { %4813 = vmatpush1.bf16.msra.mxu0 %v4812_v41  ;;  %v1554_v41 = vld [vmem:[#allocation4 + $0x270] sm:$0xff] }
 0x913   :  { %4815 = vmatprep.subr.bf16.mxu0 %v4814_v32  ;;  %v1332_v32 = vld [vmem:[%s6754_s6] sm:$0x3] }
 0x914   :  { %v1506_v62 = vrot.slane %v1332_v32, %v6106_v56 }
 0x916   :  { %4817 = vmatpush1.bf16.msra.mxu0 %v4816_v10  ;;  %v1497_v10 = vrot.slane %v1331_v5, %v6103_v54  ;;  %v1710_v5 = vld [vmem:[#allocation7 + $0x1a0] sm:$0xff] }
 0x917   :  { %4819 = vmatprep.subr.bf16.mxu0 %v4818_v45 }
 0x9d4   :  { %v1402_v53 = vpop.f32.mrb[12].mxu0 }
 0x9d5   :  { %v1407_v22 = vsub.f32 %v1329_v29, %v1402_v53  ;;  %v1404_v26 = vpop.f32.mrb[13].mxu0  ;;  %v1542_v29 = vld [vmem:[#allocation4 + $0x210] sm:$0xff]  ;;  %v4832_v53 = vpack.c.bf16 %v1554_v41, %v1552_v7  ;;  %v1706_v41 = vld [vmem:[#allocation7 + $0x180] sm:$0xff] }
 0x9d6   :  { %v1408_v33 = vsub.f32 %v1330_v27, %v1404_v26  ;;  %v4820_v27 = vpack.c.bf16 %v1542_v29, %v1540_v47  ;;  %v1510_v47 = vrot.slane %v1332_v32, %v6103_v54  ;;  %v1712_v32 = vld [vmem:[#allocation7 + $0x1b0] sm:$0xff] }
 0x9d7   :  { %v1409_v39 = vmul.f32 %v1407_v22, %v1407_v22 }
 0x9d8   :  { %v1410_v35 = vmul.f32 %v1408_v33, %v1408_v33  ;;  %4821 = vmatpush1.bf16.msra.mxu0 %v4820_v27 }
 0x9d9   :  { %4823 = vmatprep.subr.bf16.mxu0 %v4822_v59  ;;  %v1698_v59 = vld [vmem:[#allocation7 + $0x140] sm:$0xff] }
 0x9da   :  { %4236 = vmatprep.mubr.msk.f32.mxu1 %vm334_vm4, %v1410_v35  ;;  %v4836_v1 = vpack.c.bf16 %v1700_v60, %v1698_v59  ;;  %v1723_v59 = vld [vmem:[#allocation7 + $0x208] sm:$0xff]  ;;  %v1725_v60 = vld [vmem:[#allocation7 + $0x218] sm:$0xff] }
 0x9db   :  { %1479 = vmatmul.mubr.f32.vlgmr.msra.gmra.mrb[6].mxu1 %v1409_v39 }
 0x9dc   :  { %4825 = vmatpush1.bf16.msra.mxu0 %v4824_v8  ;;  %v1703_v8 = vld [vmem:[#allocation7 + $0x168] sm:$0xff] }
 0x9dd   :  { %4827 = vmatprep.subr.bf16.mxu0 %v4826_v11  ;;  %v1705_v11 = vld [vmem:[#allocation7 + $0x178] sm:$0xff] }
 0x9de   :  { %v4838_v19 = vpack.c.bf16 %v1705_v11, %v1703_v8  ;;  %v1722_v8 = vld [vmem:[#allocation7 + $0x200] sm:$0xff]  ;;  %v1724_v11 = vld [vmem:[#allocation7 + $0x210] sm:$0xff] }
 0x9e0   :  { %4829 = vmatpush1.bf16.msra.mxu0 %v4828_v61  ;;  %v1707_v61 = vld [vmem:[#allocation7 + $0x188] sm:$0xff] }
 0x9e1   :  { %4831 = vmatprep.subr.bf16.mxu0 %v4830_v0  ;;  %v1709_v0 = vld [vmem:[#allocation7 + $0x198] sm:$0xff] }
 0x9e2   :  { %v4842_v7 = vpack.c.bf16 %v1709_v0, %v1707_v61  ;;  %v1726_v61 = vld [vmem:[#allocation7 + $0x220] sm:$0xff]  ;;  %v1728_v0 = vld [vmem:[#allocation7 + $0x230] sm:$0xff] }
 0x9e4   :  { %4833 = vmatpush1.bf16.msra.mxu0 %v4832_v53  ;;  %v1708_v53 = vld [vmem:[#allocation7 + $0x190] sm:$0xff] }
 0x9e5   :  { %4875 = vmatprep.subr.bf16.mxu0 %v6119_v12 }
 0xaae   :  { %v1480_v26 = vpop.f32.mrb[6].mxu1 }
 0xaaf   :  { %v1481_v35 = vadd.f32 1e-05, %v1480_v26  ;;  %v1482_v39 = vpop.f32.mrb[7].mxu1  ;;  %v4844_v26 = vpack.c.bf16 %v1708_v53, %v1706_v41  ;;  %v1731_v41 = vld [vmem:[#allocation7 + $0x248] sm:$0xff]  ;;  %v1733_v53 = vld [vmem:[#allocation7 + $0x258] sm:$0xff] }
 0xab0   :  { %v1483_v6 = vadd.f32 1e-05, %v1482_v39  ;;  %v1713_v39 = vld [vmem:[#allocation7 + $0x1b8] sm:$0xff] }
 0xab1   :  { %5614 = vrsqrt.f32 %v1481_v35  ;;  %v1711_v35 = vld [vmem:[#allocation7 + $0x1a8] sm:$0xff] }
 0xab2   :  { %5616 = vrsqrt.f32 %v1483_v6  ;;  %v4846_v6 = vpack.c.bf16 %v1713_v39, %v1711_v35  ;;  %v1730_v35 = vld [vmem:[#allocation7 + $0x240] sm:$0xff]  ;;  %v1732_v39 = vld [vmem:[#allocation7 + $0x250] sm:$0xff] }
 0xabb   :  { %v5615_v34 = vpop.eup %5614 }
 0xabc   :  { %v5617_v13 = vpop.eup %5616  ;;  %v1487_v2 = vmul.f32 %v5615_v34, %v1407_v22  ;;  %v1699_v22 = vld [vmem:[#allocation7 + $0x148] sm:$0xff] }
 0xabd   :  { %v1488_v45 = vmul.f32 %v5617_v13, %v1408_v33  ;;  %v1701_v33 = vld [vmem:[#allocation7 + $0x158] sm:$0xff]  ;;  %v1715_v34 = vld [vmem:[#allocation7 + $0x1c8] sm:$0xff] }
 0xabe   :  { %v1500_v29 = vmul.f32 %v1493_v42, %v1487_v2  ;;  %v4834_v55 = vpack.c.bf16 %v1701_v33, %v1699_v22  ;;  %v4848_v42 = vpack.c.bf16 %v1712_v32, %v1710_v5  ;;  %v1714_v2 = vld [vmem:[#allocation7 + $0x1c0] sm:$0xff]  ;;  %v1720_v33 = vld [vmem:[#allocation7 + $0x1f0] sm:$0xff]  ;;  %v1735_v5 = vld [vmem:[#allocation7 + $0x268] sm:$0xff] }
 0xabf   :  { %v1501_v27 = vmul.f32 %v1497_v10, %v1488_v45  ;;  %v1717_v10 = vld [vmem:[#allocation7 + $0x1d8] sm:$0xff]  ;;  %v1716_v45 = vld [vmem:[#allocation7 + $0x1d0] sm:$0xff]  ;;  %v1718_v22 = vld [vmem:[#allocation7 + $0x1e0] sm:$0xff] }
 0xac0   :  { %v6287_v52 = vadd.f32 %v1506_v62, %v1500_v29  ;;  %4835 = vmatprep.subr.bf16.mxu1 %v4834_v55  ;;  %v4850_v13 = vpack.c.bf16 %v1717_v10, %v1715_v34  ;;  %v1719_v29 = vld [vmem:[#allocation7 + $0x1e8] sm:$0xff]  ;;  %v1721_v62 = vld [vmem:[#allocation7 + $0x1f8] sm:$0xff]  ;;  %v4856_v55 = vpack.c.bf16 %v1720_v33, %v1718_v22  ;;  %v1734_v34 = vld [vmem:[#allocation7 + $0x260] sm:$0xff] }
 0xac1   :  { %v6285_v40 = vadd.f32 %v1510_v47, %v1501_v27  ;;  %4837 = vmatpush1.bf16.msra.mxu1 %v4836_v1  ;;  %v4852_v47 = vpack.c.bf16 %v1716_v45, %v1714_v2  ;;  %v4854_v27 = vpack.c.bf16 %v1721_v62, %v1719_v29  ;;  %v4858_v1 = vpack.c.bf16 %v1725_v60, %v1723_v59  ;;  %v1737_v32 = vld [vmem:[#allocation7 + $0x278] sm:$0xff]  ;;  %v1736_v10 = vld [vmem:[#allocation7 + $0x270] sm:$0xff]  ;;  %v4237_v2 = vld [vmem:[%s6747_s5 + $0x2] sm:$0x3] }
 0xac2   :  { %4839 = vmatprep.subr.bf16.mxu1 %v4838_v19  ;;  %v4860_v19 = vpack.c.bf16 %v1724_v11, %v1722_v8  ;;  %v1562_v45 = vrot.slane %v4237_v2, %v6106_v56 }
 0xac3   :  { %4238 = vmatprep.mubr.msk.f32.mxu0 %vm334_vm4, %v6285_v40 }
 0xac4   :  { %1637 = vmatmul.mubr.f32.vlgmr.msra.gmra.mrb[14].mxu0 %v6287_v52 }
 0xac5   :  { %4877 = vmatpush1.bf16.msra.mxu0 %v6121_v15  ;;  %4841 = vmatpush1.bf16.msra.mxu1 %v4840_v21  ;;  %v4862_v21 = vpack.c.bf16 %v1729_v48, %v1727_v20 }
 0xac6   :  { %4879 = vmatprep.subr.bf16.mxu0 %v6123_v18  ;;  %4843 = vmatprep.subr.bf16.mxu1 %v4842_v7  ;;  %v4864_v7 = vpack.c.bf16 %v1728_v0, %v1726_v61 }
 0xac9   :  { %4881 = vmatpush1.bf16.msra.mxu0 %v6128_v23  ;;  %4845 = vmatpush1.bf16.msra.mxu1 %v4844_v26  ;;  %v4866_v26 = vpack.c.bf16 %v1733_v53, %v1731_v41 }
 0xaca   :  { %4883 = vmatprep.subr.bf16.mxu0 %v6131_v24  ;;  %4847 = vmatprep.subr.bf16.mxu1 %v4846_v6  ;;  %v4868_v6 = vpack.c.bf16 %v1732_v39, %v1730_v35 }
 0xacd   :  { %4885 = vmatpush1.bf16.msra.mxu0 %v6134_v30  ;;  %4849 = vmatpush1.bf16.msra.mxu1 %v4848_v42  ;;  %v4870_v42 = vpack.c.bf16 %v1737_v32, %v1735_v5 }
 0xace   :  { %4887 = vmatprep.subr.bf16.mxu0 %v6137_v31  ;;  %4851 = vmatprep.subr.bf16.mxu1 %v4850_v13  ;;  %v4872_v13 = vpack.c.bf16 %v1736_v10, %v1734_v34 }
 0xad1   :  { %4889 = vmatpush1.bf16.msra.mxu0 %v6140_v36  ;;  %4853 = vmatpush1.bf16.msra.mxu1 %v4852_v47  ;;  %v1566_v47 = vrot.slane %v4237_v2, %v6103_v54 }
 0xad2   :  { %4891 = vmatprep.subr.bf16.mxu0 %v6143_v38  ;;  %4855 = vmatprep.subr.bf16.mxu1 %v4854_v27 }
 0xad5   :  { %4893 = vmatpush1.bf16.msra.mxu0 %v6146_v43  ;;  %4857 = vmatpush1.bf16.msra.mxu1 %v4856_v55 }
 0xad6   :  { %4895 = vmatprep.subr.bf16.mxu0 %v6149_v44  ;;  %4859 = vmatprep.subr.bf16.mxu1 %v4858_v1 }
 0xad9   :  { %4897 = vmatpush1.bf16.msra.mxu0 %v6152_v49  ;;  %4861 = vmatpush1.bf16.msra.mxu1 %v4860_v19 }
 0xada   :  { %4899 = vmatprep.subr.bf16.mxu0 %v6155_v50  ;;  %4863 = vmatprep.subr.bf16.mxu1 %v4862_v21 }
 0xadd   :  { %4901 = vmatpush1.bf16.msra.mxu0 %v6158_v57  ;;  %4865 = vmatpush1.bf16.msra.mxu1 %v4864_v7 }
 0xade   :  { %4903 = vmatprep.subr.bf16.mxu0 %v6161_v58  ;;  %4867 = vmatprep.subr.bf16.mxu1 %v4866_v26 }
 0xae1   :  { %4905 = vmatpush1.bf16.msra.mxu0 %v6164_v3  ;;  %4869 = vmatpush1.bf16.msra.mxu1 %v4868_v6 }
 0xae2   :  { %4907 = vmatprep.subr.bf16.mxu0 %v6167_v4  ;;  %4871 = vmatprep.subr.bf16.mxu1 %v4870_v42 }
 0xae5   :  { %4909 = vmatpush1.bf16.msra.mxu0 %v6193_v14  ;;  %4873 = vmatpush1.bf16.msra.mxu1 %v4872_v13 }
 0xae6   :  { %4911 = vmatprep.subr.bf16.mxu0 %v6197_v46  ;;  %4915 = vmatprep.subr.bf16.mxu1 %v6119_v12 }
 0xae9   :  { %4913 = vmatpush1.bf16.msra.mxu0 %v6199_v51 }
 0xb97   :  { %v1638_v29 = vpop.f32.mrb[14].mxu0 }
 0xb98   :  { %v1639_v62 = vadd.f32 %v1638_v29, %v1562_v45  ;;  %v1640_v27 = vpop.f32.mrb[15].mxu0 }
 0xb99   :  { %v1641_v22 = vadd.f32 %v1640_v27, %v1566_v47 }
 0xb9a   :  { %v1645_v33 = vmul.f32 0.70710677, %v1639_v62 }
 0xb9b   :  { %v1646_v55 = vmul.f32 0.70710677, %v1641_v22 }
 0xb9c   :  { %v1651_v59 = vand.u32 2147483647, %v1645_v33  ;;  %vm1647_vm9 = vcmp.ge.f32.partialorder %v1645_v33, 0.0 }
 0xb9d   :  { %v1652_v60 = vand.u32 2147483647, %v1646_v55  ;;  %vm1648_vm10 = vcmp.ge.f32.partialorder %v1646_v55, 0.0 }
 0xb9e   :  { %v1653_v1 = vmul.f32 0.3275911, %v1651_v59  ;;  %v1679_v20 = vsub.f32 0.0, %v1651_v59 }
 0xb9f   :  { %v1654_v8 = vmul.f32 0.3275911, %v1652_v60  ;;  %v1680_v48 = vsub.f32 0.0, %v1652_v60 }
 0xba0   :  { %v1655_v11 = vadd.f32 1.0, %v1653_v1  ;;  %v1681_v61 = vmul.f32 %v1679_v20, %v1651_v59 }
 0xba1   :  { %v1656_v19 = vadd.f32 1.0, %v1654_v8  ;;  %v1682_v41 = vmul.f32 %v1680_v48, %v1652_v60 }
 0xba2   :  { %5618 = vrcp.f32 %v1655_v11  ;;  %v1683_v35 = vmul.f32 1.442695, %v1681_v61  ;;  %v1649_v61 = vsel %vm1647_vm9, 1.0, %v5857_v25 }
 0xba3   :  { %5620 = vrcp.f32 %v1656_v19  ;;  %v1685_v5 = vmul.f32 1.442695, %v1682_v41 }
 0xba4   :  { %5622 = vpow2.f32 %v1683_v35 }
 0xba5   :  { %5624 = vpow2.f32 %v1685_v5  ;;  %v1643_v5 = vmul.f32 0.5, %v1639_v62  ;;  %v4239_v62 = vld [vmem:[%s6748_s13 + $0x2] sm:$0x3] }
 0xba6   :  { %v1748_v33 = vrot.slane %v4239_v62, %v6103_v54 }
 0xbac   :  { %v5619_v21 = vpop.eup %5618 }
 0xbad   :  { %v5621_v0 = vpop.eup %5620  ;;  %v1661_v7 = vmul.f32 1.0614054, %v5619_v21 }
 0xbae   :  { %v1662_v53 = vmul.f32 1.0614054, %v5621_v0  ;;  %v5623_v1 = vpop.eup %5622 }
 0xbaf   :  { %v1663_v26 = vadd.f32 -1.4531521, %v1661_v7  ;;  %v5625_v11 = vpop.eup %5624 }
 0xbb0   :  { %v1664_v39 = vadd.f32 -1.4531521, %v1662_v53  ;;  %v1650_v53 = vsel %vm1648_vm10, 1.0, %v5857_v25 }
 0xbb1   :  { %v1665_v6 = vmul.f32 %v5619_v21, %v1663_v26 }
 0xbb2   :  { %v1666_v32 = vmul.f32 %v5621_v0, %v1664_v39  ;;  %v1644_v39 = vmul.f32 0.5, %v1641_v22  ;;  %v1744_v22 = vrot.slane %v4239_v62, %v6106_v56 }
 0xbb3   :  { %v1667_v42 = vadd.f32 1.4214138, %v1665_v6 }
 0xbb4   :  { %v1668_v34 = vadd.f32 1.4214138, %v1666_v32 }
 0xbb5   :  { %v1669_v10 = vmul.f32 %v5619_v21, %v1667_v42 }
 0xbb6   :  { %v1670_v13 = vmul.f32 %v5621_v0, %v1668_v34 }
 0xbb7   :  { %v1671_v2 = vadd.f32 -0.28449672, %v1669_v10 }
 0xbb8   :  { %v1672_v45 = vadd.f32 -0.28449672, %v1670_v13 }
 0xbb9   :  { %v1673_v47 = vmul.f32 %v5619_v21, %v1671_v2  ;;  %v2015_v2 = vld [vmem:[#allocation9 + $0x148] sm:$0xff] }
 0xbba   :  { %v1674_v29 = vmul.f32 %v5621_v0, %v1672_v45  ;;  %v2017_v45 = vld [vmem:[#allocation9 + $0x158] sm:$0xff] }
 0xbbb   :  { %v1675_v27 = vadd.f32 0.2548296, %v1673_v47  ;;  %v2014_v47 = vld [vmem:[#allocation9 + $0x140] sm:$0xff] }
 0xbbc   :  { %v1676_v59 = vadd.f32 0.2548296, %v1674_v29  ;;  %v4954_v29 = vpack.c.bf16 %v2017_v45, %v2015_v2 }
 0xbbd   :  { %v1677_v60 = vmul.f32 %v5619_v21, %v1675_v27  ;;  %v2016_v27 = vld [vmem:[#allocation9 + $0x150] sm:$0xff] }
 0xbbe   :  { %v1678_v8 = vmul.f32 %v5621_v0, %v1676_v59  ;;  %v2019_v59 = vld [vmem:[#allocation9 + $0x168] sm:$0xff]  ;;  %4955 = vmatprep.subr.bf16.mxu0 %v4954_v29 }
 0xbbf   :  { %v1687_v19 = vmul.f32 %v5623_v1, %v1677_v60  ;;  %v2021_v60 = vld [vmem:[#allocation9 + $0x178] sm:$0xff]  ;;  %v4956_v1 = vpack.c.bf16 %v2016_v27, %v2014_v47  ;;  %v2035_v29 = vld [vmem:[#allocation9 + $0x1e8] sm:$0xff] }
 0xbc0   :  { %v1688_v20 = vmul.f32 %v5625_v11, %v1678_v8  ;;  %v4958_v8 = vpack.c.bf16 %v2021_v60, %v2019_v59  ;;  %v2018_v11 = vld [vmem:[#allocation9 + $0x160] sm:$0xff]  ;;  %v2037_v27 = vld [vmem:[#allocation9 + $0x1f8] sm:$0xff] }
 0xbc1   :  { %v1689_v48 = vsub.f32 1.0, %v1687_v19  ;;  %v2020_v19 = vld [vmem:[#allocation9 + $0x170] sm:$0xff]  ;;  %v4974_v59 = vpack.c.bf16 %v2037_v27, %v2035_v29  ;;  %v2034_v60 = vld [vmem:[#allocation9 + $0x1e0] sm:$0xff] }
 0xbc2   :  { %v1690_v7 = vsub.f32 1.0, %v1688_v20  ;;  %v2023_v20 = vld [vmem:[#allocation9 + $0x188] sm:$0xff]  ;;  %v4241_v27 = vld [vmem:[%s6749_s17 + $0x2] sm:$0x3] }
 0xbc3   :  { %v1691_v41 = vmul.f32 %v1689_v48, %v1649_v61  ;;  %v2025_v48 = vld [vmem:[#allocation9 + $0x198] sm:$0xff]  ;;  %v2022_v61 = vld [vmem:[#allocation9 + $0x180] sm:$0xff] }
 0xbc4   :  { %v1692_v26 = vmul.f32 %v1690_v7, %v1650_v53  ;;  %v2024_v7 = vld [vmem:[#allocation9 + $0x190] sm:$0xff]  ;;  %v2029_v53 = vld [vmem:[#allocation9 + $0x1b8] sm:$0xff] }
 0xbc5   :  { %v1693_v35 = vadd.f32 1.0, %v1691_v41  ;;  %v2027_v41 = vld [vmem:[#allocation9 + $0x1a8] sm:$0xff] }
 0xbc6   :  { %v1694_v6 = vadd.f32 1.0, %v1692_v26  ;;  %v4964_v26 = vpack.c.bf16 %v2024_v7, %v2022_v61  ;;  %v2042_v61 = vld [vmem:[#allocation9 + $0x220] sm:$0xff]  ;;  %v2044_v7 = vld [vmem:[#allocation9 + $0x230] sm:$0xff] }
 0xbc7   :  { %v1695_v32 = vmul.f32 %v1693_v35, %v1643_v5  ;;  %v4966_v35 = vpack.c.bf16 %v2029_v53, %v2027_v41  ;;  %v2031_v5 = vld [vmem:[#allocation9 + $0x1c8] sm:$0xff] }
 0xbc8   :  { %v1696_v21 = vmul.f32 %v1694_v6, %v1644_v39  ;;  %v2026_v39 = vld [vmem:[#allocation9 + $0x1a0] sm:$0xff]  ;;  %v2028_v6 = vld [vmem:[#allocation9 + $0x1b0] sm:$0xff]  ;;  %v2047_v53 = vld [vmem:[#allocation9 + $0x248] sm:$0xff] }
 0xbca   :  { %4240 = vmatprep.mubr.msk.f32.mxu1 %vm334_vm4, %v1696_v21  ;;  %v2033_v21 = vld [vmem:[#allocation9 + $0x1d8] sm:$0xff] }
 0xbcb   :  { %1819 = vmatmul.mubr.f32.vlgmr.msra.gmra.mrb[8].mxu1 %v1695_v32  ;;  %v4968_v32 = vpack.c.bf16 %v2028_v6, %v2026_v39  ;;  %v4970_v62 = vpack.c.bf16 %v2033_v21, %v2031_v5  ;;  %v2046_v6 = vld [vmem:[#allocation9 + $0x240] sm:$0xff]  ;;  %v2048_v5 = vld [vmem:[#allocation9 + $0x250] sm:$0xff]  ;;  %v2051_v21 = vld [vmem:[#allocation9 + $0x268] sm:$0xff] }
 0xbcc   :  { %4917 = vmatpush1.bf16.msra.mxu1 %v6121_v15 }
 0xbcd   :  { %4919 = vmatprep.subr.bf16.mxu1 %v6123_v18 }
 0xbd0   :  { %4921 = vmatpush1.bf16.msra.mxu1 %v6128_v23 }
 0xbd1   :  { %4923 = vmatprep.subr.bf16.mxu1 %v6131_v24 }
 0xbd4   :  { %4925 = vmatpush1.bf16.msra.mxu1 %v6134_v30 }
 0xbd5   :  { %4927 = vmatprep.subr.bf16.mxu1 %v6137_v31 }
 0xbd8   :  { %4929 = vmatpush1.bf16.msra.mxu1 %v6140_v36 }
 0xbd9   :  { %4931 = vmatprep.subr.bf16.mxu1 %v6143_v38 }
 0xbdc   :  { %4933 = vmatpush1.bf16.msra.mxu1 %v6146_v43 }
 0xbdd   :  { %4935 = vmatprep.subr.bf16.mxu1 %v6149_v44 }
 0xbe0   :  { %4937 = vmatpush1.bf16.msra.mxu1 %v6152_v49 }
 0xbe1   :  { %4939 = vmatprep.subr.bf16.mxu1 %v6155_v50 }
 0xbe4   :  { %4941 = vmatpush1.bf16.msra.mxu1 %v6158_v57 }
 0xbe5   :  { %4943 = vmatprep.subr.bf16.mxu1 %v6161_v58 }
 0xbe8   :  { %4945 = vmatpush1.bf16.msra.mxu1 %v6164_v3 }
 0xbe9   :  { %4947 = vmatprep.subr.bf16.mxu1 %v6167_v4 }
 0xbec   :  { %4949 = vmatpush1.bf16.msra.mxu1 %v6193_v14 }
 0xbed   :  { %4951 = vmatprep.subr.bf16.mxu1 %v6197_v46 }
 0xbf0   :  { %4953 = vmatpush1.bf16.msra.mxu1 %v6199_v51 }
 0xc9e   :  { %v1820_v55 = vpop.f32.mrb[8].mxu1 }
 0xc9f   :  { %v1821_v0 = vadd.f32 %v1820_v55, %v1744_v22  ;;  %v1822_v42 = vpop.f32.mrb[9].mxu1  ;;  %v2030_v22 = vld [vmem:[#allocation9 + $0x1c0] sm:$0xff] }
 0xca0   :  { %v1823_v34 = vadd.f32 %v1822_v42, %v1748_v33  ;;  %v2032_v33 = vld [vmem:[#allocation9 + $0x1d0] sm:$0xff] }
 0xca1   :  { %v1825_v13 = vadd.f32 %v1821_v0, %v6287_v52  ;;  %v4962_v52 = vpack.c.bf16 %v2025_v48, %v2023_v20  ;;  %v4972_v55 = vpack.c.bf16 %v2032_v33, %v2030_v22  ;;  %v2038_v48 = vld [vmem:[#allocation9 + $0x200] sm:$0xff] }
 0xca2   :  { %v1826_v10 = vadd.f32 %v1823_v34, %v6285_v40  ;;  %v4960_v40 = vpack.c.bf16 %v2020_v19, %v2018_v11  ;;  %v2039_v11 = vld [vmem:[#allocation9 + $0x208] sm:$0xff]  ;;  %v2041_v19 = vld [vmem:[#allocation9 + $0x218] sm:$0xff]  ;;  %v2050_v33 = vld [vmem:[#allocation9 + $0x260] sm:$0xff] }
 0xca3   :  { %v4978_v20 = vpack.c.bf16 %v2041_v19, %v2039_v11 }
 0xca4   :  { %4243 = vmatprep.mubr.msk.f32.mxu0 %vm334_vm4, %v1826_v10 }
 0xca5   :  { %1899 = vmatmul.mubr.f32.vlgmr.msra.gmra.mrb[16].mxu0 %v1825_v13 }
 0xca6   :  { %4957 = vmatpush1.bf16.msra.mxu0 %v4956_v1  ;;  %v2036_v1 = vld [vmem:[#allocation9 + $0x1f0] sm:$0xff] }
 0xca7   :  { %4959 = vmatprep.subr.bf16.mxu0 %v4958_v8  ;;  %v4976_v8 = vpack.c.bf16 %v2036_v1, %v2034_v60  ;;  %v1991_v60 = vrot.slane %v4241_v27, %v6106_v56 }
 0xcaa   :  { %4961 = vmatpush1.bf16.msra.mxu0 %v4960_v40  ;;  %v2043_v40 = vld [vmem:[#allocation9 + $0x228] sm:$0xff] }
 0xcab   :  { %4963 = vmatprep.subr.bf16.mxu0 %v4962_v52  ;;  %v2045_v52 = vld [vmem:[#allocation9 + $0x238] sm:$0xff] }
 0xcac   :  { %v4982_v41 = vpack.c.bf16 %v2045_v52, %v2043_v40 }
 0xcae   :  { %4965 = vmatpush1.bf16.msra.mxu0 %v4964_v26  ;;  %v2049_v26 = vld [vmem:[#allocation9 + $0x258] sm:$0xff] }
 0xcaf   :  { %4967 = vmatprep.subr.bf16.mxu0 %v4966_v35  ;;  %v4984_v35 = vpack.c.bf16 %v2044_v7, %v2042_v61  ;;  %v4986_v39 = vpack.c.bf16 %v2049_v26, %v2047_v53  ;;  %v2198_v53 = vld [vmem:[#allocation10 + $0x150] sm:$0xff] }
 0xcb2   :  { %4969 = vmatpush1.bf16.msra.mxu0 %v4968_v32  ;;  %v2053_v32 = vld [vmem:[#allocation9 + $0x278] sm:$0xff] }
 0xcb3   :  { %4971 = vmatprep.subr.bf16.mxu0 %v4970_v62  ;;  %v4988_v62 = vpack.c.bf16 %v2048_v5, %v2046_v6  ;;  %v4990_v22 = vpack.c.bf16 %v2053_v32, %v2051_v21  ;;  %v2200_v5 = vld [vmem:[#allocation10 + $0x160] sm:$0xff]  ;;  %v2202_v21 = vld [vmem:[#allocation10 + $0x170] sm:$0xff] }
 0xcb4   :  { %v5000_v32 = vpack.c.bf16 %v2202_v21, %v2200_v5  ;;  %v2225_v5 = vld [vmem:[#allocation10 + $0x228] sm:$0xff]  ;;  %v2227_v21 = vld [vmem:[#allocation10 + $0x238] sm:$0xff] }
 0xcb6   :  { %4973 = vmatpush1.bf16.msra.mxu0 %v4972_v55  ;;  %v2052_v55 = vld [vmem:[#allocation9 + $0x270] sm:$0xff] }
 0xcb7   :  { %4975 = vmatprep.subr.bf16.mxu0 %v4974_v59  ;;  %v4242_v59 = vld [vmem:[%s6750_s21 + $0x2] sm:$0x3] }
 0xcb8   :  { %v2004_v40 = vrot.slane %v4242_v59, %v6106_v56 }
 0xcba   :  { %4977 = vmatpush1.bf16.msra.mxu0 %v4976_v8  ;;  %v1995_v8 = vrot.slane %v4241_v27, %v6103_v54  ;;  %v2208_v27 = vld [vmem:[#allocation10 + $0x1a0] sm:$0xff] }
 0xcbb   :  { %4979 = vmatprep.subr.bf16.mxu0 %v4978_v20 }
 0xd78   :  { %v1900_v0 = vpop.f32.mrb[16].mxu0 }
 0xd79   :  { %v1905_v42 = vsub.f32 %v1825_v13, %v1900_v0  ;;  %v1902_v34 = vpop.f32.mrb[17].mxu0  ;;  %v2040_v13 = vld [vmem:[#allocation9 + $0x210] sm:$0xff]  ;;  %v4992_v0 = vpack.c.bf16 %v2052_v55, %v2050_v33  ;;  %v2204_v55 = vld [vmem:[#allocation10 + $0x180] sm:$0xff] }
 0xd7a   :  { %v1906_v2 = vsub.f32 %v1826_v10, %v1902_v34  ;;  %v4980_v10 = vpack.c.bf16 %v2040_v13, %v2038_v48  ;;  %v2008_v48 = vrot.slane %v4242_v59, %v6103_v54  ;;  %v2210_v59 = vld [vmem:[#allocation10 + $0x1b0] sm:$0xff] }
 0xd7b   :  { %v1907_v47 = vmul.f32 %v1905_v42, %v1905_v42 }
 0xd7c   :  { %v1908_v45 = vmul.f32 %v1906_v2, %v1906_v2  ;;  %4981 = vmatpush1.bf16.msra.mxu0 %v4980_v10 }
 0xd7d   :  { %4983 = vmatprep.subr.bf16.mxu0 %v4982_v41  ;;  %v2196_v41 = vld [vmem:[#allocation10 + $0x140] sm:$0xff] }
 0xd7e   :  { %4244 = vmatprep.mubr.msk.f32.mxu1 %vm334_vm4, %v1908_v45  ;;  %v4996_v26 = vpack.c.bf16 %v2198_v53, %v2196_v41  ;;  %v2221_v41 = vld [vmem:[#allocation10 + $0x208] sm:$0xff]  ;;  %v2223_v53 = vld [vmem:[#allocation10 + $0x218] sm:$0xff] }
 0xd7f   :  { %1977 = vmatmul.mubr.f32.vlgmr.msra.gmra.mrb[10].mxu1 %v1907_v47 }
 0xd80   :  { %4985 = vmatpush1.bf16.msra.mxu0 %v4984_v35  ;;  %v2201_v35 = vld [vmem:[#allocation10 + $0x168] sm:$0xff] }
 0xd81   :  { %4987 = vmatprep.subr.bf16.mxu0 %v4986_v39  ;;  %v2203_v39 = vld [vmem:[#allocation10 + $0x178] sm:$0xff] }
 0xd82   :  { %v4998_v6 = vpack.c.bf16 %v2203_v39, %v2201_v35  ;;  %v2220_v35 = vld [vmem:[#allocation10 + $0x200] sm:$0xff]  ;;  %v2222_v39 = vld [vmem:[#allocation10 + $0x210] sm:$0xff] }
 0xd84   :  { %4989 = vmatpush1.bf16.msra.mxu0 %v4988_v62  ;;  %v2205_v62 = vld [vmem:[#allocation10 + $0x188] sm:$0xff] }
 0xd85   :  { %4991 = vmatprep.subr.bf16.mxu0 %v4990_v22  ;;  %v2207_v22 = vld [vmem:[#allocation10 + $0x198] sm:$0xff] }
 0xd86   :  { %v5002_v33 = vpack.c.bf16 %v2207_v22, %v2205_v62  ;;  %v2224_v62 = vld [vmem:[#allocation10 + $0x220] sm:$0xff]  ;;  %v2226_v22 = vld [vmem:[#allocation10 + $0x230] sm:$0xff] }
 0xd88   :  { %4993 = vmatpush1.bf16.msra.mxu0 %v4992_v0  ;;  %v2206_v0 = vld [vmem:[#allocation10 + $0x190] sm:$0xff] }
 0xd89   :  { %5035 = vmatprep.subr.bf16.mxu0 %v6119_v12 }
 0xe52   :  { %v1978_v34 = vpop.f32.mrb[10].mxu1 }
 0xe53   :  { %v1979_v45 = vadd.f32 1e-05, %v1978_v34  ;;  %v1980_v47 = vpop.f32.mrb[11].mxu1  ;;  %v5004_v34 = vpack.c.bf16 %v2206_v0, %v2204_v55  ;;  %v2229_v55 = vld [vmem:[#allocation10 + $0x248] sm:$0xff]  ;;  %v2231_v0 = vld [vmem:[#allocation10 + $0x258] sm:$0xff] }
 0xe54   :  { %v1981_v29 = vadd.f32 1e-05, %v1980_v47  ;;  %v2211_v47 = vld [vmem:[#allocation10 + $0x1b8] sm:$0xff] }
 0xe55   :  { %5626 = vrsqrt.f32 %v1979_v45  ;;  %v2209_v45 = vld [vmem:[#allocation10 + $0x1a8] sm:$0xff] }
 0xe56   :  { %5628 = vrsqrt.f32 %v1981_v29  ;;  %v5006_v29 = vpack.c.bf16 %v2211_v47, %v2209_v45  ;;  %v2228_v45 = vld [vmem:[#allocation10 + $0x240] sm:$0xff]  ;;  %v2230_v47 = vld [vmem:[#allocation10 + $0x250] sm:$0xff] }
 0xe5f   :  { %v5627_v1 = vpop.eup %5626 }
 0xe60   :  { %v5629_v11 = vpop.eup %5628  ;;  %v1985_v19 = vmul.f32 %v5627_v1, %v1905_v42  ;;  %v2197_v42 = vld [vmem:[#allocation10 + $0x148] sm:$0xff] }
 0xe61   :  { %v1986_v20 = vmul.f32 %v5629_v11, %v1906_v2  ;;  %v2199_v2 = vld [vmem:[#allocation10 + $0x158] sm:$0xff]  ;;  %v2213_v1 = vld [vmem:[#allocation10 + $0x1c8] sm:$0xff] }
 0xe62   :  { %v1998_v13 = vmul.f32 %v1991_v60, %v1985_v19  ;;  %v4994_v7 = vpack.c.bf16 %v2199_v2, %v2197_v42  ;;  %v5008_v60 = vpack.c.bf16 %v2210_v59, %v2208_v27  ;;  %v2212_v19 = vld [vmem:[#allocation10 + $0x1c0] sm:$0xff]  ;;  %v2218_v2 = vld [vmem:[#allocation10 + $0x1f0] sm:$0xff]  ;;  %v2233_v27 = vld [vmem:[#allocation10 + $0x268] sm:$0xff] }
 0xe63   :  { %v1999_v10 = vmul.f32 %v1995_v8, %v1986_v20  ;;  %v2215_v8 = vld [vmem:[#allocation10 + $0x1d8] sm:$0xff]  ;;  %v2214_v20 = vld [vmem:[#allocation10 + $0x1d0] sm:$0xff]  ;;  %v2216_v42 = vld [vmem:[#allocation10 + $0x1e0] sm:$0xff] }
 0xe64   :  { %v6353_v61 = vadd.f32 %v2004_v40, %v1998_v13  ;;  %4995 = vmatprep.subr.bf16.mxu1 %v4994_v7  ;;  %v5010_v11 = vpack.c.bf16 %v2215_v8, %v2213_v1  ;;  %v2217_v13 = vld [vmem:[#allocation10 + $0x1e8] sm:$0xff]  ;;  %v2219_v40 = vld [vmem:[#allocation10 + $0x1f8] sm:$0xff]  ;;  %v5016_v7 = vpack.c.bf16 %v2218_v2, %v2216_v42  ;;  %v2232_v1 = vld [vmem:[#allocation10 + $0x260] sm:$0xff] }
 0xe65   :  { %v6351_v52 = vadd.f32 %v2008_v48, %v1999_v10  ;;  %4997 = vmatpush1.bf16.msra.mxu1 %v4996_v26  ;;  %v5012_v48 = vpack.c.bf16 %v2214_v20, %v2212_v19  ;;  %v5014_v10 = vpack.c.bf16 %v2219_v40, %v2217_v13  ;;  %v5018_v26 = vpack.c.bf16 %v2223_v53, %v2221_v41  ;;  %v2235_v59 = vld [vmem:[#allocation10 + $0x278] sm:$0xff]  ;;  %v2234_v8 = vld [vmem:[#allocation10 + $0x270] sm:$0xff]  ;;  %v4245_v19 = vld [vmem:[%s6751_s25 + $0x2] sm:$0x3] }
 0xe66   :  { %4999 = vmatprep.subr.bf16.mxu1 %v4998_v6  ;;  %v5020_v6 = vpack.c.bf16 %v2222_v39, %v2220_v35  ;;  %v2060_v20 = vrot.slane %v4245_v19, %v6106_v56 }
 0xe67   :  { %4246 = vmatprep.mubr.msk.f32.mxu0 %vm334_vm4, %v6351_v52 }
 0xe68   :  { %2135 = vmatmul.mubr.f32.vlgmr.msra.gmra.mrb[18].mxu0 %v6353_v61 }
 0xe69   :  { %5037 = vmatpush1.bf16.msra.mxu0 %v6121_v15  ;;  %5001 = vmatpush1.bf16.msra.mxu1 %v5000_v32  ;;  %v5022_v32 = vpack.c.bf16 %v2227_v21, %v2225_v5 }
 0xe6a   :  { %5039 = vmatprep.subr.bf16.mxu0 %v6123_v18  ;;  %5003 = vmatprep.subr.bf16.mxu1 %v5002_v33  ;;  %v5024_v33 = vpack.c.bf16 %v2226_v22, %v2224_v62 }
 0xe6d   :  { %5041 = vmatpush1.bf16.msra.mxu0 %v6128_v23  ;;  %5005 = vmatpush1.bf16.msra.mxu1 %v5004_v34  ;;  %v5026_v34 = vpack.c.bf16 %v2231_v0, %v2229_v55 }
 0xe6e   :  { %5043 = vmatprep.subr.bf16.mxu0 %v6131_v24  ;;  %5007 = vmatprep.subr.bf16.mxu1 %v5006_v29  ;;  %v5028_v29 = vpack.c.bf16 %v2230_v47, %v2228_v45 }
 0xe71   :  { %5045 = vmatpush1.bf16.msra.mxu0 %v6134_v30  ;;  %5009 = vmatpush1.bf16.msra.mxu1 %v5008_v60  ;;  %v5030_v60 = vpack.c.bf16 %v2235_v59, %v2233_v27 }
 0xe72   :  { %5047 = vmatprep.subr.bf16.mxu0 %v6137_v31  ;;  %5011 = vmatprep.subr.bf16.mxu1 %v5010_v11  ;;  %v5032_v11 = vpack.c.bf16 %v2234_v8, %v2232_v1 }
 0xe75   :  { %5049 = vmatpush1.bf16.msra.mxu0 %v6140_v36  ;;  %5013 = vmatpush1.bf16.msra.mxu1 %v5012_v48  ;;  %v2064_v48 = vrot.slane %v4245_v19, %v6103_v54 }
 0xe76   :  { %5051 = vmatprep.subr.bf16.mxu0 %v6143_v38  ;;  %5015 = vmatprep.subr.bf16.mxu1 %v5014_v10 }
 0xe79   :  { %5053 = vmatpush1.bf16.msra.mxu0 %v6146_v43  ;;  %5017 = vmatpush1.bf16.msra.mxu1 %v5016_v7 }
 0xe7a   :  { %5055 = vmatprep.subr.bf16.mxu0 %v6149_v44  ;;  %5019 = vmatprep.subr.bf16.mxu1 %v5018_v26 }
 0xe7d   :  { %5057 = vmatpush1.bf16.msra.mxu0 %v6152_v49  ;;  %5021 = vmatpush1.bf16.msra.mxu1 %v5020_v6 }
 0xe7e   :  { %5059 = vmatprep.subr.bf16.mxu0 %v6155_v50  ;;  %5023 = vmatprep.subr.bf16.mxu1 %v5022_v32 }
 0xe81   :  { %5061 = vmatpush1.bf16.msra.mxu0 %v6158_v57  ;;  %5025 = vmatpush1.bf16.msra.mxu1 %v5024_v33 }
 0xe82   :  { %5063 = vmatprep.subr.bf16.mxu0 %v6161_v58  ;;  %5027 = vmatprep.subr.bf16.mxu1 %v5026_v34 }
 0xe85   :  { %5065 = vmatpush1.bf16.msra.mxu0 %v6164_v3  ;;  %5029 = vmatpush1.bf16.msra.mxu1 %v5028_v29 }
 0xe86   :  { %5067 = vmatprep.subr.bf16.mxu0 %v6167_v4  ;;  %5031 = vmatprep.subr.bf16.mxu1 %v5030_v60 }
 0xe89   :  { %5069 = vmatpush1.bf16.msra.mxu0 %v6193_v14  ;;  %5033 = vmatpush1.bf16.msra.mxu1 %v5032_v11 }
 0xe8a   :  { %5071 = vmatprep.subr.bf16.mxu0 %v6197_v46  ;;  %5075 = vmatprep.subr.bf16.mxu1 %v6119_v12 }
 0xe8d   :  { %5073 = vmatpush1.bf16.msra.mxu0 %v6199_v51 }
 0xf3b   :  { %v2136_v13 = vpop.f32.mrb[18].mxu0 }
 0xf3c   :  { %v2137_v40 = vadd.f32 %v2136_v13, %v2060_v20  ;;  %v2138_v10 = vpop.f32.mrb[19].mxu0 }
 0xf3d   :  { %v2139_v42 = vadd.f32 %v2138_v10, %v2064_v48 }
 0xf3e   :  { %v2143_v2 = vmul.f32 0.70710677, %v2137_v40 }
 0xf3f   :  { %v2144_v7 = vmul.f32 0.70710677, %v2139_v42 }
 0xf40   :  { %v2149_v41 = vand.u32 2147483647, %v2143_v2  ;;  %vm2145_vm11 = vcmp.ge.f32.partialorder %v2143_v2, 0.0 }
 0xf41   :  { %v2150_v53 = vand.u32 2147483647, %v2144_v7  ;;  %vm2146_vm12 = vcmp.ge.f32.partialorder %v2144_v7, 0.0 }
 0xf42   :  { %v2151_v26 = vmul.f32 0.3275911, %v2149_v41  ;;  %v2177_v5 = vsub.f32 0.0, %v2149_v41 }
 0xf43   :  { %v2152_v35 = vmul.f32 0.3275911, %v2150_v53  ;;  %v2178_v21 = vsub.f32 0.0, %v2150_v53 }
 0xf44   :  { %v2153_v39 = vadd.f32 1.0, %v2151_v26  ;;  %v2179_v62 = vmul.f32 %v2177_v5, %v2149_v41 }
 0xf45   :  { %v2154_v6 = vadd.f32 1.0, %v2152_v35  ;;  %v2180_v55 = vmul.f32 %v2178_v21, %v2150_v53 }
 0xf46   :  { %5630 = vrcp.f32 %v2153_v39  ;;  %v2181_v45 = vmul.f32 1.442695, %v2179_v62  ;;  %v2147_v62 = vsel %vm2145_vm11, 1.0, %v5857_v25 }
 0xf47   :  { %5632 = vrcp.f32 %v2154_v6  ;;  %v2183_v27 = vmul.f32 1.442695, %v2180_v55 }
 0xf48   :  { %5634 = vpow2.f32 %v2181_v45 }
 0xf49   :  { %5636 = vpow2.f32 %v2183_v27  ;;  %v2141_v27 = vmul.f32 0.5, %v2137_v40  ;;  %v4247_v40 = vld [vmem:[%s6752_s29 + $0x2] sm:$0x3] }
 0xf4a   :  { %v2246_v2 = vrot.slane %v4247_v40, %v6103_v54 }
 0xf50   :  { %v5631_v32 = vpop.eup %5630 }
 0xf51   :  { %v5633_v22 = vpop.eup %5632  ;;  %v2159_v33 = vmul.f32 1.0614054, %v5631_v32 }
 0xf52   :  { %v2160_v0 = vmul.f32 1.0614054, %v5633_v22  ;;  %v5635_v26 = vpop.eup %5634 }
 0xf53   :  { %v2161_v34 = vadd.f32 -1.4531521, %v2159_v33  ;;  %v5637_v39 = vpop.eup %5636 }
 0xf54   :  { %v2162_v47 = vadd.f32 -1.4531521, %v2160_v0  ;;  %v2148_v0 = vsel %vm2146_vm12, 1.0, %v5857_v25 }
 0xf55   :  { %v2163_v29 = vmul.f32 %v5631_v32, %v2161_v34 }
 0xf56   :  { %v2164_v59 = vmul.f32 %v5633_v22, %v2162_v47  ;;  %v2142_v47 = vmul.f32 0.5, %v2139_v42  ;;  %v2242_v42 = vrot.slane %v4247_v40, %v6106_v56 }
 0xf57   :  { %v2165_v60 = vadd.f32 1.4214138, %v2163_v29 }
 0xf58   :  { %v2166_v1 = vadd.f32 1.4214138, %v2164_v59 }
 0xf59   :  { %v2167_v8 = vmul.f32 %v5631_v32, %v2165_v60 }
 0xf5a   :  { %v2168_v11 = vmul.f32 %v5633_v22, %v2166_v1 }
 0xf5b   :  { %v2169_v19 = vadd.f32 -0.28449672, %v2167_v8 }
 0xf5c   :  { %v2170_v20 = vadd.f32 -0.28449672, %v2168_v11 }
 0xf5d   :  { %v2171_v48 = vmul.f32 %v5631_v32, %v2169_v19  ;;  %v2513_v19 = vld [vmem:[#allocation4 + $0x288] sm:$0xff] }
 0xf5e   :  { %v2172_v13 = vmul.f32 %v5633_v22, %v2170_v20  ;;  %v2515_v20 = vld [vmem:[#allocation4 + $0x298] sm:$0xff] }
 0xf5f   :  { %v2173_v10 = vadd.f32 0.2548296, %v2171_v48  ;;  %v2512_v48 = vld [vmem:[#allocation4 + $0x280] sm:$0xff] }
 0xf60   :  { %v2174_v41 = vadd.f32 0.2548296, %v2172_v13  ;;  %v5114_v13 = vpack.c.bf16 %v2515_v20, %v2513_v19 }
 0xf61   :  { %v2175_v53 = vmul.f32 %v5631_v32, %v2173_v10  ;;  %v2514_v10 = vld [vmem:[#allocation4 + $0x290] sm:$0xff] }
 0xf62   :  { %v2176_v35 = vmul.f32 %v5633_v22, %v2174_v41  ;;  %v2517_v41 = vld [vmem:[#allocation4 + $0x2a8] sm:$0xff]  ;;  %5115 = vmatprep.subr.bf16.mxu0 %v5114_v13 }
 0xf63   :  { %v2185_v6 = vmul.f32 %v5635_v26, %v2175_v53  ;;  %v2519_v53 = vld [vmem:[#allocation4 + $0x2b8] sm:$0xff]  ;;  %v5116_v26 = vpack.c.bf16 %v2514_v10, %v2512_v48  ;;  %v2533_v13 = vld [vmem:[#allocation4 + $0x328] sm:$0xff] }
 0xf64   :  { %v2186_v5 = vmul.f32 %v5637_v39, %v2176_v35  ;;  %v5118_v35 = vpack.c.bf16 %v2519_v53, %v2517_v41  ;;  %v2516_v39 = vld [vmem:[#allocation4 + $0x2a0] sm:$0xff]  ;;  %v2535_v10 = vld [vmem:[#allocation4 + $0x338] sm:$0xff] }
 0xf65   :  { %v2187_v21 = vsub.f32 1.0, %v2185_v6  ;;  %v2518_v6 = vld [vmem:[#allocation4 + $0x2b0] sm:$0xff]  ;;  %v5134_v41 = vpack.c.bf16 %v2535_v10, %v2533_v13  ;;  %v2532_v53 = vld [vmem:[#allocation4 + $0x320] sm:$0xff] }
 0xf66   :  { %v2188_v33 = vsub.f32 1.0, %v2186_v5  ;;  %v2521_v5 = vld [vmem:[#allocation4 + $0x2c8] sm:$0xff]  ;;  %v4249_v10 = vld [vmem:[%s6753_s3 + $0x2] sm:$0x3] }
 0xf67   :  { %v2189_v55 = vmul.f32 %v2187_v21, %v2147_v62  ;;  %v2523_v21 = vld [vmem:[#allocation4 + $0x2d8] sm:$0xff]  ;;  %v2520_v62 = vld [vmem:[#allocation4 + $0x2c0] sm:$0xff] }
 0xf68   :  { %v2190_v34 = vmul.f32 %v2188_v33, %v2148_v0  ;;  %v2522_v33 = vld [vmem:[#allocation4 + $0x2d0] sm:$0xff]  ;;  %v2527_v0 = vld [vmem:[#allocation4 + $0x2f8] sm:$0xff] }
 0xf69   :  { %v2191_v45 = vadd.f32 1.0, %v2189_v55  ;;  %v2525_v55 = vld [vmem:[#allocation4 + $0x2e8] sm:$0xff] }
 0xf6a   :  { %v2192_v29 = vadd.f32 1.0, %v2190_v34  ;;  %v5124_v34 = vpack.c.bf16 %v2522_v33, %v2520_v62  ;;  %v2540_v62 = vld [vmem:[#allocation4 + $0x360] sm:$0xff]  ;;  %v2542_v33 = vld [vmem:[#allocation4 + $0x370] sm:$0xff] }
 0xf6b   :  { %v2193_v59 = vmul.f32 %v2191_v45, %v2141_v27  ;;  %v5126_v45 = vpack.c.bf16 %v2527_v0, %v2525_v55  ;;  %v2529_v27 = vld [vmem:[#allocation4 + $0x308] sm:$0xff] }
 0xf6c   :  { %v2194_v32 = vmul.f32 %v2192_v29, %v2142_v47  ;;  %v2524_v47 = vld [vmem:[#allocation4 + $0x2e0] sm:$0xff]  ;;  %v2526_v29 = vld [vmem:[#allocation4 + $0x2f0] sm:$0xff]  ;;  %v2545_v0 = vld [vmem:[#allocation4 + $0x388] sm:$0xff] }
 0xf6e   :  { %4248 = vmatprep.mubr.msk.f32.mxu1 %vm334_vm4, %v2194_v32  ;;  %v2531_v32 = vld [vmem:[#allocation4 + $0x318] sm:$0xff] }
 0xf6f   :  { %2317 = vmatmul.mubr.f32.vlgmr.msra.gmra.mrb[12].mxu1 %v2193_v59  ;;  %v5128_v59 = vpack.c.bf16 %v2526_v29, %v2524_v47  ;;  %v5130_v40 = vpack.c.bf16 %v2531_v32, %v2529_v27  ;;  %v2544_v29 = vld [vmem:[#allocation4 + $0x380] sm:$0xff]  ;;  %v2546_v27 = vld [vmem:[#allocation4 + $0x390] sm:$0xff]  ;;  %v2549_v32 = vld [vmem:[#allocation4 + $0x3a8] sm:$0xff] }
 0xf70   :  { %5077 = vmatpush1.bf16.msra.mxu1 %v6121_v15 }
 0xf71   :  { %5079 = vmatprep.subr.bf16.mxu1 %v6123_v18 }
 0xf74   :  { %5081 = vmatpush1.bf16.msra.mxu1 %v6128_v23 }
 0xf75   :  { %5083 = vmatprep.subr.bf16.mxu1 %v6131_v24 }
 0xf78   :  { %5085 = vmatpush1.bf16.msra.mxu1 %v6134_v30 }
 0xf79   :  { %5087 = vmatprep.subr.bf16.mxu1 %v6137_v31 }
 0xf7c   :  { %5089 = vmatpush1.bf16.msra.mxu1 %v6140_v36 }
 0xf7d   :  { %5091 = vmatprep.subr.bf16.mxu1 %v6143_v38 }
 0xf80   :  { %5093 = vmatpush1.bf16.msra.mxu1 %v6146_v43 }
 0xf81   :  { %5095 = vmatprep.subr.bf16.mxu1 %v6149_v44 }
 0xf84   :  { %5097 = vmatpush1.bf16.msra.mxu1 %v6152_v49 }
 0xf85   :  { %5099 = vmatprep.subr.bf16.mxu1 %v6155_v50 }
 0xf88   :  { %5101 = vmatpush1.bf16.msra.mxu1 %v6158_v57 }
 0xf89   :  { %5103 = vmatprep.subr.bf16.mxu1 %v6161_v58 }
 0xf8c   :  { %5105 = vmatpush1.bf16.msra.mxu1 %v6164_v3 }
 0xf8d   :  { %5107 = vmatprep.subr.bf16.mxu1 %v6167_v4 }
 0xf90   :  { %5109 = vmatpush1.bf16.msra.mxu1 %v6193_v14 }
 0xf91   :  { %5111 = vmatprep.subr.bf16.mxu1 %v6197_v46 }
 0xf94   :  { %5113 = vmatpush1.bf16.msra.mxu1 %v6199_v51 }
0x1042   :  { %v2318_v7 = vpop.f32.mrb[12].mxu1 }
0x1043   :  { %v2319_v22 = vadd.f32 %v2318_v7, %v2242_v42  ;;  %v2320_v60 = vpop.f32.mrb[13].mxu1  ;;  %v2528_v42 = vld [vmem:[#allocation4 + $0x300] sm:$0xff] }
0x1044   :  { %v2321_v1 = vadd.f32 %v2320_v60, %v2246_v2  ;;  %v2530_v2 = vld [vmem:[#allocation4 + $0x310] sm:$0xff] }
0x1045   :  { %v2323_v11 = vadd.f32 %v2319_v22, %v6353_v61  ;;  %v5122_v61 = vpack.c.bf16 %v2523_v21, %v2521_v5  ;;  %v5132_v7 = vpack.c.bf16 %v2530_v2, %v2528_v42  ;;  %v2536_v21 = vld [vmem:[#allocation4 + $0x340] sm:$0xff] }
0x1046   :  { %v2324_v8 = vadd.f32 %v2321_v1, %v6351_v52  ;;  %v5120_v52 = vpack.c.bf16 %v2518_v6, %v2516_v39  ;;  %v2537_v39 = vld [vmem:[#allocation4 + $0x348] sm:$0xff]  ;;  %v2539_v6 = vld [vmem:[#allocation4 + $0x358] sm:$0xff]  ;;  %v2548_v2 = vld [vmem:[#allocation4 + $0x3a0] sm:$0xff] }
0x1047   :  { %v5138_v5 = vpack.c.bf16 %v2539_v6, %v2537_v39 }
0x1048   :  { %4251 = vmatprep.mubr.msk.f32.mxu0 %vm334_vm4, %v2324_v8 }
0x1049   :  { %2397 = vmatmul.mubr.f32.vlgmr.msra.gmra.mrb[20].mxu0 %v2323_v11 }
0x104a   :  { %5117 = vmatpush1.bf16.msra.mxu0 %v5116_v26  ;;  %v2534_v26 = vld [vmem:[#allocation4 + $0x330] sm:$0xff] }
0x104b   :  { %5119 = vmatprep.subr.bf16.mxu0 %v5118_v35  ;;  %v5136_v35 = vpack.c.bf16 %v2534_v26, %v2532_v53  ;;  %v2489_v53 = vrot.slane %v4249_v10, %v6106_v56 }
0x104e   :  { %5121 = vmatpush1.bf16.msra.mxu0 %v5120_v52  ;;  %v2541_v52 = vld [vmem:[#allocation4 + $0x368] sm:$0xff] }
0x104f   :  { %5123 = vmatprep.subr.bf16.mxu0 %v5122_v61  ;;  %v2543_v61 = vld [vmem:[#allocation4 + $0x378] sm:$0xff] }
0x1050   :  { %v5142_v55 = vpack.c.bf16 %v2543_v61, %v2541_v52 }
0x1052   :  { %5125 = vmatpush1.bf16.msra.mxu0 %v5124_v34  ;;  %v2547_v34 = vld [vmem:[#allocation4 + $0x398] sm:$0xff] }
0x1053   :  { %5127 = vmatprep.subr.bf16.mxu0 %v5126_v45  ;;  %v5144_v45 = vpack.c.bf16 %v2542_v33, %v2540_v62  ;;  %v5146_v47 = vpack.c.bf16 %v2547_v34, %v2545_v0  ;;  %v2696_v0 = vld [vmem:[#allocation7 + $0x290] sm:$0xff] }
0x1056   :  { %5129 = vmatpush1.bf16.msra.mxu0 %v5128_v59  ;;  %v2551_v59 = vld [vmem:[#allocation4 + $0x3b8] sm:$0xff] }
0x1057   :  { %5131 = vmatprep.subr.bf16.mxu0 %v5130_v40  ;;  %v5148_v40 = vpack.c.bf16 %v2546_v27, %v2544_v29  ;;  %v5150_v42 = vpack.c.bf16 %v2551_v59, %v2549_v32  ;;  %v2698_v27 = vld [vmem:[#allocation7 + $0x2a0] sm:$0xff]  ;;  %v2700_v32 = vld [vmem:[#allocation7 + $0x2b0] sm:$0xff] }
0x1058   :  { %v5160_v59 = vpack.c.bf16 %v2700_v32, %v2698_v27  ;;  %v2723_v27 = vld [vmem:[#allocation7 + $0x368] sm:$0xff]  ;;  %v2725_v32 = vld [vmem:[#allocation7 + $0x378] sm:$0xff] }
0x105a   :  { %5133 = vmatpush1.bf16.msra.mxu0 %v5132_v7  ;;  %v2550_v7 = vld [vmem:[#allocation4 + $0x3b0] sm:$0xff] }
0x105b   :  { %5135 = vmatprep.subr.bf16.mxu0 %v5134_v41  ;;  %v4250_v41 = vld [vmem:[%s6754_s6 + $0x2] sm:$0x3] }
0x105c   :  { %v2502_v52 = vrot.slane %v4250_v41, %v6106_v56 }
0x105e   :  { %5137 = vmatpush1.bf16.msra.mxu0 %v5136_v35  ;;  %v2493_v35 = vrot.slane %v4249_v10, %v6103_v54  ;;  %v2706_v10 = vld [vmem:[#allocation7 + $0x2e0] sm:$0xff] }
0x105f   :  { %5139 = vmatprep.subr.bf16.mxu0 %v5138_v5 }
0x111c   :  { %v2398_v22 = vpop.f32.mrb[20].mxu0 }
0x111d   :  { %v2403_v60 = vsub.f32 %v2323_v11, %v2398_v22  ;;  %v2400_v1 = vpop.f32.mrb[21].mxu0  ;;  %v2538_v11 = vld [vmem:[#allocation4 + $0x350] sm:$0xff]  ;;  %v5152_v22 = vpack.c.bf16 %v2550_v7, %v2548_v2  ;;  %v2702_v7 = vld [vmem:[#allocation7 + $0x2c0] sm:$0xff] }
0x111e   :  { %v2404_v19 = vsub.f32 %v2324_v8, %v2400_v1  ;;  %v5140_v8 = vpack.c.bf16 %v2538_v11, %v2536_v21  ;;  %v2506_v21 = vrot.slane %v4250_v41, %v6103_v54  ;;  %v2708_v41 = vld [vmem:[#allocation7 + $0x2f0] sm:$0xff] }
0x111f   :  { %v2405_v48 = vmul.f32 %v2403_v60, %v2403_v60 }
0x1120   :  { %v2406_v20 = vmul.f32 %v2404_v19, %v2404_v19  ;;  %5141 = vmatpush1.bf16.msra.mxu0 %v5140_v8 }
0x1121   :  { %5143 = vmatprep.subr.bf16.mxu0 %v5142_v55  ;;  %v2694_v55 = vld [vmem:[#allocation7 + $0x280] sm:$0xff] }
0x1122   :  { %4252 = vmatprep.mubr.msk.f32.mxu1 %vm334_vm4, %v2406_v20  ;;  %v5156_v34 = vpack.c.bf16 %v2696_v0, %v2694_v55  ;;  %v2719_v55 = vld [vmem:[#allocation7 + $0x348] sm:$0xff]  ;;  %v2721_v0 = vld [vmem:[#allocation7 + $0x358] sm:$0xff] }
0x1123   :  { %2475 = vmatmul.mubr.f32.vlgmr.msra.gmra.mrb[14].mxu1 %v2405_v48 }
0x1124   :  { %5145 = vmatpush1.bf16.msra.mxu0 %v5144_v45  ;;  %v2699_v45 = vld [vmem:[#allocation7 + $0x2a8] sm:$0xff] }
0x1125   :  { %5147 = vmatprep.subr.bf16.mxu0 %v5146_v47  ;;  %v2701_v47 = vld [vmem:[#allocation7 + $0x2b8] sm:$0xff] }
0x1126   :  { %v5158_v29 = vpack.c.bf16 %v2701_v47, %v2699_v45  ;;  %v2718_v45 = vld [vmem:[#allocation7 + $0x340] sm:$0xff]  ;;  %v2720_v47 = vld [vmem:[#allocation7 + $0x350] sm:$0xff] }
0x1128   :  { %5149 = vmatpush1.bf16.msra.mxu0 %v5148_v40  ;;  %v2703_v40 = vld [vmem:[#allocation7 + $0x2c8] sm:$0xff] }
0x1129   :  { %5151 = vmatprep.subr.bf16.mxu0 %v5150_v42  ;;  %v2705_v42 = vld [vmem:[#allocation7 + $0x2d8] sm:$0xff] }
0x112a   :  { %v5162_v2 = vpack.c.bf16 %v2705_v42, %v2703_v40  ;;  %v2722_v40 = vld [vmem:[#allocation7 + $0x360] sm:$0xff]  ;;  %v2724_v42 = vld [vmem:[#allocation7 + $0x370] sm:$0xff] }
0x112c   :  { %5153 = vmatpush1.bf16.msra.mxu0 %v5152_v22  ;;  %v2704_v22 = vld [vmem:[#allocation7 + $0x2d0] sm:$0xff] }
0x112d   :  { %5195 = vmatprep.subr.bf16.mxu0 %v6119_v12 }
0x11f6   :  { %v2476_v1 = vpop.f32.mrb[14].mxu1 }
0x11f7   :  { %v2477_v20 = vadd.f32 1e-05, %v2476_v1  ;;  %v2478_v48 = vpop.f32.mrb[15].mxu1  ;;  %v5164_v1 = vpack.c.bf16 %v2704_v22, %v2702_v7  ;;  %v2727_v7 = vld [vmem:[#allocation7 + $0x388] sm:$0xff]  ;;  %v2729_v22 = vld [vmem:[#allocation7 + $0x398] sm:$0xff] }
0x11f8   :  { %v2479_v13 = vadd.f32 1e-05, %v2478_v48  ;;  %v2709_v48 = vld [vmem:[#allocation7 + $0x2f8] sm:$0xff] }
0x11f9   :  { %5638 = vrsqrt.f32 %v2477_v20  ;;  %v2707_v20 = vld [vmem:[#allocation7 + $0x2e8] sm:$0xff] }
0x11fa   :  { %5640 = vrsqrt.f32 %v2479_v13  ;;  %v5166_v13 = vpack.c.bf16 %v2709_v48, %v2707_v20  ;;  %v2726_v20 = vld [vmem:[#allocation7 + $0x380] sm:$0xff]  ;;  %v2728_v48 = vld [vmem:[#allocation7 + $0x390] sm:$0xff] }
0x1203   :  { %v5639_v26 = vpop.eup %5638 }
0x1204   :  { %v5641_v39 = vpop.eup %5640  ;;  %v2483_v6 = vmul.f32 %v5639_v26, %v2403_v60  ;;  %v2695_v60 = vld [vmem:[#allocation7 + $0x288] sm:$0xff] }
0x1205   :  { %v2484_v5 = vmul.f32 %v5641_v39, %v2404_v19  ;;  %v2697_v19 = vld [vmem:[#allocation7 + $0x298] sm:$0xff]  ;;  %v2711_v26 = vld [vmem:[#allocation7 + $0x308] sm:$0xff] }
0x1206   :  { %v2496_v11 = vmul.f32 %v2489_v53, %v2483_v6  ;;  %v5154_v33 = vpack.c.bf16 %v2697_v19, %v2695_v60  ;;  %v5168_v53 = vpack.c.bf16 %v2708_v41, %v2706_v10  ;;  %v2710_v6 = vld [vmem:[#allocation7 + $0x300] sm:$0xff]  ;;  %v2716_v19 = vld [vmem:[#allocation7 + $0x330] sm:$0xff]  ;;  %v2731_v10 = vld [vmem:[#allocation7 + $0x3a8] sm:$0xff] }
0x1207   :  { %v2497_v8 = vmul.f32 %v2493_v35, %v2484_v5  ;;  %v2713_v35 = vld [vmem:[#allocation7 + $0x318] sm:$0xff]  ;;  %v2712_v5 = vld [vmem:[#allocation7 + $0x310] sm:$0xff]  ;;  %v2714_v60 = vld [vmem:[#allocation7 + $0x320] sm:$0xff] }
0x1208   :  { %v6419_v62 = vadd.f32 %v2502_v52, %v2496_v11  ;;  %5155 = vmatprep.subr.bf16.mxu1 %v5154_v33  ;;  %v5170_v39 = vpack.c.bf16 %v2713_v35, %v2711_v26  ;;  %v2715_v11 = vld [vmem:[#allocation7 + $0x328] sm:$0xff]  ;;  %v2717_v52 = vld [vmem:[#allocation7 + $0x338] sm:$0xff]  ;;  %v5176_v33 = vpack.c.bf16 %v2716_v19, %v2714_v60  ;;  %v2730_v26 = vld [vmem:[#allocation7 + $0x3a0] sm:$0xff] }
0x1209   :  { %v6417_v61 = vadd.f32 %v2506_v21, %v2497_v8  ;;  %5157 = vmatpush1.bf16.msra.mxu1 %v5156_v34  ;;  %v5172_v21 = vpack.c.bf16 %v2712_v5, %v2710_v6  ;;  %v5174_v8 = vpack.c.bf16 %v2717_v52, %v2715_v11  ;;  %v5178_v34 = vpack.c.bf16 %v2721_v0, %v2719_v55  ;;  %v2733_v41 = vld [vmem:[#allocation7 + $0x3b8] sm:$0xff]  ;;  %v2732_v35 = vld [vmem:[#allocation7 + $0x3b0] sm:$0xff]  ;;  %v4253_v6 = vld [vmem:[%s6747_s5 + $0x4] sm:$0x3] }
0x120a   :  { %5159 = vmatprep.subr.bf16.mxu1 %v5158_v29  ;;  %v5180_v29 = vpack.c.bf16 %v2720_v47, %v2718_v45  ;;  %v2558_v5 = vrot.slane %v4253_v6, %v6106_v56 }
0x120b   :  { %4254 = vmatprep.mubr.msk.f32.mxu0 %vm334_vm4, %v6417_v61 }
0x120c   :  { %2633 = vmatmul.mubr.f32.vlgmr.msra.gmra.mrb[22].mxu0 %v6419_v62 }
0x120d   :  { %5197 = vmatpush1.bf16.msra.mxu0 %v6121_v15  ;;  %5161 = vmatpush1.bf16.msra.mxu1 %v5160_v59  ;;  %v5182_v59 = vpack.c.bf16 %v2725_v32, %v2723_v27 }
0x120e   :  { %5199 = vmatprep.subr.bf16.mxu0 %v6123_v18  ;;  %5163 = vmatprep.subr.bf16.mxu1 %v5162_v2  ;;  %v5184_v2 = vpack.c.bf16 %v2724_v42, %v2722_v40 }
0x1211   :  { %5201 = vmatpush1.bf16.msra.mxu0 %v6128_v23  ;;  %5165 = vmatpush1.bf16.msra.mxu1 %v5164_v1  ;;  %v5186_v1 = vpack.c.bf16 %v2729_v22, %v2727_v7 }
0x1212   :  { %5203 = vmatprep.subr.bf16.mxu0 %v6131_v24  ;;  %5167 = vmatprep.subr.bf16.mxu1 %v5166_v13  ;;  %v5188_v13 = vpack.c.bf16 %v2728_v48, %v2726_v20 }
0x1215   :  { %5205 = vmatpush1.bf16.msra.mxu0 %v6134_v30  ;;  %5169 = vmatpush1.bf16.msra.mxu1 %v5168_v53  ;;  %v5190_v53 = vpack.c.bf16 %v2733_v41, %v2731_v10 }
0x1216   :  { %5207 = vmatprep.subr.bf16.mxu0 %v6137_v31  ;;  %5171 = vmatprep.subr.bf16.mxu1 %v5170_v39  ;;  %v5192_v39 = vpack.c.bf16 %v2732_v35, %v2730_v26 }
0x1219   :  { %5209 = vmatpush1.bf16.msra.mxu0 %v6140_v36  ;;  %5173 = vmatpush1.bf16.msra.mxu1 %v5172_v21  ;;  %v2562_v21 = vrot.slane %v4253_v6, %v6103_v54 }
0x121a   :  { %5211 = vmatprep.subr.bf16.mxu0 %v6143_v38  ;;  %5175 = vmatprep.subr.bf16.mxu1 %v5174_v8 }
0x121d   :  { %5213 = vmatpush1.bf16.msra.mxu0 %v6146_v43  ;;  %5177 = vmatpush1.bf16.msra.mxu1 %v5176_v33 }
0x121e   :  { %5215 = vmatprep.subr.bf16.mxu0 %v6149_v44  ;;  %5179 = vmatprep.subr.bf16.mxu1 %v5178_v34 }
0x1221   :  { %5217 = vmatpush1.bf16.msra.mxu0 %v6152_v49  ;;  %5181 = vmatpush1.bf16.msra.mxu1 %v5180_v29 }
0x1222   :  { %5219 = vmatprep.subr.bf16.mxu0 %v6155_v50  ;;  %5183 = vmatprep.subr.bf16.mxu1 %v5182_v59 }
0x1225   :  { %5221 = vmatpush1.bf16.msra.mxu0 %v6158_v57  ;;  %5185 = vmatpush1.bf16.msra.mxu1 %v5184_v2 }
0x1226   :  { %5223 = vmatprep.subr.bf16.mxu0 %v6161_v58  ;;  %5187 = vmatprep.subr.bf16.mxu1 %v5186_v1 }
0x1229   :  { %5225 = vmatpush1.bf16.msra.mxu0 %v6164_v3  ;;  %5189 = vmatpush1.bf16.msra.mxu1 %v5188_v13 }
0x122a   :  { %5227 = vmatprep.subr.bf16.mxu0 %v6167_v4  ;;  %5191 = vmatprep.subr.bf16.mxu1 %v5190_v53 }
0x122d   :  { %5229 = vmatpush1.bf16.msra.mxu0 %v6193_v14  ;;  %5193 = vmatpush1.bf16.msra.mxu1 %v5192_v39 }
0x122e   :  { %5231 = vmatprep.subr.bf16.mxu0 %v6197_v46  ;;  %5235 = vmatprep.subr.bf16.mxu1 %v6119_v12 }
0x1231   :  { %5233 = vmatpush1.bf16.msra.mxu0 %v6199_v51 }
0x12df   :  { %v2634_v11 = vpop.f32.mrb[22].mxu0 }
0x12e0   :  { %v2635_v52 = vadd.f32 %v2634_v11, %v2558_v5  ;;  %v2636_v8 = vpop.f32.mrb[23].mxu0 }
0x12e1   :  { %v2637_v60 = vadd.f32 %v2636_v8, %v2562_v21 }
0x12e2   :  { %v2641_v19 = vmul.f32 0.70710677, %v2635_v52 }
0x12e3   :  { %v2642_v33 = vmul.f32 0.70710677, %v2637_v60 }
0x12e4   :  { %v2647_v55 = vand.u32 2147483647, %v2641_v19  ;;  %vm2643_vm13 = vcmp.ge.f32.partialorder %v2641_v19, 0.0 }
0x12e5   :  { %v2648_v0 = vand.u32 2147483647, %v2642_v33  ;;  %vm2644_vm14 = vcmp.ge.f32.partialorder %v2642_v33, 0.0 }
0x12e6   :  { %v2649_v34 = vmul.f32 0.3275911, %v2647_v55  ;;  %v2675_v27 = vsub.f32 0.0, %v2647_v55 }
0x12e7   :  { %v2650_v45 = vmul.f32 0.3275911, %v2648_v0  ;;  %v2676_v32 = vsub.f32 0.0, %v2648_v0 }
0x12e8   :  { %v2651_v47 = vadd.f32 1.0, %v2649_v34  ;;  %v2677_v40 = vmul.f32 %v2675_v27, %v2647_v55 }
0x12e9   :  { %v2652_v29 = vadd.f32 1.0, %v2650_v45  ;;  %v2678_v7 = vmul.f32 %v2676_v32, %v2648_v0 }
0x12ea   :  { %5642 = vrcp.f32 %v2651_v47  ;;  %v2679_v20 = vmul.f32 1.442695, %v2677_v40  ;;  %v2645_v40 = vsel %vm2643_vm13, 1.0, %v5857_v25 }
0x12eb   :  { %5644 = vrcp.f32 %v2652_v29  ;;  %v2681_v10 = vmul.f32 1.442695, %v2678_v7 }
0x12ec   :  { %5646 = vpow2.f32 %v2679_v20 }
0x12ed   :  { %5648 = vpow2.f32 %v2681_v10  ;;  %v2639_v10 = vmul.f32 0.5, %v2635_v52  ;;  %v4255_v52 = vld [vmem:[%s6748_s13 + $0x4] sm:$0x3] }
0x12ee   :  { %v2744_v19 = vrot.slane %v4255_v52, %v6103_v54 }
0x12f4   :  { %v5643_v59 = vpop.eup %5642 }
0x12f5   :  { %v5645_v42 = vpop.eup %5644  ;;  %v2657_v2 = vmul.f32 1.0614054, %v5643_v59 }
0x12f6   :  { %v2658_v22 = vmul.f32 1.0614054, %v5645_v42  ;;  %v5647_v34 = vpop.eup %5646 }
0x12f7   :  { %v2659_v1 = vadd.f32 -1.4531521, %v2657_v2  ;;  %v5649_v47 = vpop.eup %5648 }
0x12f8   :  { %v2660_v48 = vadd.f32 -1.4531521, %v2658_v22  ;;  %v2646_v22 = vsel %vm2644_vm14, 1.0, %v5857_v25 }
0x12f9   :  { %v2661_v13 = vmul.f32 %v5643_v59, %v2659_v1 }
0x12fa   :  { %v2662_v41 = vmul.f32 %v5645_v42, %v2660_v48  ;;  %v2640_v48 = vmul.f32 0.5, %v2637_v60  ;;  %v2740_v60 = vrot.slane %v4255_v52, %v6106_v56 }
0x12fb   :  { %v2663_v53 = vadd.f32 1.4214138, %v2661_v13 }
0x12fc   :  { %v2664_v26 = vadd.f32 1.4214138, %v2662_v41 }
0x12fd   :  { %v2665_v35 = vmul.f32 %v5643_v59, %v2663_v53 }
0x12fe   :  { %v2666_v39 = vmul.f32 %v5645_v42, %v2664_v26 }
0x12ff   :  { %v2667_v6 = vadd.f32 -0.28449672, %v2665_v35 }
0x1300   :  { %v2668_v5 = vadd.f32 -0.28449672, %v2666_v39 }
0x1301   :  { %v2669_v21 = vmul.f32 %v5643_v59, %v2667_v6  ;;  %v3011_v6 = vld [vmem:[#allocation9 + $0x288] sm:$0xff] }
0x1302   :  { %v2670_v11 = vmul.f32 %v5645_v42, %v2668_v5  ;;  %v3013_v5 = vld [vmem:[#allocation9 + $0x298] sm:$0xff] }
0x1303   :  { %v2671_v8 = vadd.f32 0.2548296, %v2669_v21  ;;  %v3010_v21 = vld [vmem:[#allocation9 + $0x280] sm:$0xff] }
0x1304   :  { %v2672_v55 = vadd.f32 0.2548296, %v2670_v11  ;;  %v5274_v11 = vpack.c.bf16 %v3013_v5, %v3011_v6 }
0x1305   :  { %v2673_v0 = vmul.f32 %v5643_v59, %v2671_v8  ;;  %v3012_v8 = vld [vmem:[#allocation9 + $0x290] sm:$0xff] }
0x1306   :  { %v2674_v45 = vmul.f32 %v5645_v42, %v2672_v55  ;;  %v3015_v55 = vld [vmem:[#allocation9 + $0x2a8] sm:$0xff]  ;;  %5275 = vmatprep.subr.bf16.mxu0 %v5274_v11 }
0x1307   :  { %v2683_v29 = vmul.f32 %v5647_v34, %v2673_v0  ;;  %v3017_v0 = vld [vmem:[#allocation9 + $0x2b8] sm:$0xff]  ;;  %v5276_v34 = vpack.c.bf16 %v3012_v8, %v3010_v21  ;;  %v3031_v11 = vld [vmem:[#allocation9 + $0x328] sm:$0xff] }
0x1308   :  { %v2684_v27 = vmul.f32 %v5649_v47, %v2674_v45  ;;  %v5278_v45 = vpack.c.bf16 %v3017_v0, %v3015_v55  ;;  %v3014_v47 = vld [vmem:[#allocation9 + $0x2a0] sm:$0xff]  ;;  %v3033_v8 = vld [vmem:[#allocation9 + $0x338] sm:$0xff] }
0x1309   :  { %v2685_v32 = vsub.f32 1.0, %v2683_v29  ;;  %v3016_v29 = vld [vmem:[#allocation9 + $0x2b0] sm:$0xff]  ;;  %v5294_v55 = vpack.c.bf16 %v3033_v8, %v3031_v11  ;;  %v3030_v0 = vld [vmem:[#allocation9 + $0x320] sm:$0xff] }
0x130a   :  { %v2686_v2 = vsub.f32 1.0, %v2684_v27  ;;  %v3019_v27 = vld [vmem:[#allocation9 + $0x2c8] sm:$0xff]  ;;  %v4257_v8 = vld [vmem:[%s6749_s17 + $0x4] sm:$0x3] }
0x130b   :  { %v2687_v7 = vmul.f32 %v2685_v32, %v2645_v40  ;;  %v3021_v32 = vld [vmem:[#allocation9 + $0x2d8] sm:$0xff]  ;;  %v3018_v40 = vld [vmem:[#allocation9 + $0x2c0] sm:$0xff] }
0x130c   :  { %v2688_v1 = vmul.f32 %v2686_v2, %v2646_v22  ;;  %v3020_v2 = vld [vmem:[#allocation9 + $0x2d0] sm:$0xff]  ;;  %v3025_v22 = vld [vmem:[#allocation9 + $0x2f8] sm:$0xff] }
0x130d   :  { %v2689_v20 = vadd.f32 1.0, %v2687_v7  ;;  %v3023_v7 = vld [vmem:[#allocation9 + $0x2e8] sm:$0xff] }
0x130e   :  { %v2690_v13 = vadd.f32 1.0, %v2688_v1  ;;  %v5284_v1 = vpack.c.bf16 %v3020_v2, %v3018_v40  ;;  %v3038_v40 = vld [vmem:[#allocation9 + $0x360] sm:$0xff]  ;;  %v3040_v2 = vld [vmem:[#allocation9 + $0x370] sm:$0xff] }
0x130f   :  { %v2691_v41 = vmul.f32 %v2689_v20, %v2639_v10  ;;  %v5286_v20 = vpack.c.bf16 %v3025_v22, %v3023_v7  ;;  %v3027_v10 = vld [vmem:[#allocation9 + $0x308] sm:$0xff] }
0x1310   :  { %v2692_v59 = vmul.f32 %v2690_v13, %v2640_v48  ;;  %v3022_v48 = vld [vmem:[#allocation9 + $0x2e0] sm:$0xff]  ;;  %v3024_v13 = vld [vmem:[#allocation9 + $0x2f0] sm:$0xff]  ;;  %v3043_v22 = vld [vmem:[#allocation9 + $0x388] sm:$0xff] }
0x1312   :  { %4256 = vmatprep.mubr.msk.f32.mxu1 %vm334_vm4, %v2692_v59  ;;  %v3029_v59 = vld [vmem:[#allocation9 + $0x318] sm:$0xff] }
0x1313   :  { %2815 = vmatmul.mubr.f32.vlgmr.msra.gmra.mrb[16].mxu1 %v2691_v41  ;;  %v5288_v41 = vpack.c.bf16 %v3024_v13, %v3022_v48  ;;  %v5290_v52 = vpack.c.bf16 %v3029_v59, %v3027_v10  ;;  %v3042_v13 = vld [vmem:[#allocation9 + $0x380] sm:$0xff]  ;;  %v3044_v10 = vld [vmem:[#allocation9 + $0x390] sm:$0xff]  ;;  %v3047_v59 = vld [vmem:[#allocation9 + $0x3a8] sm:$0xff] }
0x1314   :  { %5237 = vmatpush1.bf16.msra.mxu1 %v6121_v15 }
0x1315   :  { %5239 = vmatprep.subr.bf16.mxu1 %v6123_v18 }
0x1318   :  { %5241 = vmatpush1.bf16.msra.mxu1 %v6128_v23 }
0x1319   :  { %5243 = vmatprep.subr.bf16.mxu1 %v6131_v24 }
0x131c   :  { %5245 = vmatpush1.bf16.msra.mxu1 %v6134_v30 }
0x131d   :  { %5247 = vmatprep.subr.bf16.mxu1 %v6137_v31 }
0x1320   :  { %5249 = vmatpush1.bf16.msra.mxu1 %v6140_v36 }
0x1321   :  { %5251 = vmatprep.subr.bf16.mxu1 %v6143_v38 }
0x1324   :  { %5253 = vmatpush1.bf16.msra.mxu1 %v6146_v43 }
0x1325   :  { %5255 = vmatprep.subr.bf16.mxu1 %v6149_v44 }
0x1328   :  { %5257 = vmatpush1.bf16.msra.mxu1 %v6152_v49 }
0x1329   :  { %5259 = vmatprep.subr.bf16.mxu1 %v6155_v50 }
0x132c   :  { %5261 = vmatpush1.bf16.msra.mxu1 %v6158_v57 }
0x132d   :  { %5263 = vmatprep.subr.bf16.mxu1 %v6161_v58 }
0x1330   :  { %5265 = vmatpush1.bf16.msra.mxu1 %v6164_v3 }
0x1331   :  { %5267 = vmatprep.subr.bf16.mxu1 %v6167_v4 }
0x1334   :  { %5269 = vmatpush1.bf16.msra.mxu1 %v6193_v14 }
0x1335   :  { %5271 = vmatprep.subr.bf16.mxu1 %v6197_v46 }
0x1338   :  { %5273 = vmatpush1.bf16.msra.mxu1 %v6199_v51 }
0x13e6   :  { %v2816_v33 = vpop.f32.mrb[16].mxu1 }
0x13e7   :  { %v2817_v42 = vadd.f32 %v2816_v33, %v2740_v60  ;;  %v2818_v53 = vpop.f32.mrb[17].mxu1  ;;  %v3026_v60 = vld [vmem:[#allocation9 + $0x300] sm:$0xff] }
0x13e8   :  { %v2819_v26 = vadd.f32 %v2818_v53, %v2744_v19  ;;  %v3028_v19 = vld [vmem:[#allocation9 + $0x310] sm:$0xff] }
0x13e9   :  { %v2821_v39 = vadd.f32 %v2817_v42, %v6419_v62  ;;  %v5282_v62 = vpack.c.bf16 %v3021_v32, %v3019_v27  ;;  %v5292_v33 = vpack.c.bf16 %v3028_v19, %v3026_v60  ;;  %v3034_v32 = vld [vmem:[#allocation9 + $0x340] sm:$0xff] }
0x13ea   :  { %v2822_v35 = vadd.f32 %v2819_v26, %v6417_v61  ;;  %v5280_v61 = vpack.c.bf16 %v3016_v29, %v3014_v47  ;;  %v3035_v47 = vld [vmem:[#allocation9 + $0x348] sm:$0xff]  ;;  %v3037_v29 = vld [vmem:[#allocation9 + $0x358] sm:$0xff]  ;;  %v3046_v19 = vld [vmem:[#allocation9 + $0x3a0] sm:$0xff] }
0x13eb   :  { %v5298_v27 = vpack.c.bf16 %v3037_v29, %v3035_v47 }
0x13ec   :  { %4259 = vmatprep.mubr.msk.f32.mxu0 %vm334_vm4, %v2822_v35 }
0x13ed   :  { %2895 = vmatmul.mubr.f32.vlgmr.msra.gmra.mrb[24].mxu0 %v2821_v39 }
0x13ee   :  { %5277 = vmatpush1.bf16.msra.mxu0 %v5276_v34  ;;  %v3032_v34 = vld [vmem:[#allocation9 + $0x330] sm:$0xff] }
0x13ef   :  { %5279 = vmatprep.subr.bf16.mxu0 %v5278_v45  ;;  %v5296_v45 = vpack.c.bf16 %v3032_v34, %v3030_v0  ;;  %v2987_v0 = vrot.slane %v4257_v8, %v6106_v56 }
0x13f2   :  { %5281 = vmatpush1.bf16.msra.mxu0 %v5280_v61  ;;  %v3039_v61 = vld [vmem:[#allocation9 + $0x368] sm:$0xff] }
0x13f3   :  { %5283 = vmatprep.subr.bf16.mxu0 %v5282_v62  ;;  %v3041_v62 = vld [vmem:[#allocation9 + $0x378] sm:$0xff] }
0x13f4   :  { %v5302_v7 = vpack.c.bf16 %v3041_v62, %v3039_v61 }
0x13f6   :  { %5285 = vmatpush1.bf16.msra.mxu0 %v5284_v1  ;;  %v3045_v1 = vld [vmem:[#allocation9 + $0x398] sm:$0xff] }
0x13f7   :  { %5287 = vmatprep.subr.bf16.mxu0 %v5286_v20  ;;  %v5304_v20 = vpack.c.bf16 %v3040_v2, %v3038_v40  ;;  %v5306_v48 = vpack.c.bf16 %v3045_v1, %v3043_v22  ;;  %v3194_v22 = vld [vmem:[#allocation10 + $0x290] sm:$0xff] }
0x13fa   :  { %5289 = vmatpush1.bf16.msra.mxu0 %v5288_v41  ;;  %v3049_v41 = vld [vmem:[#allocation9 + $0x3b8] sm:$0xff] }
0x13fb   :  { %5291 = vmatprep.subr.bf16.mxu0 %v5290_v52  ;;  %v5308_v52 = vpack.c.bf16 %v3044_v10, %v3042_v13  ;;  %v5310_v60 = vpack.c.bf16 %v3049_v41, %v3047_v59  ;;  %v3196_v10 = vld [vmem:[#allocation10 + $0x2a0] sm:$0xff]  ;;  %v3198_v59 = vld [vmem:[#allocation10 + $0x2b0] sm:$0xff] }
0x13fc   :  { %v5320_v41 = vpack.c.bf16 %v3198_v59, %v3196_v10  ;;  %v3221_v10 = vld [vmem:[#allocation10 + $0x368] sm:$0xff]  ;;  %v3223_v59 = vld [vmem:[#allocation10 + $0x378] sm:$0xff] }
0x13fe   :  { %5293 = vmatpush1.bf16.msra.mxu0 %v5292_v33  ;;  %v3048_v33 = vld [vmem:[#allocation9 + $0x3b0] sm:$0xff] }
0x13ff   :  { %5295 = vmatprep.subr.bf16.mxu0 %v5294_v55  ;;  %v4258_v55 = vld [vmem:[%s6750_s21 + $0x4] sm:$0x3] }
0x1400   :  { %v3000_v61 = vrot.slane %v4258_v55, %v6106_v56 }
0x1402   :  { %5297 = vmatpush1.bf16.msra.mxu0 %v5296_v45  ;;  %v2991_v45 = vrot.slane %v4257_v8, %v6103_v54  ;;  %v3204_v8 = vld [vmem:[#allocation10 + $0x2e0] sm:$0xff] }
0x1403   :  { %5299 = vmatprep.subr.bf16.mxu0 %v5298_v27 }
0x14c0   :  { %v2896_v42 = vpop.f32.mrb[24].mxu0 }
0x14c1   :  { %v2901_v53 = vsub.f32 %v2821_v39, %v2896_v42  ;;  %v2898_v26 = vpop.f32.mrb[25].mxu0  ;;  %v3036_v39 = vld [vmem:[#allocation9 + $0x350] sm:$0xff]  ;;  %v5312_v42 = vpack.c.bf16 %v3048_v33, %v3046_v19  ;;  %v3200_v33 = vld [vmem:[#allocation10 + $0x2c0] sm:$0xff] }
0x14c2   :  { %v2902_v6 = vsub.f32 %v2822_v35, %v2898_v26  ;;  %v5300_v35 = vpack.c.bf16 %v3036_v39, %v3034_v32  ;;  %v3004_v32 = vrot.slane %v4258_v55, %v6103_v54  ;;  %v3206_v55 = vld [vmem:[#allocation10 + $0x2f0] sm:$0xff] }
0x14c3   :  { %v2903_v21 = vmul.f32 %v2901_v53, %v2901_v53 }
0x14c4   :  { %v2904_v5 = vmul.f32 %v2902_v6, %v2902_v6  ;;  %5301 = vmatpush1.bf16.msra.mxu0 %v5300_v35 }
0x14c5   :  { %5303 = vmatprep.subr.bf16.mxu0 %v5302_v7  ;;  %v3192_v7 = vld [vmem:[#allocation10 + $0x280] sm:$0xff] }
0x14c6   :  { %4260 = vmatprep.mubr.msk.f32.mxu1 %vm334_vm4, %v2904_v5  ;;  %v5316_v1 = vpack.c.bf16 %v3194_v22, %v3192_v7  ;;  %v3217_v7 = vld [vmem:[#allocation10 + $0x348] sm:$0xff]  ;;  %v3219_v22 = vld [vmem:[#allocation10 + $0x358] sm:$0xff] }
0x14c7   :  { %2973 = vmatmul.mubr.f32.vlgmr.msra.gmra.mrb[18].mxu1 %v2903_v21 }
0x14c8   :  { %5305 = vmatpush1.bf16.msra.mxu0 %v5304_v20  ;;  %v3197_v20 = vld [vmem:[#allocation10 + $0x2a8] sm:$0xff] }
0x14c9   :  { %5307 = vmatprep.subr.bf16.mxu0 %v5306_v48  ;;  %v3199_v48 = vld [vmem:[#allocation10 + $0x2b8] sm:$0xff] }
0x14ca   :  { %v5318_v13 = vpack.c.bf16 %v3199_v48, %v3197_v20  ;;  %v3216_v20 = vld [vmem:[#allocation10 + $0x340] sm:$0xff]  ;;  %v3218_v48 = vld [vmem:[#allocation10 + $0x350] sm:$0xff] }
0x14cc   :  { %5309 = vmatpush1.bf16.msra.mxu0 %v5308_v52  ;;  %v3201_v52 = vld [vmem:[#allocation10 + $0x2c8] sm:$0xff] }
0x14cd   :  { %5311 = vmatprep.subr.bf16.mxu0 %v5310_v60  ;;  %v3203_v60 = vld [vmem:[#allocation10 + $0x2d8] sm:$0xff] }
0x14ce   :  { %v5322_v19 = vpack.c.bf16 %v3203_v60, %v3201_v52  ;;  %v3220_v52 = vld [vmem:[#allocation10 + $0x360] sm:$0xff]  ;;  %v3222_v60 = vld [vmem:[#allocation10 + $0x370] sm:$0xff] }
0x14d0   :  { %5313 = vmatpush1.bf16.msra.mxu0 %v5312_v42  ;;  %v3202_v42 = vld [vmem:[#allocation10 + $0x2d0] sm:$0xff] }
0x14d1   :  { %5355 = vmatprep.subr.bf16.mxu0 %v6119_v12 }
0x159a   :  { %v2974_v26 = vpop.f32.mrb[18].mxu1 }
0x159b   :  { %v2975_v5 = vadd.f32 1e-05, %v2974_v26  ;;  %v2976_v21 = vpop.f32.mrb[19].mxu1  ;;  %v5324_v26 = vpack.c.bf16 %v3202_v42, %v3200_v33  ;;  %v3225_v33 = vld [vmem:[#allocation10 + $0x388] sm:$0xff]  ;;  %v3227_v42 = vld [vmem:[#allocation10 + $0x398] sm:$0xff] }
0x159c   :  { %v2977_v11 = vadd.f32 1e-05, %v2976_v21  ;;  %v3207_v21 = vld [vmem:[#allocation10 + $0x2f8] sm:$0xff] }
0x159d   :  { %5650 = vrsqrt.f32 %v2975_v5  ;;  %v3205_v5 = vld [vmem:[#allocation10 + $0x2e8] sm:$0xff] }
0x159e   :  { %5652 = vrsqrt.f32 %v2977_v11  ;;  %v5326_v11 = vpack.c.bf16 %v3207_v21, %v3205_v5  ;;  %v3224_v5 = vld [vmem:[#allocation10 + $0x380] sm:$0xff]  ;;  %v3226_v21 = vld [vmem:[#allocation10 + $0x390] sm:$0xff] }
0x15a7   :  { %v5651_v34 = vpop.eup %5650 }
0x15a8   :  { %v5653_v47 = vpop.eup %5652  ;;  %v2981_v29 = vmul.f32 %v5651_v34, %v2901_v53  ;;  %v3193_v53 = vld [vmem:[#allocation10 + $0x288] sm:$0xff] }
0x15a9   :  { %v2982_v27 = vmul.f32 %v5653_v47, %v2902_v6  ;;  %v3195_v6 = vld [vmem:[#allocation10 + $0x298] sm:$0xff]  ;;  %v3209_v34 = vld [vmem:[#allocation10 + $0x308] sm:$0xff] }
0x15aa   :  { %v2994_v39 = vmul.f32 %v2987_v0, %v2981_v29  ;;  %v5314_v2 = vpack.c.bf16 %v3195_v6, %v3193_v53  ;;  %v5328_v0 = vpack.c.bf16 %v3206_v55, %v3204_v8  ;;  %v3208_v29 = vld [vmem:[#allocation10 + $0x300] sm:$0xff]  ;;  %v3214_v6 = vld [vmem:[#allocation10 + $0x330] sm:$0xff]  ;;  %v3229_v8 = vld [vmem:[#allocation10 + $0x3a8] sm:$0xff] }
0x15ab   :  { %v2995_v35 = vmul.f32 %v2991_v45, %v2982_v27  ;;  %v3211_v45 = vld [vmem:[#allocation10 + $0x318] sm:$0xff]  ;;  %v3210_v27 = vld [vmem:[#allocation10 + $0x310] sm:$0xff]  ;;  %v3212_v53 = vld [vmem:[#allocation10 + $0x320] sm:$0xff] }
0x15ac   :  { %v6485_v40 = vadd.f32 %v3000_v61, %v2994_v39  ;;  %5315 = vmatprep.subr.bf16.mxu1 %v5314_v2  ;;  %v5330_v47 = vpack.c.bf16 %v3211_v45, %v3209_v34  ;;  %v3213_v39 = vld [vmem:[#allocation10 + $0x328] sm:$0xff]  ;;  %v3215_v61 = vld [vmem:[#allocation10 + $0x338] sm:$0xff]  ;;  %v5336_v2 = vpack.c.bf16 %v3214_v6, %v3212_v53  ;;  %v3228_v34 = vld [vmem:[#allocation10 + $0x3a0] sm:$0xff] }
0x15ad   :  { %v6483_v62 = vadd.f32 %v3004_v32, %v2995_v35  ;;  %5317 = vmatpush1.bf16.msra.mxu1 %v5316_v1  ;;  %v5332_v32 = vpack.c.bf16 %v3210_v27, %v3208_v29  ;;  %v5334_v35 = vpack.c.bf16 %v3215_v61, %v3213_v39  ;;  %v5338_v1 = vpack.c.bf16 %v3219_v22, %v3217_v7  ;;  %v3231_v55 = vld [vmem:[#allocation10 + $0x3b8] sm:$0xff]  ;;  %v3230_v45 = vld [vmem:[#allocation10 + $0x3b0] sm:$0xff]  ;;  %v4261_v29 = vld [vmem:[%s6751_s25 + $0x4] sm:$0x3] }
0x15ae   :  { %5319 = vmatprep.subr.bf16.mxu1 %v5318_v13  ;;  %v5340_v13 = vpack.c.bf16 %v3218_v48, %v3216_v20  ;;  %v3056_v27 = vrot.slane %v4261_v29, %v6106_v56 }
0x15af   :  { %4262 = vmatprep.mubr.msk.f32.mxu0 %vm334_vm4, %v6483_v62 }
0x15b0   :  { %3131 = vmatmul.mubr.f32.vlgmr.msra.gmra.mrb[26].mxu0 %v6485_v40 }
0x15b1   :  { %5357 = vmatpush1.bf16.msra.mxu0 %v6121_v15  ;;  %5321 = vmatpush1.bf16.msra.mxu1 %v5320_v41  ;;  %v5342_v41 = vpack.c.bf16 %v3223_v59, %v3221_v10 }
0x15b2   :  { %5359 = vmatprep.subr.bf16.mxu0 %v6123_v18  ;;  %5323 = vmatprep.subr.bf16.mxu1 %v5322_v19  ;;  %v5344_v19 = vpack.c.bf16 %v3222_v60, %v3220_v52 }
0x15b5   :  { %5361 = vmatpush1.bf16.msra.mxu0 %v6128_v23  ;;  %5325 = vmatpush1.bf16.msra.mxu1 %v5324_v26  ;;  %v5346_v26 = vpack.c.bf16 %v3227_v42, %v3225_v33 }
0x15b6   :  { %5363 = vmatprep.subr.bf16.mxu0 %v6131_v24  ;;  %5327 = vmatprep.subr.bf16.mxu1 %v5326_v11  ;;  %v5348_v11 = vpack.c.bf16 %v3226_v21, %v3224_v5 }
0x15b9   :  { %5365 = vmatpush1.bf16.msra.mxu0 %v6134_v30  ;;  %5329 = vmatpush1.bf16.msra.mxu1 %v5328_v0  ;;  %v5350_v0 = vpack.c.bf16 %v3231_v55, %v3229_v8 }
0x15ba   :  { %5367 = vmatprep.subr.bf16.mxu0 %v6137_v31  ;;  %5331 = vmatprep.subr.bf16.mxu1 %v5330_v47  ;;  %v5352_v47 = vpack.c.bf16 %v3230_v45, %v3228_v34 }
0x15bd   :  { %5369 = vmatpush1.bf16.msra.mxu0 %v6140_v36  ;;  %5333 = vmatpush1.bf16.msra.mxu1 %v5332_v32  ;;  %v3060_v32 = vrot.slane %v4261_v29, %v6103_v54 }
0x15be   :  { %5371 = vmatprep.subr.bf16.mxu0 %v6143_v38  ;;  %5335 = vmatprep.subr.bf16.mxu1 %v5334_v35 }
0x15c1   :  { %5373 = vmatpush1.bf16.msra.mxu0 %v6146_v43  ;;  %5337 = vmatpush1.bf16.msra.mxu1 %v5336_v2 }
0x15c2   :  { %5375 = vmatprep.subr.bf16.mxu0 %v6149_v44  ;;  %5339 = vmatprep.subr.bf16.mxu1 %v5338_v1 }
0x15c5   :  { %5377 = vmatpush1.bf16.msra.mxu0 %v6152_v49  ;;  %5341 = vmatpush1.bf16.msra.mxu1 %v5340_v13 }
0x15c6   :  { %5379 = vmatprep.subr.bf16.mxu0 %v6155_v50  ;;  %5343 = vmatprep.subr.bf16.mxu1 %v5342_v41 }
0x15c9   :  { %5381 = vmatpush1.bf16.msra.mxu0 %v6158_v57  ;;  %5345 = vmatpush1.bf16.msra.mxu1 %v5344_v19 }
0x15ca   :  { %5383 = vmatprep.subr.bf16.mxu0 %v6161_v58  ;;  %5347 = vmatprep.subr.bf16.mxu1 %v5346_v26 }
0x15cd   :  { %5385 = vmatpush1.bf16.msra.mxu0 %v6164_v3  ;;  %5349 = vmatpush1.bf16.msra.mxu1 %v5348_v11 }
0x15ce   :  { %5387 = vmatprep.subr.bf16.mxu0 %v6167_v4  ;;  %5351 = vmatprep.subr.bf16.mxu1 %v5350_v0 }
0x15d1   :  { %5389 = vmatpush1.bf16.msra.mxu0 %v6193_v14  ;;  %5353 = vmatpush1.bf16.msra.mxu1 %v5352_v47 }
0x15d2   :  { %5391 = vmatprep.subr.bf16.mxu0 %v6197_v46  ;;  %5395 = vmatprep.subr.bf16.mxu1 %v6119_v12 }
0x15d5   :  { %5393 = vmatpush1.bf16.msra.mxu0 %v6199_v51 }
0x15d6   :  { %5434 = vmatprep.subr.bf16.mxu0 %v5854_v16 }
0x1683   :  { %v3132_v39 = vpop.f32.mrb[26].mxu0 }
0x1684   :  { %v3133_v61 = vadd.f32 %v3132_v39, %v3056_v27  ;;  %v3134_v35 = vpop.f32.mrb[27].mxu0 }
0x1685   :  { %v3135_v53 = vadd.f32 %v3134_v35, %v3060_v32 }
0x1686   :  { %v3139_v6 = vmul.f32 0.70710677, %v3133_v61 }
0x1687   :  { %v3140_v2 = vmul.f32 0.70710677, %v3135_v53 }
0x1688   :  { %v3145_v7 = vand.u32 2147483647, %v3139_v6  ;;  %vm3141_vm15 = vcmp.ge.f32.partialorder %v3139_v6, 0.0 }
0x1689   :  { %v3146_v22 = vand.u32 2147483647, %v3140_v2  ;;  %vm3142_vm2 = vcmp.ge.f32.partialorder %v3140_v2, 0.0 }
0x168a   :  { %v3147_v1 = vmul.f32 0.3275911, %v3145_v7  ;;  %v3173_v12 = vsub.f32 0.0, %v3145_v7 }
0x168b   :  { %v3148_v20 = vmul.f32 0.3275911, %v3146_v22  ;;  %v3174_v10 = vsub.f32 0.0, %v3146_v22 }
0x168c   :  { %v3149_v48 = vadd.f32 1.0, %v3147_v1  ;;  %v3175_v41 = vmul.f32 %v3173_v12, %v3145_v7 }
0x168d   :  { %v3150_v13 = vadd.f32 1.0, %v3148_v20  ;;  %v3176_v19 = vmul.f32 %v3174_v10, %v3146_v22  ;;  %v3143_v10 = vsel %vm3141_vm15, 1.0, %v5857_v25 }
0x168e   :  { %5654 = vrcp.f32 %v3149_v48  ;;  %v3177_v26 = vmul.f32 1.442695, %v3175_v41 }
0x168f   :  { %5656 = vrcp.f32 %v3150_v13  ;;  %v3179_v11 = vmul.f32 1.442695, %v3176_v19  ;;  %v3144_v19 = vsel %vm3142_vm2, 1.0, %v5857_v25 }
0x1690   :  { %5658 = vpow2.f32 %v3177_v26  ;;  %v3138_v26 = vmul.f32 0.5, %v3135_v53 }
0x1691   :  { %5660 = vpow2.f32 %v3179_v11 }
0x1698   :  { %v5655_v59 = vpop.eup %5654 }
0x1699   :  { %v5657_v52 = vpop.eup %5656  ;;  %v3155_v60 = vmul.f32 1.0614054, %v5655_v59 }
0x169a   :  { %v3156_v33 = vmul.f32 1.0614054, %v5657_v52  ;;  %v5659_v22 = vpop.eup %5658 }
0x169b   :  { %v3157_v42 = vadd.f32 -1.4531521, %v3155_v60  ;;  %v5661_v20 = vpop.eup %5660 }
0x169c   :  { %v3158_v5 = vadd.f32 -1.4531521, %v3156_v33 }
0x169d   :  { %v3159_v21 = vmul.f32 %v5655_v59, %v3157_v42 }
0x169e   :  { %v3160_v8 = vmul.f32 %v5657_v52, %v3158_v5 }
0x169f   :  { %v3161_v55 = vadd.f32 1.4214138, %v3159_v21  ;;  %v3137_v21 = vmul.f32 0.5, %v3133_v61 }
0x16a0   :  { %v3162_v0 = vadd.f32 1.4214138, %v3160_v8 }
0x16a1   :  { %v3163_v34 = vmul.f32 %v5655_v59, %v3161_v55 }
0x16a2   :  { %v3164_v45 = vmul.f32 %v5657_v52, %v3162_v0  ;;  %v4266_v0 = vld [vmem:[%s6754_s6 + $0x4] sm:$0x3] }
0x16a3   :  { %v3165_v47 = vadd.f32 -0.28449672, %v3163_v34 }
0x16a4   :  { %v3166_v29 = vadd.f32 -0.28449672, %v3164_v45 }
0x16a5   :  { %v3167_v27 = vmul.f32 %v5655_v59, %v3165_v47 }
0x16a6   :  { %v3168_v32 = vmul.f32 %v5657_v52, %v3166_v29  ;;  %v3498_v29 = vrot.slane %v4266_v0, %v6106_v56 }
0x16a7   :  { %v3169_v39 = vadd.f32 0.2548296, %v3167_v27  ;;  %v3502_v27 = vrot.slane %v4266_v0, %v6103_v54  ;;  %v4067_v0 = vld [vmem:[%s5997_s8 + $0x8] sm:$0xff] }
0x16a8   :  { %v3170_v35 = vadd.f32 0.2548296, %v3168_v32 }
0x16a9   :  { %v3171_v7 = vmul.f32 %v5655_v59, %v3169_v39 }
0x16aa   :  { %v3172_v1 = vmul.f32 %v5657_v52, %v3170_v35 }
0x16ab   :  { %v3181_v48 = vmul.f32 %v5659_v22, %v3171_v7 }
0x16ac   :  { %v3182_v13 = vmul.f32 %v5661_v20, %v3172_v1  ;;  %v6614_v20 = vpop.permute.xlu1 %3526 }
0x16ad   :  { %v3183_v12 = vsub.f32 1.0, %v3181_v48 }
0x16ae   :  { %v3184_v41 = vsub.f32 1.0, %v3182_v13 }
0x16af   :  { %v3185_v60 = vmul.f32 %v3183_v12, %v3143_v10  ;;  %v4273_v10 = vld [vmem:[%s6756_s15] ss:$0 sm:$0xff] }
0x16b0   :  { %v3186_v33 = vmul.f32 %v3184_v41, %v3144_v19 }
0x16b1   :  { %v3187_v42 = vadd.f32 1.0, %v3185_v60  ;;  %v4274_v60 = vld [vmem:[%s6757_s0] ss:$0 sm:$0xff] }
0x16b2   :  { %v3188_v5 = vadd.f32 1.0, %v3186_v33 }
0x16b3   :  { %v3189_v11 = vmul.f32 %v3187_v42, %v3137_v21 }
0x16b4   :  { %v3190_v59 = vmul.f32 %v3188_v5, %v3138_v26 }
0x16b6   :  { %4264 = vmatprep.mubr.msk.f32.mxu1 %vm334_vm4, %v3190_v59 }
0x16b7   :  { %3313 = vmatmul.mubr.f32.vlgmr.msra.gmra.mrb[20].mxu1 %v3189_v11 }
0x16b8   :  { %5397 = vmatpush1.bf16.msra.mxu1 %v6121_v15 }
0x16b9   :  { %5399 = vmatprep.subr.bf16.mxu1 %v6123_v18  ;;  %v4263_v18 = vld [vmem:[%s6752_s29 + $0x4] sm:$0x3] }
0x16bc   :  { %5401 = vmatpush1.bf16.msra.mxu1 %v6128_v23 }
0x16bd   :  { %5403 = vmatprep.subr.bf16.mxu1 %v6131_v24  ;;  %v3238_v24 = vrot.slane %v4263_v18, %v6106_v56 }
0x16c0   :  { %5405 = vmatpush1.bf16.msra.mxu1 %v6134_v30 }
0x16c1   :  { %5407 = vmatprep.subr.bf16.mxu1 %v6137_v31  ;;  %v3242_v31 = vrot.slane %v4263_v18, %v6103_v54 }
0x16c4   :  { %5409 = vmatpush1.bf16.msra.mxu1 %v6140_v36 }
0x16c5   :  { %5411 = vmatprep.subr.bf16.mxu1 %v6143_v38 }
0x16c8   :  { %5413 = vmatpush1.bf16.msra.mxu1 %v6146_v43 }
0x16c9   :  { %5415 = vmatprep.subr.bf16.mxu1 %v6149_v44 }
0x16cc   :  { %5417 = vmatpush1.bf16.msra.mxu1 %v6152_v49 }
0x16cd   :  { %5419 = vmatprep.subr.bf16.mxu1 %v6155_v50 }
0x16d0   :  { %5421 = vmatpush1.bf16.msra.mxu1 %v6158_v57 }
0x16d1   :  { %5423 = vmatprep.subr.bf16.mxu1 %v6161_v58 }
0x16d4   :  { %5425 = vmatpush1.bf16.msra.mxu1 %v6164_v3 }
0x16d5   :  { %5427 = vmatprep.subr.bf16.mxu1 %v6167_v4  ;;  %v4227_v4 = vld [vmem:[%s6755_s20] ss:$0 sm:$0xff] }
0x16d6   :  { %v488_v25 = vadd.f32 %v4227_v4, %v6116_v63  ;;  %v4269_v63 = vld [vmem:[#allocation2] ss:$0 sm:$0xff] }
0x16d7   :  { %3514 = vperm.xlu0 %5589, %v4269_v63  }
0x16d8   :  { %5429 = vmatpush1.bf16.msra.mxu1 %v6193_v14 }
0x16d9   :  { %5431 = vmatprep.subr.bf16.mxu1 %v6197_v46 }
0x16dc   :  { %5433 = vmatpush1.bf16.msra.mxu1 %v6199_v51 }
0x16dd   :  { %5452 = vmatprep.subr.bf16.mxu1 %v5854_v16 }
0x1756   :  { %v6609_v35 = vpop.permute.xlu0 %3514 }
0x178a   :  { %v3314_v38 = vpop.f32.mrb[20].mxu1 }
0x178b   :  { %v3315_v44 = vadd.f32 %v3314_v38, %v3238_v24  ;;  %v3316_v50 = vpop.f32.mrb[21].mxu1 }
0x178c   :  { %v3317_v57 = vadd.f32 %v3316_v50, %v3242_v31 }
0x178d   :  { %v3319_v3 = vadd.f32 %v3315_v44, %v6485_v40 }
0x178e   :  { %v3320_v58 = vadd.f32 %v3317_v57, %v6483_v62 }
0x1790   :  { %4267 = vmatprep.mubr.msk.f32.mxu0 %vm334_vm4, %v3320_v58 }
0x1791   :  { %3393 = vmatmul.mubr.f32.vlgmr.msra.gmra.mrb[28].mxu0 %v3319_v3 }
0x1792   :  { %5436 = vmatpush3.bf16.msra.mxu0 %v6121_v15  ;;  %4376 = vmatprep.mubr.msk.f32.mxu0 %vm5855_vm1, %v5856_v17 }
0x1793   :  { %5437 = vmatprep.subr.bf16.mxu0 %v5854_v16 }
0x1796   :  { %5439 = vmatpush3.bf16.msra.mxu0 %v6128_v23 }
0x1797   :  { %5440 = vmatprep.subr.bf16.mxu0 %v5854_v16 }
0x179a   :  { %5442 = vmatpush3.bf16.msra.mxu0 %v6134_v30 }
0x179b   :  { %5443 = vmatprep.subr.bf16.mxu0 %v5854_v16 }
0x179e   :  { %5445 = vmatpush3.bf16.msra.mxu0 %v6140_v36 }
0x179f   :  { %5446 = vmatprep.subr.bf16.mxu0 %v5854_v16 }
0x17a2   :  { %5448 = vmatpush3.bf16.msra.mxu0 %v6146_v43 }
0x17a3   :  { %5449 = vmatprep.subr.bf16.mxu0 %v5854_v16 }
0x17a6   :  { %5451 = vmatpush3.bf16.msra.mxu0 %v6152_v49 }
0x17a7   :  { %5470 = vmatprep.subr.bf16.mxu0 %v5854_v16 }
0x17a9   :  { %4377 = vmatmul.mubr.msk.f32.vlgmr.msra.gmra.mrb[30].mxu0 %vm3533_vm3, %v488_v25 }
0x17aa   :  { %5472 = vmatpush3.bf16.msra.mxu0 %v6121_v15  ;;  %4430 = vmatprep.mubr.msk.f32.mxu0 %vm5855_vm1, %v5856_v17 }
0x17ab   :  { %5473 = vmatprep.subr.bf16.mxu0 %v5854_v16 }
0x17ae   :  { %5475 = vmatpush3.bf16.msra.mxu0 %v6128_v23 }
0x17af   :  { %5476 = vmatprep.subr.bf16.mxu0 %v5854_v16 }
0x17b2   :  { %5478 = vmatpush3.bf16.msra.mxu0 %v6134_v30 }
0x17b3   :  { %5479 = vmatprep.subr.bf16.mxu0 %v5854_v16 }
0x17b6   :  { %5481 = vmatpush3.bf16.msra.mxu0 %v6140_v36 }
0x17b7   :  { %5482 = vmatprep.subr.bf16.mxu0 %v5854_v16 }
0x17ba   :  { %5484 = vmatpush3.bf16.msra.mxu0 %v6146_v43 }
0x17bb   :  { %5485 = vmatprep.subr.bf16.mxu0 %v5854_v16 }
0x17be   :  { %5487 = vmatpush3.bf16.msra.mxu0 %v6152_v49 }
0x1864   :  { %v3394_v14 = vpop.f32.mrb[28].mxu0 }
0x1865   :  { %v3399_v46 = vsub.f32 %v3319_v3, %v3394_v14  ;;  %v3396_v51 = vpop.f32.mrb[29].mxu0 }
0x1866   :  { %v3400_v62 = vsub.f32 %v3320_v58, %v3396_v51 }
0x1867   :  { %v3401_v61 = vmul.f32 %v3399_v46, %v3399_v46 }
0x1868   :  { %v3402_v40 = vmul.f32 %v3400_v62, %v3400_v62 }
0x186a   :  { %4268 = vmatprep.mubr.msk.f32.mxu1 %vm334_vm4, %v3402_v40 }
0x186b   :  { %3471 = vmatmul.mubr.f32.vlgmr.msra.gmra.mrb[22].mxu1 %v3401_v61 }
0x186c   :  { %5454 = vmatpush3.bf16.msra.mxu1 %v6121_v15  ;;  %4403 = vmatprep.mubr.msk.f32.mxu1 %vm5855_vm1, %v5856_v17 }
0x186d   :  { %5455 = vmatprep.subr.bf16.mxu1 %v5854_v16 }
0x1870   :  { %5457 = vmatpush3.bf16.msra.mxu1 %v6128_v23 }
0x1871   :  { %5458 = vmatprep.subr.bf16.mxu1 %v5854_v16 }
0x1874   :  { %5460 = vmatpush3.bf16.msra.mxu1 %v6134_v30 }
0x1875   :  { %5461 = vmatprep.subr.bf16.mxu1 %v5854_v16 }
0x1878   :  { %5463 = vmatpush3.bf16.msra.mxu1 %v6140_v36 }
0x1879   :  { %5464 = vmatprep.subr.bf16.mxu1 %v5854_v16 }
0x187c   :  { %v3603_v53 = vpop.f32.mrb[30].mxu0  ;;  %5466 = vmatpush3.bf16.msra.mxu1 %v6146_v43 }
0x187d   :  { %v3607_v6 = vsub.f32 %v488_v25, %v3603_v53  ;;  %v4378_v2 = vpop.f32.mrb[31].mxu0  ;;  %5467 = vmatprep.subr.bf16.mxu1 %v5854_v16 }
0x187f   :  { %v3608_v52 = vmul.f32 %v3607_v6, %v3607_v6 }
0x1880   :  { %5469 = vmatpush3.bf16.msra.mxu1 %v6152_v49 }
0x1881   :  { %5488 = vmatprep.subr.bf16.mxu1 %v5854_v16 }
0x1883   :  { %4404 = vmatmul.mubr.msk.f32.vlgmr.msra.gmra.mrb[24].mxu1 %vm3533_vm3, %v3608_v52 }
0x1884   :  { %5490 = vmatpush3.bf16.msra.mxu1 %v6121_v15  ;;  %4457 = vmatprep.mubr.msk.f32.mxu1 %vm5855_vm1, %v5856_v17 }
0x1885   :  { %5491 = vmatprep.subr.bf16.mxu1 %v5854_v16 }
0x1888   :  { %5493 = vmatpush3.bf16.msra.mxu1 %v6128_v23 }
0x1889   :  { %5494 = vmatprep.subr.bf16.mxu1 %v5854_v16 }
0x188c   :  { %5496 = vmatpush3.bf16.msra.mxu1 %v6134_v30  ;;  %v4265_v30 = vld [vmem:[%s6753_s3 + $0x4] sm:$0x3] }
0x188d   :  { %5497 = vmatprep.subr.bf16.mxu1 %v5854_v16  ;;  %v3489_v45 = vrot.slane %v4265_v30, %v6103_v54 }
0x1890   :  { %5499 = vmatpush3.bf16.msra.mxu1 %v6140_v36  ;;  %v3485_v36 = vrot.slane %v4265_v30, %v6106_v56  ;;  %v4066_v30 = vld [vmem:[%s5997_s8] sm:$0xff] }
0x1891   :  { %5500 = vmatprep.subr.bf16.mxu1 %v5854_v16 }
0x1894   :  { %5502 = vmatpush3.bf16.msra.mxu1 %v6146_v43 }
0x1895   :  { %5503 = vmatprep.subr.bf16.mxu1 %v5854_v16 }
0x1898   :  { %5505 = vmatpush3.bf16.msra.mxu1 %v6152_v49 }
0x1899   :  { %5514 = vmatprep.subr.bf16.mxu1 %v5854_v16 }
0x193e   :  { %v3472_v15 = vpop.f32.mrb[22].mxu1 }
0x193f   :  { %v3473_v23 = vadd.f32 1e-05, %v3472_v15  ;;  %v3474_v8 = vpop.f32.mrb[23].mxu1 }
0x1940   :  { %v3475_v55 = vadd.f32 1e-05, %v3474_v8 }
0x1941   :  { %5662 = vrsqrt.f32 %v3473_v23 }
0x1942   :  { %5664 = vrsqrt.f32 %v3475_v55 }
0x194b   :  { %v5663_v34 = vpop.eup %5662 }
0x194c   :  { %v5665_v43 = vpop.eup %5664  ;;  %v3479_v47 = vmul.f32 %v5663_v34, %v3399_v46  ;;  %v5515_v34 = vpack.c.bf16 %v4067_v0, %v4066_v30 }
0x194d   :  { %v3480_v49 = vmul.f32 %v5665_v43, %v3400_v62 }
0x194e   :  { %v3492_v32 = vmul.f32 %v3485_v36, %v3479_v47  ;;  %v4068_v36 = vld [vmem:[%s5997_s8 + $0x10] sm:$0xff]  ;;  %v4070_v47 = vld [vmem:[%s5997_s8 + $0x20] sm:$0xff] }
0x194f   :  { %v3493_v39 = vmul.f32 %v3489_v45, %v3480_v49  ;;  %v4069_v45 = vld [vmem:[%s5997_s8 + $0x18] sm:$0xff] }
0x1950   :  { %v3505_v7 = vadd.f32 %v3498_v29, %v3492_v32  ;;  %v5518_v43 = vpack.c.bf16 %v4069_v45, %v4068_v36  ;;  %v4071_v29 = vld [vmem:[%s5997_s8 + $0x28] sm:$0xff]  ;;  %v4073_v32 = vld [vmem:[%s5997_s8 + $0x38] sm:$0xff] }
0x1951   :  { %v6611_v22 = vadd.f32 %v3502_v27, %v3493_v39  ;;  %v5521_v49 = vpack.c.bf16 %v4071_v29, %v4070_v47  ;;  %v4072_v27 = vld [vmem:[%s5997_s8 + $0x30] sm:$0xff] }
0x1952   :  { %v3517_v1 = vmul.f32 %v6609_v35, %v3505_v7  ;;  %v5524_v39 = vpack.c.bf16 %v4073_v32, %v4072_v27  ;;  %v4074_v7 = vld [vmem:[%s5997_s8 + $0x40] sm:$0xff] }
0x1954   :  { %v6617_v48 = vadd.f32 %v6614_v20, %v3517_v1  ;;  %v4075_v1 = vld [vmem:[%s5997_s8 + $0x48] sm:$0xff] }
0x1956   :  { %v3678_v56 = vpop.f32.mrb[24].mxu1  ;;  %4431 = vmatmul.mubr.msk.f32.vlgmr.msra.gmra.mrb[32].mxu0 %vm3533_vm3, %v6617_v48 }
0x1957   :  { %v3679_v54 = vadd.f32 1e-05, %v3678_v56  ;;  %v4405_v13 = vpop.f32.mrb[25].mxu1  ;;  %4057 = vmatprep.mubr.f32.mxu0 %v5856_v17  ;;  %v5676_v17 = vld [vmem:[%s5874_s9] sm:$0xff]  ;;  %s6758_s9 = sld [smem:[#allocation27_spill]]  ;;  %v5527_v56 = vpack.c.bf16 %v4075_v1, %v4074_v7 }
0x1958   :  { %v4167_v26 = vadd.f32 1e-10, %v5676_v17  ;;  %v4077_v13 = vld [vmem:[%s5997_s8 + $0x58] sm:$0xff] }
0x1959   :  { %5666 = vrsqrt.f32 %v3679_v54  ;;  %v4076_v54 = vld [vmem:[%s5997_s8 + $0x50] sm:$0xff] }
0x195d   :  { %v3983_v51 = vld [vmem:[%s6758_s9 + $0x8] sm:$0xff]  ;;  %v3985_v62 = vld [vmem:[%s6758_s9 + $0x18] sm:$0xff]  ;;  %v3982_v40 = vld [vmem:[%s6758_s9] sm:$0xff] }
0x195e   :  { %v5506_v61 = vpack.c.bf16 %v3985_v62, %v3983_v51  ;;  %v3984_v53 = vld [vmem:[%s6758_s9 + $0x10] sm:$0xff]  ;;  %v3989_v2 = vld [vmem:[%s6758_s9 + $0x38] sm:$0xff]  ;;  %v3986_v23 = vld [vmem:[%s6758_s9 + $0x20] sm:$0xff] }
0x195f   :  { %v5508_v52 = vpack.c.bf16 %v3984_v53, %v3982_v40  ;;  %v3988_v8 = vld [vmem:[%s6758_s9 + $0x30] sm:$0xff] }
0x1960   :  { %5507 = vmatprep.subr.bf16.mxu0 %v5506_v61  ;;  %v5512_v55 = vpack.c.bf16 %v3988_v8, %v3986_v23 }
0x1961   :  { %5509 = vmatpush1.bf16.msra.mxu0 %v5508_v52 }
0x1963   :  { %v5667_v12 = vpop.eup %5666 }
0x1964   :  { %v3683_v41 = vmul.f32 %v5667_v12, %v3607_v6  ;;  %v3987_v6 = vld [vmem:[%s6758_s9 + $0x28] sm:$0xff]  ;;  %v5530_v12 = vpack.c.bf16 %v4077_v13, %v4076_v54 }
0x1965   :  { %v5510_v15 = vpack.c.bf16 %v3989_v2, %v3987_v6 }
0x1966   :  { %v3690_v19 = vmul.f32 %v4273_v10, %v3683_v41  ;;  %v4079_v41 = vld [vmem:[%s5997_s8 + $0x68] sm:$0xff] }
0x1967   :  { %5511 = vmatprep.subr.bf16.mxu0 %v5510_v15 }
0x1968   :  { %v6624_v33 = vadd.f32 %v4274_v60, %v3690_v19  ;;  %5513 = vmatpush1.bf16.msra.mxu0 %v5512_v55  ;;  %v4080_v19 = vld [vmem:[%s5997_s8 + $0x70] sm:$0xff] }
0x196a   :  { %3854 = vrot.lane.b32.xlu0 %v6624_v33, %s5858_s19  ;;  %v3875_v42 = vmul.f32 -0.5, %v6624_v33  ;;  %v3881_v63 = vmul.f32 0.8660254, %v6624_v33  ;;  %v6659_v14 = vmul.f32 0.0, %v6624_v33  ;;  %v3891_v46 = vmul.f32 -0.8660254, %v6624_v33 }
0x196c   :  { %3877 = vrot.lane.b32.xlu1 %v3875_v42, %s5858_s19  ;;  %v3852_v47 = vsub.f32 0.0, %v6659_v14 }
0x196e   :  { %3887 = vrot.lane.b32.xlu0 %v3875_v42, %s5859_s30  ;;  %v4081_v42 = vld [vmem:[%s5997_s8 + $0x78] sm:$0xff] }
0x196f   :  { %v5536_v17 = vpack.c.bf16 %v4081_v42, %v4080_v19 }
0x1972   :  { %3863 = vrot.lane.b32.xlu0 %v6624_v33, %s5859_s30 }
0x1976   :  { %4170 = vperm.xlu0 %5589, %v4167_v26   ;;  %v4082_v26 = vld [vmem:[%s5997_s8 + $0x80] sm:$0xff] }
0x19dc   :  { %v3855_v62 = vpop.permute.xlu0 %3854 }
0x19dd   :  { %v3857_v7 = vadd.f32 %v3855_v62, %v6624_v33 }
0x19e0   :  { %v3888_v30 = vpop.permute.xlu0 %3887 }
0x1a29   :  { %v3767_v5 = vpop.f32.mrb[32].mxu0 }
0x1a2a   :  { %v3771_v21 = vsub.f32 %v6617_v48, %v3767_v5  ;;  %v4432_v59 = vpop.f32.mrb[33].mxu0  ;;  %v4083_v5 = vld [vmem:[%s5997_s8 + $0x88] sm:$0xff] }
0x1a2b   :  { %v3878_v59 = vpop.permute.xlu1 %3877 }
0x1a2c   :  { %v3772_v11 = vmul.f32 %v3771_v21, %v3771_v21  ;;  %v3880_v0 = vadd.f32 %v3878_v59, %v6624_v33 }
0x1a2e   :  { %4458 = vmatmul.mubr.msk.f32.vlgmr.msra.gmra.mrb[26].mxu1 %vm3533_vm3, %v3772_v11  ;;  %v3890_v29 = vadd.f32 %v3888_v30, %v3880_v0 }
0x1a2f   :  { %5516 = vmatpush1.bf16.msra.mxu1 %v5515_v34 }
0x1a30   :  { %5517 = vmatprep.subr.bf16.mxu1 %v5854_v16 }
0x1a33   :  { %5519 = vmatpush1.bf16.msra.mxu1 %v5518_v43 }
0x1a34   :  { %5520 = vmatprep.subr.bf16.mxu1 %v5854_v16 }
0x1a37   :  { %5522 = vmatpush1.bf16.msra.mxu1 %v5521_v49  ;;  %v3864_v49 = vpop.permute.xlu0 %3863 }
0x1a38   :  { %5523 = vmatprep.subr.bf16.mxu1 %v5854_v16 }
0x1a3b   :  { %5525 = vmatpush1.bf16.msra.mxu1 %v5524_v39 }
0x1a3c   :  { %5526 = vmatprep.subr.bf16.mxu1 %v5854_v16 }
0x1a3f   :  { %5528 = vmatpush1.bf16.msra.mxu1 %v5527_v56 }
0x1a40   :  { %5529 = vmatprep.subr.bf16.mxu1 %v5854_v16 }
0x1a43   :  { %5531 = vmatpush1.bf16.msra.mxu1 %v5530_v12  ;;  %v3897_v12 = vmul.f32 %v3890_v29, %v3890_v29 }
0x1a44   :  { %5532 = vmatprep.subr.bf16.mxu1 %v5854_v16 }
0x1b01   :  { %v3842_v18 = vpop.f32.mrb[26].mxu1 }
0x1b02   :  { %v3843_v24 = vadd.f32 1e-05, %v3842_v18  ;;  %v4459_v31 = vpop.f32.mrb[27].mxu1 }
0x1b04   :  { %5668 = vrsqrt.f32 %v3843_v24 }
0x1b0e   :  { %v5669_v38 = vpop.eup %5668 }
0x1b0f   :  { %v3847_v44 = vmul.f32 %v5669_v38, %v3771_v21  ;;  %v5539_v21 = vpack.c.bf16 %v4083_v5, %v4082_v26 }
0x1b11   :  { %v3848_v50 = vmul.f32 %v4273_v10, %v3847_v44  ;;  %v4078_v10 = vld [vmem:[%s5997_s8 + $0x60] sm:$0xff] }
0x1b13   :  { %v6636_v57 = vadd.f32 %v4274_v60, %v3848_v50  ;;  %v5533_v60 = vpack.c.bf16 %v4079_v41, %v4078_v10  ;;  %v3866_v10 = vadd.f32 %v3864_v49, %v3857_v7 }
0x1b15   :  { %3912 = vrot.lane.b32.xlu1 %v6636_v57, %s5858_s19  ;;  %v3933_v58 = vmul.f32 -0.5, %v6636_v57  ;;  %v3939_v3 = vmul.f32 0.8660254, %v6636_v57  ;;  %v6647_v4 = vmul.f32 0.0, %v6636_v57  ;;  %v3949_v25 = vmul.f32 -0.8660254, %v6636_v57  ;;  %5534 = vmatpush1.bf16.msra.mxu1 %v5533_v60 }
0x1b16   :  { %5535 = vmatprep.subr.bf16.mxu1 %v5854_v16 }
0x1b19   :  { %3921 = vrot.lane.b32.xlu1 %v6636_v57, %s5859_s30  ;;  %5537 = vmatpush1.bf16.msra.mxu1 %v5536_v17 }
0x1b1a   :  { %5538 = vmatprep.subr.bf16.mxu1 %v5854_v16 }
0x1b1d   :  { %3935 = vrot.lane.b32.xlu1 %v3933_v58, %s5858_s19  ;;  %5540 = vmatpush1.bf16.msra.mxu1 %v5539_v21  ;;  %v3871_v21 = vmul.f32 %v3866_v10, %v3866_v10 }
0x1b1e   :  { %5541 = vmatprep.subr.bf16.mxu1 %v5854_v16 }
0x1b21   :  { %3941 = vrot.lane.b32.xlu1 %v3939_v3, %s5858_s19 }
0x1b25   :  { %3917 = vrot.lane.b32.xlu1 %v6647_v4, %s5858_s19 }
0x1b29   :  { %3945 = vrot.lane.b32.xlu1 %v3933_v58, %s5859_s30  ;;  %v3910_v58 = vsub.f32 0.0, %v6647_v4 }
0x1b2d   :  { %3951 = vrot.lane.b32.xlu1 %v3949_v25, %s5859_s30 }
0x1b31   :  { %3925 = vrot.lane.b32.xlu1 %v6647_v4, %s5859_s30 }
0x1b35   :  { %3883 = vrot.lane.b32.xlu1 %v3881_v63, %s5858_s19 }
0x1b39   :  { %3859 = vrot.lane.b32.xlu1 %v6659_v14, %s5858_s19 }
0x1b3d   :  { %3893 = vrot.lane.b32.xlu1 %v3891_v46, %s5859_s30 }
0x1b41   :  { %3867 = vrot.lane.b32.xlu1 %v6659_v14, %s5859_s30 }
0x1b87   :  { %v3913_v11 = vpop.permute.xlu1 %3912 }
0x1b88   :  { %v3915_v46 = vadd.f32 %v3913_v11, %v6636_v57 }
0x1b8b   :  { %v3922_v18 = vpop.permute.xlu1 %3921 }
0x1b8c   :  { %v3924_v40 = vadd.f32 %v3922_v18, %v3915_v46 }
0x1b8e   :  { %v3929_v15 = vmul.f32 %v3924_v40, %v3924_v40 }
0x1b8f   :  { %v3936_v24 = vpop.permute.xlu1 %3935 }
0x1b90   :  { %v3938_v50 = vadd.f32 %v3936_v24, %v6636_v57 }
0x1b93   :  { %v3942_v31 = vpop.permute.xlu1 %3941 }
0x1b94   :  { %v3944_v3 = vsub.f32 %v3910_v58, %v3942_v31 }
0x1b97   :  { %v3918_v38 = vpop.permute.xlu1 %3917 }
0x1b98   :  { %v3920_v16 = vsub.f32 %v3910_v58, %v3918_v38 }
0x1b9b   :  { %v3946_v44 = vpop.permute.xlu1 %3945 }
0x1b9c   :  { %v3948_v25 = vadd.f32 %v3946_v44, %v3938_v50 }
0x1b9e   :  { %v3955_v61 = vmul.f32 %v3948_v25, %v3948_v25 }
0x1b9f   :  { %v3952_v63 = vpop.permute.xlu1 %3951 }
0x1ba0   :  { %v3954_v51 = vsub.f32 %v3944_v3, %v3952_v63 }
0x1ba2   :  { %v3956_v53 = vmul.f32 %v3954_v51, %v3954_v51 }
0x1ba3   :  { %v3926_v6 = vpop.permute.xlu1 %3925 }
0x1ba4   :  { %v3957_v2 = vadd.f32 %v3956_v53, %v3955_v61  ;;  %v3928_v52 = vsub.f32 %v3920_v16, %v3926_v6 }
0x1ba6   :  { %v3958_v23 = vmul.f32 0.33333334, %v3957_v2  ;;  %v3930_v8 = vmul.f32 %v3928_v52, %v3928_v52  ;;  %v4084_v52 = vld [vmem:[%s5997_s8 + $0x90] sm:$0xff] }
0x1ba7   :  { %v3884_v55 = vpop.permute.xlu1 %3883 }
0x1ba8   :  { %v3931_v4 = vadd.f32 %v3930_v8, %v3929_v15  ;;  %v3962_v36 = vmul.f32 -1.0, %v3958_v23  ;;  %v3886_v39 = vsub.f32 %v3852_v47, %v3884_v55  ;;  %v4085_v15 = vld [vmem:[%s5997_s8 + $0x98] sm:$0xff]  ;;  %v3518_v8 = vmul.f32 %v6609_v35, %v6611_v22  ;;  %s5860_s8 = smov [#allocation13]  }
0x1ba9   :  { %s4184_s18 = sshll.u32 %s5860_s8, 4  ;;  %s4185_s18 = int_to_ptr.vmem [resolvable:$true] %s4184_s18 }
0x1baa   :  { %v3932_v34 = vmul.f32 0.33333334, %v3931_v4  ;;  %v3530_v30 = vadd.f32 %v6614_v20, %v3518_v8  ;;  %s5787_s23 = scalar_lea.vmem %s4185_s18, 128  ;;  %p5792_p13 = scmp.lt.s32.totalorder %s4185_s18, %s4185_s18 }
0x1bab   :  { %v3860_v57 = vpop.permute.xlu1 %3859  ;;  %p5788_p12 = scmp.ne.s32.totalorder %s4185_s18, %s5787_s23  ;;  %p5793_p0 = scmp.lt.s32.totalorder %s5787_s23, %s5787_s23 }
0x1bac   :  { %v3959_v45 = vadd.f32 %v3958_v23, %v3932_v34  ;;  %v3963_v43 = vadd.f32 %v3962_v36, %v3932_v34  ;;  %v3862_v19 = vsub.f32 %v3852_v47, %v3860_v57  ;;  %v5542_v23 = vpack.c.bf16 %v4085_v15, %v4084_v52  ;;  %v4171_v34 = vpop.permute.xlu0 %4170  ;;  %v4278_v57 = vld [vmem:[%s6002_s12] ss:$0 sm:$0xff] }
0x1bad   :  { %p5794_p1 = por %p5793_p0, %p5792_p13 }
0x1bae   :  { %v3960_v27 = vmul.f32 0.5, %v3959_v45  ;;  %v3964_v32 = vmul.f32 0.5, %v3963_v43  ;;  %5543 = vmatpush1.bf16.msra.mxu1 %v5542_v23 }
0x1baf   :  { %v3894_v1 = vpop.permute.xlu1 %3893  ;;  %p5795_p2 = pnand %p5794_p1, %p5788_p12 }
0x1bb0   :  { %v3961_v56 = vmax.f32 %v3960_v27, 0.0  ;;  %v3965_v54 = vmax.f32 %v3964_v32, 0.0  ;;  %v3896_v13 = vsub.f32 %v3886_v39, %v3894_v1 }
0x1bb2   :  { %v3967_v41 = vmul.f32 %v3961_v56, %v3961_v56  ;;  %v3970_v60 = vmul.f32 %v3965_v54, %v3965_v54  ;;  %v3898_v42 = vmul.f32 %v3896_v13, %v3896_v13 }
0x1bb3   :  { %v3868_v17 = vpop.permute.xlu1 %3867 }
0x1bb4   :  { %v3971_v26 = vadd.f32 %v3970_v60, %v3967_v41  ;;  %v3899_v14 = vadd.f32 %v3898_v42, %v3897_v12  ;;  %v3870_v5 = vsub.f32 %v3862_v19, %v3868_v17 }
0x1bb6   :  { %v3900_v59 = vmul.f32 0.33333334, %v3899_v14  ;;  %v3872_v11 = vmul.f32 %v3870_v5, %v3870_v5  ;;  %v3972_v18 = vadd.f32 0.001, %v3971_v26 }
0x1bb8   :  { %v3873_v24 = vadd.f32 %v3872_v11, %v3871_v21  ;;  %v3904_v33 = vmul.f32 -1.0, %v3900_v59  ;;  %5670 = vrcp.f32 %v3972_v18 }
0x1bba   :  { %v3874_v31 = vmul.f32 0.33333334, %v3873_v24 }
0x1bbc   :  { %v3901_v38 = vadd.f32 %v3900_v59, %v3874_v31  ;;  %v3905_v44 = vadd.f32 %v3904_v33, %v3874_v31 }
0x1bbe   :  { %v3902_v50 = vmul.f32 0.5, %v3901_v38  ;;  %v3906_v58 = vmul.f32 0.5, %v3905_v44 }
0x1bc0   :  { %v3903_v3 = vmax.f32 %v3902_v50, 0.0  ;;  %v3907_v25 = vmax.f32 %v3906_v58, 0.0 }
0x1bc2   :  { %v3966_v63 = vmul.f32 %v3961_v56, %v3903_v3  ;;  %v3968_v46 = vmul.f32 %v3965_v54, %v3907_v25  ;;  %v5671_v62 = vpop.eup %5670 }
0x1bc4   :  { %v3969_v51 = vadd.f32 %v3968_v46, %v3966_v63 }
0x1bc6   :  { %v3974_v40 = vmul.f32 %v5671_v62, %v3969_v51 }
0x1bc8   :  { %5672 = vrsqrt.f32 %v3974_v40  ;;  %vm3977_vm1 = vcmp.eq.f32.partialorder %v3974_v40, inf  ;;  %v3980_v53 = vand.u32 2147483648, %v3974_v40  ;;  %vm3979_vm5 = vcmp.eq.f32.partialorder %v3974_v40, 0.0 }
0x1bc9   :  { %5674 = vrcp.f32 %v4171_v34 }
0x1bd2   :  { %v5673_v16 = vpop.eup %5672 }
0x1bd3   :  { %v3976_v61 = vmul.f32 %v5673_v16, %v3974_v40  ;;  %v5675_v49 = vpop.eup %5674 }
0x1bd5   :  { %v3978_v6 = vsel %vm3977_vm1, %v3974_v40, %v3976_v61 }
0x1bd6   :  { %v3981_v2 = vsel %vm3979_vm5, %v3980_v53, %v3978_v6 }
0x1bd7   :  { %4277 = vmatmul.mubr.msk.f32.vlgmr.msra.gmra.mrb[34].mxu0 %vm334_vm4, %v3981_v2 }
0x1caa   :  { %v4059_v55 = vpop.f32.mrb[34].mxu0 }
0x1cab   :  { %v4061_v4 = vpop.f32.mrb[35].mxu0  ;;  %v4064_v36 = vmul.f32 %v4059_v55, %v6617_v48 }
0x1cac   :  { %v4065_v0 = vmul.f32 %v4061_v4, %v3530_v30 }
0x1cae   :  { %4279 = vmatprep.mubr.msk.f32.mxu1 %vm334_vm4, %v4065_v0 }
0x1caf   :  { %4161 = vmatmul.mubr.f32.vlgmr.msra.gmra.mrb[28].mxu1 %v4064_v36 }
0x1d82   :  { %v4162_v45 = vpop.f32.mrb[28].mxu1 }
0x1d83   :  { %v4163_v43 = vadd.f32 %v4278_v57, %v4162_v45  ;;  %v4164_v47 = vpop.f32.mrb[29].mxu1 }
0x1d85   :  { %v4166_v29 = vsub.f32 %v4163_v43, %v6087_v37 }
0x1d87   :  { %v4174_v35 = vmul.f32 %v5675_v49, %v4166_v29 }
0x1d89   :  { %v4175_v22 = vmul.f32 %v4174_v35, %v6080_v28 }
0x1d8b   :  { %v4176_v20 = vadd.f32 %v4175_v22, %v6068_v9 }
0x1d8d   :  { %4177 = vst.msk [vmem:[#allocation13] sm:$0xff] %vm196_vm0, %v4176_v20 }
0x1d8e   :  { %5798 = shalt.err (!%p5795_p2)
}
0x1d8f   :  { %s5799_s12 = scalar_lea.hbm %s6007_s27, 128 }
0x1d90   :  { %p5800_p3 = scmp.ne.s32.totalorder %s6007_s27, %s5799_s12  ;;  %p5803_p4 = scmp.lt.u32.totalorder %s5799_s12, %s6007_s27 }
0x1d92   :  { %p5805_p5 = pnand %p5803_p4, %p5800_p3 }
0x1d94   :  { %5808 = shalt.err (!%p5805_p5)
}
0x1d95   :  { %4187 = dma.vmem_to_hbm [thread:$0]  %s4185_s18, 128, %s6007_s27, [#allocation6]  }
0x1d96   :  { %5815 = dma.done.wait [#allocation6], 128  }
0x1d97   :  { %5816 = vsyncadd [#allocation6], 4294967168 }
0x1d98   :  { %4191 = vsyncpa [#allocation5], 1 }
0x1d99   :  { %4192 = vsyncpa [#allocation8], 1 }
0x1d9a   :  { %4193 = vsyncpa [#allocation11], 1 }
0x1d9b   :  { %4194 = vsyncpa [#allocation6], 1 }

</bundles_post_ra>
